<compile_context>
chip_gen: v7x
topology: tpu7x:2x2x1
jax: 0.10.0
libtpu: 0.0.40
codegen_flags: <defaults>
</compile_context>

<pallas_src>
import functools
import math

import jax
import jax.numpy as jnp
from jax.experimental import pallas as pl
from jax.experimental.pallas import tpu as pltpu


# -----------------------------------------------------------------------------
# Pallas kernel: one batch tile (B_TILE elements) per grid step.
# -----------------------------------------------------------------------------
def _hypernet_kernel(ent_ref, mrow_ref, mcol_ref,
                     w1_ref, b1_ref,              # fc1 (entity_dim -> hyp) + bias
                     wq_ref, wk_ref, wv_ref,      # per-head in_trans (H, hyp, hd)
                     wo_ref, bo_ref,              # per-head out_trans (H, hd, hyp) + bias
                     w2_ref, b2_ref,              # fc2 (hyp -> mix) + bias
                     o_ref,
                     *, n_heads):
    B, ne, in_dim = ent_ref.shape
    hyp = w1_ref.shape[1]
    hd = hyp // n_heads

    # --- fc1 + ReLU on the flattened batch tile -------------------------------
    x = ent_ref[...].reshape(B * ne, in_dim)
    x1 = jnp.dot(x, w1_ref[...], preferred_element_type=jnp.float32) + b1_ref[...]
    x1 = jnp.maximum(x1, 0.0)                                   # (B*ne, hyp)

    # --- additive attention bias (built once per tile) -------------------------
    # -1e30 (or -2e30) wherever the query entity OR the key entity is unavailable.
    # Rows whose query entity is masked produce garbage-but-finite attention
    # outputs that are zeroed by the post-mask below, matching the reference's
    # (-inf -> NaN -> 0 -> post-mask) behaviour for the rows that are kept.
    m_row = mrow_ref[...]                                       # (B, ne)
    m_col = mcol_ref[...].reshape(B, ne, 1)                     # (B, ne, 1)
    bias = (m_col + m_row[:, None, :]) * jnp.float32(-1e30)     # (B, ne, ne)

    scale = jnp.float32(1.0 / math.sqrt(hd))
    x2 = jnp.zeros((B * ne, hyp), dtype=jnp.float32)
    for h in range(n_heads):                                    # static, small
        qh = jnp.dot(x1, wq_ref[h], preferred_element_type=jnp.float32)
        kh = jnp.dot(x1, wk_ref[h], preferred_element_type=jnp.float32)
        vh = jnp.dot(x1, wv_ref[h], preferred_element_type=jnp.float32)
        qh = qh.reshape(B, ne, hd)
        kh = kh.reshape(B, ne, hd)
        vh = vh.reshape(B, ne, hd)

        logits = jnp.einsum("bqd,bkd->bqk", qh, kh,
                            preferred_element_type=jnp.float32) * scale + bias
        mx = jnp.max(logits, axis=-1, keepdims=True)
        p = jnp.exp(logits - mx)                                # masked -> exact 0
        attn = p * (1.0 / jnp.sum(p, axis=-1, keepdims=True))
        ho = jnp.einsum("bqk,bkd->bqd", attn, vh,
                        preferred_element_type=jnp.float32)     # (B, ne, hd)

        # out_trans accumulated per head (no concat): x2 += ho @ wo[h*hd:(h+1)*hd]
        x2 = x2 + jnp.dot(ho.reshape(B * ne, hd), wo_ref[h],
                          preferred_element_type=jnp.float32)

    # --- out_trans bias + post-mask, fc2 + final mask ---------------------------
    keep = mcol_ref[...] < 0.5                                  # (B*ne, 1) bool
    x2 = jnp.where(keep, x2 + bo_ref[...], 0.0)
    x3 = jnp.dot(x2, w2_ref[...], preferred_element_type=jnp.float32) + b2_ref[...]
    x3 = jnp.where(keep, x3, 0.0)
    o_ref[...] = x3.astype(o_ref.dtype)


# -----------------------------------------------------------------------------
# AttentionHyperNet wrapper (batch-tiled pallas_call)
# -----------------------------------------------------------------------------
def attention_hypernet_forward(entities, entity_mask, params, *, n_agents, n_heads,
                               mode="matrix", b_tile=128):
    """entities: (bs, ne, entity_dim); entity_mask: (bs, ne), 1.0 == unavailable."""
    w1, b1, wqkv, wo, bo, w2, b2 = params
    bs, ne, in_dim = entities.shape
    hyp = w1.shape[1]
    mix = w2.shape[1]
    hd = hyp // n_heads

    # --- batch tiling / padding -------------------------------------------------
    b_tile = int(b_tile)
    if b_tile >= bs:
        b_tile = bs                               # single block == full array dims
    else:
        b_tile = ((b_tile + 7) // 8) * 8          # keep leading block dim 8-aligned
        if b_tile >= bs:
            b_tile = bs
    bs_p = ((bs + b_tile - 1) // b_tile) * b_tile

    ents = entities.astype(jnp.float32)
    mask = entity_mask.astype(jnp.float32)
    if bs_p != bs:
        pad = bs_p - bs
        ents = jnp.concatenate(
            [ents, jnp.zeros((pad, ne, in_dim), jnp.float32)], axis=0)
        mask = jnp.concatenate(
            [mask, jnp.ones((pad, ne), jnp.float32)], axis=0)   # padded rows masked

    # --- parameter / mask prep (once, outside the kernel) -----------------------
    mask_col = mask.reshape(bs_p * ne, 1)                       # column-shaped copy
    b1_2d = b1.reshape(1, hyp).astype(jnp.float32)
    bo_2d = bo.reshape(1, hyp).astype(jnp.float32)
    b2_2d = b2.reshape(1, mix).astype(jnp.float32)

    wq = wqkv[:, 0 * hyp:1 * hyp]
    wk = wqkv[:, 1 * hyp:2 * hyp]
    wv = wqkv[:, 2 * hyp:3 * hyp]
    wq_h = wq.reshape(hyp, n_heads, hd).transpose(1, 0, 2).astype(jnp.float32)  # (H,hyp,hd)
    wk_h = wk.reshape(hyp, n_heads, hd).transpose(1, 0, 2).astype(jnp.float32)
    wv_h = wv.reshape(hyp, n_heads, hd).transpose(1, 0, 2).astype(jnp.float32)
    wo_h = wo.reshape(n_heads, hd, hyp).astype(jnp.float32)                     # (H,hd,hyp)
    w1f = w1.astype(jnp.float32)
    w2f = w2.astype(jnp.float32)

    def _full(arr):
        nd = arr.ndim
        return pl.BlockSpec(arr.shape, lambda b, _nd=nd: (0,) * _nd)

    kernel = functools.partial(_hypernet_kernel, n_heads=n_heads)
    out = pl.pallas_call(
        kernel,
        out_shape=jax.ShapeDtypeStruct((bs_p * ne, mix), jnp.float32),
        grid_spec=pltpu.PrefetchScalarGridSpec(
            num_scalar_prefetch=0,
            grid=(bs_p // b_tile,),
            in_specs=[
                pl.BlockSpec((b_tile, ne, in_dim), lambda b: (b, 0, 0)),
                pl.BlockSpec((b_tile, ne), lambda b: (b, 0)),
                pl.BlockSpec((b_tile * ne, 1), lambda b: (b, 0)),
                _full(w1f), _full(b1_2d),
                _full(wq_h), _full(wk_h), _full(wv_h),
                _full(wo_h), _full(bo_2d),
                _full(w2f), _full(b2_2d),
            ],
            out_specs=pl.BlockSpec((b_tile * ne, mix), lambda b: (b, 0)),
        ),
        compiler_params=pltpu.CompilerParams(dimension_semantics=("parallel",)),
    )(ents, mask, mask_col,
      w1f, b1_2d, wq_h, wk_h, wv_h, wo_h, bo_2d, w2f, b2_2d)

    x3 = out.reshape(bs_p, ne, mix)[:bs, :n_agents, :]          # keep agent rows
    if mode == "vector":
        return x3.mean(axis=1)
    elif mode == "alt_vector":
        return x3.mean(axis=2)
    elif mode == "scalar":
        return x3.mean(axis=(1, 2))
    return x3  # 'matrix'


# -----------------------------------------------------------------------------
# FlexQMixer forward (4 hypernets via the Pallas kernel + mixing math)
# -----------------------------------------------------------------------------
def flex_qmixer_forward(agent_qs, entities, entity_mask, hyper_params, *,
                        n_agents, n_heads, softmax_mixing_weights=False, b_tile=128):
    """agent_qs: (bs, max_t, n_agents); entities: (bs, max_t, ne, ed);
    entity_mask: (bs, max_t, ne).  Returns q_tot: (bs, max_t, 1)."""
    bs, max_t, ne, ed = entities.shape
    ents = entities.reshape(bs * max_t, ne, ed)
    mask = entity_mask.reshape(bs * max_t, ne)

    hn = functools.partial(attention_hypernet_forward, ents, mask,
                           n_agents=n_agents, n_heads=n_heads, b_tile=b_tile)
    w1 = hn(hyper_params["w1"], mode="matrix")          # (B, n_agents, embed)
    w_final = hn(hyper_params["w_final"], mode="vector")  # (B, embed)
    b1 = hn(hyper_params["b1"], mode="vector")          # (B, embed)
    v = hn(hyper_params["v"], mode="scalar")            # (B,)

    qs = agent_qs.reshape(bs * max_t, 1, n_agents).astype(jnp.float32)
    if softmax_mixing_weights:
        w1 = jax.nn.softmax(w1, axis=-1)
        w_final = jax.nn.softmax(w_final, axis=-1)
    else:
        w1 = jnp.abs(w1)
        w_final = jnp.abs(w_final)

    # TODO(synk): imagine_groups (REFIL imagined-group attn_mask override) is not implemented.
    # TODO(synk): the per-timestep mixing below is O(n_agents*embed) scalar work per
    # sample; it stays in plain JAX (no benefit from a Pallas kernel).
    hidden = jax.nn.elu(jnp.matmul(qs, w1) + b1[:, None, :])          # (B, 1, embed)
    y = jnp.matmul(hidden, w_final[:, :, None]) + v[:, None, None]    # (B, 1, 1)
    return y.reshape(bs, max_t, 1)


# -----------------------------------------------------------------------------
# Pure-JAX references (mirror the PyTorch forward semantics)
# -----------------------------------------------------------------------------
def reference_forward(entities, entity_mask, params, *, n_agents, n_heads):
    w1, b1, wqkv, wo, bo, w2, b2 = params
    bs, ne, _ = entities.shape
    hyp = w1.shape[1]
    hd = hyp // n_heads

    x1 = jax.nn.relu(entities @ w1 + b1)
    mask = entity_mask.astype(jnp.float32)
    agent_mask = mask[:, :n_agents]
    attn_mask = 1.0 - jnp.einsum("ba,be->bae", 1.0 - agent_mask, 1.0 - mask)

    qkv = x1 @ wqkv
    q = qkv[:, :n_agents, 0 * hyp:1 * hyp].reshape(bs, n_agents, n_heads, hd).transpose(0, 2, 1, 3)
    k = qkv[:, :, 1 * hyp:2 * hyp].reshape(bs, ne, n_heads, hd).transpose(0, 2, 1, 3)
    v = qkv[:, :, 2 * hyp:3 * hyp].reshape(bs, ne, n_heads, hd).transpose(0, 2, 1, 3)

    logits = jnp.einsum("bhqd,bhkd->bhqk", q, k) / jnp.sqrt(jnp.float32(hd))
    masked = jnp.where(attn_mask[:, None] > 0.5, -jnp.inf, logits)
    w = jax.nn.softmax(masked, axis=-1)
    w = jnp.where(jnp.isnan(w), 0.0, w)
    attn_out = jnp.einsum("bhqk,bhkd->bhqd", w, v).transpose(0, 2, 1, 3).reshape(bs, n_agents, hyp)

    x2 = attn_out @ wo + bo
    x2 = jnp.where(agent_mask[..., None] > 0.5, 0.0, x2)
    x3 = x2 @ w2 + b2
    x3 = jnp.where(agent_mask[..., None] > 0.5, 0.0, x3)
    return x3


def reference_hypernet(entities, entity_mask, params, *, n_agents, n_heads, mode="matrix"):
    x3 = reference_forward(entities, entity_mask, params,
                           n_agents=n_agents, n_heads=n_heads)
    if mode == "vector":
        return x3.mean(axis=1)
    if mode == "alt_vector":
        return x3.mean(axis=2)
    if mode == "scalar":
        return x3.mean(axis=(1, 2))
    return x3


def reference_qmixer(agent_qs, entities, entity_mask, hyper_params, *,
                     n_agents, n_heads, softmax_mixing_weights=False):
    bs, max_t, ne, ed = entities.shape
    ents = entities.reshape(bs * max_t, ne, ed)
    mask = entity_mask.reshape(bs * max_t, ne)
    hn = functools.partial(reference_hypernet, ents, mask,
                           n_agents=n_agents, n_heads=n_heads)
    w1 = hn(hyper_params["w1"], mode="matrix")
    w_final = hn(hyper_params["w_final"], mode="vector")
    b1 = hn(hyper_params["b1"], mode="vector")
    v = hn(hyper_params["v"], mode="scalar")

    qs = agent_qs.reshape(bs * max_t, 1, n_agents).astype(jnp.float32)
    if softmax_mixing_weights:
        w1 = jax.nn.softmax(w1, axis=-1)
        w_final = jax.nn.softmax(w_final, axis=-1)
    else:
        w1 = jnp.abs(w1)
        w_final = jnp.abs(w_final)
    hidden = jax.nn.elu(jnp.matmul(qs, w1) + b1[:, None, :])
    y = jnp.matmul(hidden, w_final[:, :, None]) + v[:, None, None]
    return y.reshape(bs, max_t, 1)


# -----------------------------------------------------------------------------
if __name__ == "__main__":
    # Config consistent with the module: entity_shape=32 (entity_last_action=False,
    # extra_dims=0), hypernet_embed=32, mixing_embed_dim=32, attn_n_heads=4,
    # n_agents=3, pooling_type=None (attention path), softmax_mixing_weights=False.
    bs, max_t, ne = 2, 8, 8
    entity_dim, hyp, mix = 32, 32, 32
    n_agents, n_heads = 3, 4

    key = jax.random.PRNGKey(0)
    k_ent, k_qs, k_par = jax.random.split(key, 3)

    entities = jax.random.normal(k_ent, (bs, max_t, ne, entity_dim), dtype=jnp.float32)
    agent_qs = jax.random.normal(k_qs, (bs, max_t, n_agents), dtype=jnp.float32)

    # entity_mask: 1.0 = unavailable. Include masked agents and masked entities.
    entity_mask = jnp.zeros((bs, max_t, ne), dtype=jnp.float32)
    entity_mask = entity_mask.at[0, :, 6:].set(1.0)   # last entities of batch 0 masked
    entity_mask = entity_mask.at[0, 0, 2].set(1.0)    # agent 2 unavailable at t=0
    entity_mask = entity_mask.at[1, 3, 7].set(1.0)
    entity_mask = entity_mask.at[1, 5, 1].set(1.0)    # agent 1 unavailable

    def make_hypernet_params(k):
        ks = jax.random.split(k, 7)
        init = lambda kk, shape: jax.random.normal(kk, shape, dtype=jnp.float32) * 0.1
        # Weights stored as (in, out) so the kernel computes x @ W + b.
        return (init(ks[0], (entity_dim, hyp)),   # fc1 weight
                init(ks[1], (hyp,)),              # fc1 bias
                init(ks[2], (hyp, 3 * hyp)),      # in_trans weight (no bias)
                init(ks[3], (hyp, hyp)),          # out_trans weight
                init(ks[4], (hyp,)),              # out_trans bias
                init(ks[5], (hyp, mix)),          # fc2 weight
                init(ks[6], (mix,)))              # fc2 bias

    pk = jax.random.split(k_par, 4)
    hyper_params = {"w1": make_hypernet_params(pk[0]),
                    "w_final": make_hypernet_params(pk[1]),
                    "b1": make_hypernet_params(pk[2]),
                    "v": make_hypernet_params(pk[3])}

    # --- 1. hypernet kernel vs. reference (batch-tiled grid with 2 steps) -------
    ents_flat = entities.reshape(bs * max_t, ne, entity_dim)
    mask_flat = entity_mask.reshape(bs * max_t, ne)
    out = attention_hypernet_forward(ents_flat, mask_flat, hyper_params["w1"],
                                     n_agents=n_agents, n_heads=n_heads,
                                     mode="matrix", b_tile=8)
    out = jax.block_until_ready(out)
    ref = reference_forward(ents_flat, mask_flat, hyper_params["w1"],
                            n_agents=n_agents, n_heads=n_heads)
    ref = jax.block_until_ready(ref)
    assert out.shape == (bs * max_t, n_agents, mix), out.shape
    err = jnp.max(jnp.abs(out - ref))
    assert jnp.allclose(out, ref, atol=1e-4, rtol=1e-4), f"hypernet max abs diff {err}"

    # --- 2. full FlexQMixer forward vs. reference --------------------------------
    q_tot = flex_qmixer_forward(agent_qs, entities, entity_mask, hyper_params,
                                n_agents=n_agents, n_heads=n_heads, b_tile=8)
    q_tot = jax.block_until_ready(q_tot)
    q_ref = reference_qmixer(agent_qs, entities, entity_mask, hyper_params,
                             n_agents=n_agents, n_heads=n_heads)
    q_ref = jax.block_until_ready(q_ref)
    assert q_tot.shape == (bs, max_t, 1), q_tot.shape
    errq = jnp.max(jnp.abs(q_tot - q_ref))
    assert jnp.allclose(q_tot, q_ref, atol=1e-4, rtol=1e-4), f"qmixer max abs diff {errq}"

    print("KERNEL_OK")
</pallas_src>

<mosaic_0001>
module attributes {stable_mosaic.version = 11 : i64} {
  func.func @_hypernet_kernel(%arg0: i32, %arg1: memref<8x8x32xf32, #tpu.memory_space<vmem>>, %arg2: memref<8x8xf32, #tpu.memory_space<vmem>>, %arg3: memref<64x1xf32, #tpu.memory_space<vmem>>, %arg4: memref<32x32xf32, #tpu.memory_space<vmem>>, %arg5: memref<1x32xf32, #tpu.memory_space<vmem>>, %arg6: memref<4x32x8xf32, #tpu.memory_space<vmem>>, %arg7: memref<4x32x8xf32, #tpu.memory_space<vmem>>, %arg8: memref<4x32x8xf32, #tpu.memory_space<vmem>>, %arg9: memref<4x8x32xf32, #tpu.memory_space<vmem>>, %arg10: memref<1x32xf32, #tpu.memory_space<vmem>>, %arg11: memref<32x32xf32, #tpu.memory_space<vmem>>, %arg12: memref<1x32xf32, #tpu.memory_space<vmem>>, %arg13: memref<64x32xf32, #tpu.memory_space<vmem>>) attributes {dimension_semantics = [#tpu.dimension_semantics<parallel>], iteration_bounds = array<i64: 2>, scalar_prefetch = 0 : i64, scratch_operands = 0 : i64, tpu.core_type = #tpu.core_type<tc>, window_params = [{transform_indices = @transform_0, window_bounds = array<i64: 8, 8, 32>}, {transform_indices = @transform_1, window_bounds = array<i64: 8, 8>}, {transform_indices = @transform_2, window_bounds = array<i64: 64, 1>}, {pipeline_mode = #tpu.pipeline_mode<synchronous>, transform_indices = @transform_3, window_bounds = array<i64: 32, 32>}, {pipeline_mode = #tpu.pipeline_mode<synchronous>, transform_indices = @transform_4, window_bounds = array<i64: 1, 32>}, {pipeline_mode = #tpu.pipeline_mode<synchronous>, transform_indices = @transform_5, window_bounds = array<i64: 4, 32, 8>}, {pipeline_mode = #tpu.pipeline_mode<synchronous>, transform_indices = @transform_6, window_bounds = array<i64: 4, 32, 8>}, {pipeline_mode = #tpu.pipeline_mode<synchronous>, transform_indices = @transform_7, window_bounds = array<i64: 4, 32, 8>}, {pipeline_mode = #tpu.pipeline_mode<synchronous>, transform_indices = @transform_8, window_bounds = array<i64: 4, 8, 32>}, {pipeline_mode = #tpu.pipeline_mode<synchronous>, transform_indices = @transform_9, window_bounds = array<i64: 1, 32>}, {pipeline_mode = #tpu.pipeline_mode<synchronous>, transform_indices = @transform_10, window_bounds = array<i64: 32, 32>}, {pipeline_mode = #tpu.pipeline_mode<synchronous>, transform_indices = @transform_11, window_bounds = array<i64: 1, 32>}, {transform_indices = @transform_12, window_bounds = array<i64: 64, 32>}]} {
    %c0 = arith.constant 0 : index
    %c0_0 = arith.constant 0 : index
    %c0_1 = arith.constant 0 : index
    %0 = vector.load %arg1[%c0, %c0_0, %c0_1] : memref<8x8x32xf32, #tpu.memory_space<vmem>>, vector<8x8x32xf32>
    %1 = vector.shape_cast %0 : vector<8x8x32xf32> to vector<64x32xf32>
    %c0_2 = arith.constant 0 : index
    %c0_3 = arith.constant 0 : index
    %2 = vector.load %arg4[%c0_2, %c0_3] : memref<32x32xf32, #tpu.memory_space<vmem>>, vector<32x32xf32>
    %cst = arith.constant dense<0.000000e+00> : vector<64x32xf32>
    %3 = tpu.matmul %1, %2, %cst {dimension_numbers = #tpu.dot_dimension_numbers<[1], [0], [0], [1], [0, 0, 1, 1], [], []>} : vector<64x32xf32>, vector<32x32xf32>, vector<64x32xf32> -> vector<64x32xf32>
    %c0_4 = arith.constant 0 : index
    %c0_5 = arith.constant 0 : index
    %4 = vector.load %arg5[%c0_4, %c0_5] : memref<1x32xf32, #tpu.memory_space<vmem>>, vector<1x32xf32>
    %5 = vector.broadcast %4 : vector<1x32xf32> to vector<64x32xf32>
    %6 = arith.addf %3, %5 : vector<64x32xf32>
    %cst_6 = arith.constant 0.000000e+00 : f32
    %7 = vector.broadcast %cst_6 : f32 to vector<64x32xf32>
    %8 = arith.maximumf %6, %7 : vector<64x32xf32>
    %c0_7 = arith.constant 0 : index
    %c0_8 = arith.constant 0 : index
    %9 = vector.load %arg2[%c0_7, %c0_8] : memref<8x8xf32, #tpu.memory_space<vmem>>, vector<8x8xf32>
    %c0_9 = arith.constant 0 : index
    %c0_10 = arith.constant 0 : index
    %10 = vector.load %arg3[%c0_9, %c0_10] : memref<64x1xf32, #tpu.memory_space<vmem>>, vector<64x1xf32>
    %11 = vector.shape_cast %10 : vector<64x1xf32> to vector<8x8x1xf32>
    %12 = vector.shape_cast %9 : vector<8x8xf32> to vector<8x1x8xf32>
    %13 = vector.broadcast %11 : vector<8x8x1xf32> to vector<8x8x8xf32>
    %14 = vector.broadcast %12 : vector<8x1x8xf32> to vector<8x8x8xf32>
    %15 = arith.addf %13, %14 : vector<8x8x8xf32>
    %cst_11 = arith.constant -1.000000e+30 : f32
    %16 = vector.broadcast %cst_11 : f32 to vector<8x8x8xf32>
    %17 = arith.mulf %15, %16 : vector<8x8x8xf32>
    %cst_12 = arith.constant 0.000000e+00 : f32
    %18 = vector.broadcast %cst_12 : f32 to vector<64x32xf32>
    %c0_13 = arith.constant 0 : index
    %c0_14 = arith.constant 0 : index
    %c0_15 = arith.constant 0 : index
    %19 = vector.load %arg6[%c0_13, %c0_14, %c0_15] : memref<4x32x8xf32, #tpu.memory_space<vmem>>, vector<1x32x8xf32>
    %20 = vector.shape_cast %19 : vector<1x32x8xf32> to vector<32x8xf32>
    %cst_16 = arith.constant dense<0.000000e+00> : vector<64x8xf32>
    %21 = tpu.matmul %8, %20, %cst_16 {dimension_numbers = #tpu.dot_dimension_numbers<[1], [0], [0], [1], [0, 0, 1, 1], [], []>} : vector<64x32xf32>, vector<32x8xf32>, vector<64x8xf32> -> vector<64x8xf32>
    %c0_17 = arith.constant 0 : index
    %c0_18 = arith.constant 0 : index
    %c0_19 = arith.constant 0 : index
    %22 = vector.load %arg7[%c0_17, %c0_18, %c0_19] : memref<4x32x8xf32, #tpu.memory_space<vmem>>, vector<1x32x8xf32>
    %23 = vector.shape_cast %22 : vector<1x32x8xf32> to vector<32x8xf32>
    %cst_20 = arith.constant dense<0.000000e+00> : vector<64x8xf32>
    %24 = tpu.matmul %8, %23, %cst_20 {dimension_numbers = #tpu.dot_dimension_numbers<[1], [0], [0], [1], [0, 0, 1, 1], [], []>} : vector<64x32xf32>, vector<32x8xf32>, vector<64x8xf32> -> vector<64x8xf32>
    %c0_21 = arith.constant 0 : index
    %c0_22 = arith.constant 0 : index
    %c0_23 = arith.constant 0 : index
    %25 = vector.load %arg8[%c0_21, %c0_22, %c0_23] : memref<4x32x8xf32, #tpu.memory_space<vmem>>, vector<1x32x8xf32>
    %26 = vector.shape_cast %25 : vector<1x32x8xf32> to vector<32x8xf32>
    %cst_24 = arith.constant dense<0.000000e+00> : vector<64x8xf32>
    %27 = tpu.matmul %8, %26, %cst_24 {dimension_numbers = #tpu.dot_dimension_numbers<[1], [0], [0], [1], [0, 0, 1, 1], [], []>} : vector<64x32xf32>, vector<32x8xf32>, vector<64x8xf32> -> vector<64x8xf32>
    %28 = vector.shape_cast %21 : vector<64x8xf32> to vector<8x8x8xf32>
    %29 = vector.shape_cast %24 : vector<64x8xf32> to vector<8x8x8xf32>
    %30 = vector.shape_cast %27 : vector<64x8xf32> to vector<8x8x8xf32>
    "tpu.trace_start"() <{level = 10 : i32, message = "bqd,bkd->bqk"}> : () -> ()
    %cst_25 = arith.constant dense<0.000000e+00> : vector<8x8x8xf32>
    %31 = tpu.matmul %28, %29, %cst_25 {dimension_numbers = #tpu.dot_dimension_numbers<[2], [2], [1], [1], [0, 0, 0, 1, 1, 1], [0], [0]>} : vector<8x8x8xf32>, vector<8x8x8xf32>, vector<8x8x8xf32> -> vector<8x8x8xf32>
    "tpu.trace_stop"() : () -> ()
    %cst_26 = arith.constant 0.353553385 : f32
    %32 = vector.broadcast %cst_26 : f32 to vector<8x8x8xf32>
    %33 = arith.mulf %31, %32 : vector<8x8x8xf32>
    %34 = arith.addf %33, %17 : vector<8x8x8xf32>
    %cst_27 = arith.constant dense<0xFF800000> : vector<8x8xf32>
    %35 = vector.multi_reduction <maximumf>, %34, %cst_27 [2] : vector<8x8x8xf32> to vector<8x8xf32>
    %36 = vector.shape_cast %35 : vector<8x8xf32> to vector<8x8x1xf32>
    %37 = vector.broadcast %36 : vector<8x8x1xf32> to vector<8x8x8xf32>
    %38 = arith.subf %34, %37 : vector<8x8x8xf32>
    %39 = math.exp %38 : vector<8x8x8xf32>
    %cst_28 = arith.constant dense<0.000000e+00> : vector<8x8xf32>
    %40 = vector.multi_reduction <add>, %39, %cst_28 [2] : vector<8x8x8xf32> to vector<8x8xf32>
    %41 = vector.shape_cast %40 : vector<8x8xf32> to vector<8x8x1xf32>
    %cst_29 = arith.constant 1.000000e+00 : f32
    %42 = vector.broadcast %cst_29 : f32 to vector<8x8x1xf32>
    %43 = arith.divf %42, %41 : vector<8x8x1xf32>
    %44 = vector.broadcast %43 : vector<8x8x1xf32> to vector<8x8x8xf32>
    %45 = arith.mulf %39, %44 : vector<8x8x8xf32>
    "tpu.trace_start"() <{level = 10 : i32, message = "bqk,bkd->bqd"}> : () -> ()
    %cst_30 = arith.constant dense<0.000000e+00> : vector<8x8x8xf32>
    %46 = tpu.matmul %45, %30, %cst_30 {dimension_numbers = #tpu.dot_dimension_numbers<[2], [1], [1], [2], [0, 0, 0, 1, 1, 2], [0], [0]>} : vector<8x8x8xf32>, vector<8x8x8xf32>, vector<8x8x8xf32> -> vector<8x8x8xf32>
    "tpu.trace_stop"() : () -> ()
    %47 = vector.shape_cast %46 : vector<8x8x8xf32> to vector<64x8xf32>
    %c0_31 = arith.constant 0 : index
    %c0_32 = arith.constant 0 : index
    %c0_33 = arith.constant 0 : index
    %48 = vector.load %arg9[%c0_31, %c0_32, %c0_33] : memref<4x8x32xf32, #tpu.memory_space<vmem>>, vector<1x8x32xf32>
    %49 = vector.shape_cast %48 : vector<1x8x32xf32> to vector<8x32xf32>
    %cst_34 = arith.constant dense<0.000000e+00> : vector<64x32xf32>
    %50 = tpu.matmul %47, %49, %cst_34 {dimension_numbers = #tpu.dot_dimension_numbers<[1], [0], [0], [1], [0, 0, 1, 1], [], []>} : vector<64x8xf32>, vector<8x32xf32>, vector<64x32xf32> -> vector<64x32xf32>
    %51 = arith.addf %18, %50 : vector<64x32xf32>
    %c1 = arith.constant 1 : index
    %c0_35 = arith.constant 0 : index
    %c0_36 = arith.constant 0 : index
    %52 = vector.load %arg6[%c1, %c0_35, %c0_36] : memref<4x32x8xf32, #tpu.memory_space<vmem>>, vector<1x32x8xf32>
    %53 = vector.shape_cast %52 : vector<1x32x8xf32> to vector<32x8xf32>
    %cst_37 = arith.constant dense<0.000000e+00> : vector<64x8xf32>
    %54 = tpu.matmul %8, %53, %cst_37 {dimension_numbers = #tpu.dot_dimension_numbers<[1], [0], [0], [1], [0, 0, 1, 1], [], []>} : vector<64x32xf32>, vector<32x8xf32>, vector<64x8xf32> -> vector<64x8xf32>
    %c1_38 = arith.constant 1 : index
    %c0_39 = arith.constant 0 : index
    %c0_40 = arith.constant 0 : index
    %55 = vector.load %arg7[%c1_38, %c0_39, %c0_40] : memref<4x32x8xf32, #tpu.memory_space<vmem>>, vector<1x32x8xf32>
    %56 = vector.shape_cast %55 : vector<1x32x8xf32> to vector<32x8xf32>
    %cst_41 = arith.constant dense<0.000000e+00> : vector<64x8xf32>
    %57 = tpu.matmul %8, %56, %cst_41 {dimension_numbers = #tpu.dot_dimension_numbers<[1], [0], [0], [1], [0, 0, 1, 1], [], []>} : vector<64x32xf32>, vector<32x8xf32>, vector<64x8xf32> -> vector<64x8xf32>
    %c1_42 = arith.constant 1 : index
    %c0_43 = arith.constant 0 : index
    %c0_44 = arith.constant 0 : index
    %58 = vector.load %arg8[%c1_42, %c0_43, %c0_44] : memref<4x32x8xf32, #tpu.memory_space<vmem>>, vector<1x32x8xf32>
    %59 = vector.shape_cast %58 : vector<1x32x8xf32> to vector<32x8xf32>
    %cst_45 = arith.constant dense<0.000000e+00> : vector<64x8xf32>
    %60 = tpu.matmul %8, %59, %cst_45 {dimension_numbers = #tpu.dot_dimension_numbers<[1], [0], [0], [1], [0, 0, 1, 1], [], []>} : vector<64x32xf32>, vector<32x8xf32>, vector<64x8xf32> -> vector<64x8xf32>
    %61 = vector.shape_cast %54 : vector<64x8xf32> to vector<8x8x8xf32>
    %62 = vector.shape_cast %57 : vector<64x8xf32> to vector<8x8x8xf32>
    %63 = vector.shape_cast %60 : vector<64x8xf32> to vector<8x8x8xf32>
    "tpu.trace_start"() <{level = 10 : i32, message = "bqd,bkd->bqk"}> : () -> ()
    %cst_46 = arith.constant dense<0.000000e+00> : vector<8x8x8xf32>
    %64 = tpu.matmul %61, %62, %cst_46 {dimension_numbers = #tpu.dot_dimension_numbers<[2], [2], [1], [1], [0, 0, 0, 1, 1, 1], [0], [0]>} : vector<8x8x8xf32>, vector<8x8x8xf32>, vector<8x8x8xf32> -> vector<8x8x8xf32>
    "tpu.trace_stop"() : () -> ()
    %cst_47 = arith.constant 0.353553385 : f32
    %65 = vector.broadcast %cst_47 : f32 to vector<8x8x8xf32>
    %66 = arith.mulf %64, %65 : vector<8x8x8xf32>
    %67 = arith.addf %66, %17 : vector<8x8x8xf32>
    %cst_48 = arith.constant dense<0xFF800000> : vector<8x8xf32>
    %68 = vector.multi_reduction <maximumf>, %67, %cst_48 [2] : vector<8x8x8xf32> to vector<8x8xf32>
    %69 = vector.shape_cast %68 : vector<8x8xf32> to vector<8x8x1xf32>
    %70 = vector.broadcast %69 : vector<8x8x1xf32> to vector<8x8x8xf32>
    %71 = arith.subf %67, %70 : vector<8x8x8xf32>
    %72 = math.exp %71 : vector<8x8x8xf32>
    %cst_49 = arith.constant dense<0.000000e+00> : vector<8x8xf32>
    %73 = vector.multi_reduction <add>, %72, %cst_49 [2] : vector<8x8x8xf32> to vector<8x8xf32>
    %74 = vector.shape_cast %73 : vector<8x8xf32> to vector<8x8x1xf32>
    %cst_50 = arith.constant 1.000000e+00 : f32
    %75 = vector.broadcast %cst_50 : f32 to vector<8x8x1xf32>
    %76 = arith.divf %75, %74 : vector<8x8x1xf32>
    %77 = vector.broadcast %76 : vector<8x8x1xf32> to vector<8x8x8xf32>
    %78 = arith.mulf %72, %77 : vector<8x8x8xf32>
    "tpu.trace_start"() <{level = 10 : i32, message = "bqk,bkd->bqd"}> : () -> ()
    %cst_51 = arith.constant dense<0.000000e+00> : vector<8x8x8xf32>
    %79 = tpu.matmul %78, %63, %cst_51 {dimension_numbers = #tpu.dot_dimension_numbers<[2], [1], [1], [2], [0, 0, 0, 1, 1, 2], [0], [0]>} : vector<8x8x8xf32>, vector<8x8x8xf32>, vector<8x8x8xf32> -> vector<8x8x8xf32>
    "tpu.trace_stop"() : () -> ()
    %80 = vector.shape_cast %79 : vector<8x8x8xf32> to vector<64x8xf32>
    %c1_52 = arith.constant 1 : index
    %c0_53 = arith.constant 0 : index
    %c0_54 = arith.constant 0 : index
    %81 = vector.load %arg9[%c1_52, %c0_53, %c0_54] : memref<4x8x32xf32, #tpu.memory_space<vmem>>, vector<1x8x32xf32>
    %82 = vector.shape_cast %81 : vector<1x8x32xf32> to vector<8x32xf32>
    %cst_55 = arith.constant dense<0.000000e+00> : vector<64x32xf32>
    %83 = tpu.matmul %80, %82, %cst_55 {dimension_numbers = #tpu.dot_dimension_numbers<[1], [0], [0], [1], [0, 0, 1, 1], [], []>} : vector<64x8xf32>, vector<8x32xf32>, vector<64x32xf32> -> vector<64x32xf32>
    %84 = arith.addf %51, %83 : vector<64x32xf32>
    %c2 = arith.constant 2 : index
    %c0_56 = arith.constant 0 : index
    %c0_57 = arith.constant 0 : index
    %85 = vector.load %arg6[%c2, %c0_56, %c0_57] : memref<4x32x8xf32, #tpu.memory_space<vmem>>, vector<1x32x8xf32>
    %86 = vector.shape_cast %85 : vector<1x32x8xf32> to vector<32x8xf32>
    %cst_58 = arith.constant dense<0.000000e+00> : vector<64x8xf32>
    %87 = tpu.matmul %8, %86, %cst_58 {dimension_numbers = #tpu.dot_dimension_numbers<[1], [0], [0], [1], [0, 0, 1, 1], [], []>} : vector<64x32xf32>, vector<32x8xf32>, vector<64x8xf32> -> vector<64x8xf32>
    %c2_59 = arith.constant 2 : index
    %c0_60 = arith.constant 0 : index
    %c0_61 = arith.constant 0 : index
    %88 = vector.load %arg7[%c2_59, %c0_60, %c0_61] : memref<4x32x8xf32, #tpu.memory_space<vmem>>, vector<1x32x8xf32>
    %89 = vector.shape_cast %88 : vector<1x32x8xf32> to vector<32x8xf32>
    %cst_62 = arith.constant dense<0.000000e+00> : vector<64x8xf32>
    %90 = tpu.matmul %8, %89, %cst_62 {dimension_numbers = #tpu.dot_dimension_numbers<[1], [0], [0], [1], [0, 0, 1, 1], [], []>} : vector<64x32xf32>, vector<32x8xf32>, vector<64x8xf32> -> vector<64x8xf32>
    %c2_63 = arith.constant 2 : index
    %c0_64 = arith.constant 0 : index
    %c0_65 = arith.constant 0 : index
    %91 = vector.load %arg8[%c2_63, %c0_64, %c0_65] : memref<4x32x8xf32, #tpu.memory_space<vmem>>, vector<1x32x8xf32>
    %92 = vector.shape_cast %91 : vector<1x32x8xf32> to vector<32x8xf32>
    %cst_66 = arith.constant dense<0.000000e+00> : vector<64x8xf32>
    %93 = tpu.matmul %8, %92, %cst_66 {dimension_numbers = #tpu.dot_dimension_numbers<[1], [0], [0], [1], [0, 0, 1, 1], [], []>} : vector<64x32xf32>, vector<32x8xf32>, vector<64x8xf32> -> vector<64x8xf32>
    %94 = vector.shape_cast %87 : vector<64x8xf32> to vector<8x8x8xf32>
    %95 = vector.shape_cast %90 : vector<64x8xf32> to vector<8x8x8xf32>
    %96 = vector.shape_cast %93 : vector<64x8xf32> to vector<8x8x8xf32>
    "tpu.trace_start"() <{level = 10 : i32, message = "bqd,bkd->bqk"}> : () -> ()
    %cst_67 = arith.constant dense<0.000000e+00> : vector<8x8x8xf32>
    %97 = tpu.matmul %94, %95, %cst_67 {dimension_numbers = #tpu.dot_dimension_numbers<[2], [2], [1], [1], [0, 0, 0, 1, 1, 1], [0], [0]>} : vector<8x8x8xf32>, vector<8x8x8xf32>, vector<8x8x8xf32> -> vector<8x8x8xf32>
    "tpu.trace_stop"() : () -> ()
    %cst_68 = arith.constant 0.353553385 : f32
    %98 = vector.broadcast %cst_68 : f32 to vector<8x8x8xf32>
    %99 = arith.mulf %97, %98 : vector<8x8x8xf32>
    %100 = arith.addf %99, %17 : vector<8x8x8xf32>
    %cst_69 = arith.constant dense<0xFF800000> : vector<8x8xf32>
    %101 = vector.multi_reduction <maximumf>, %100, %cst_69 [2] : vector<8x8x8xf32> to vector<8x8xf32>
    %102 = vector.shape_cast %101 : vector<8x8xf32> to vector<8x8x1xf32>
    %103 = vector.broadcast %102 : vector<8x8x1xf32> to vector<8x8x8xf32>
    %104 = arith.subf %100, %103 : vector<8x8x8xf32>
    %105 = math.exp %104 : vector<8x8x8xf32>
    %cst_70 = arith.constant dense<0.000000e+00> : vector<8x8xf32>
    %106 = vector.multi_reduction <add>, %105, %cst_70 [2] : vector<8x8x8xf32> to vector<8x8xf32>
    %107 = vector.shape_cast %106 : vector<8x8xf32> to vector<8x8x1xf32>
    %cst_71 = arith.constant 1.000000e+00 : f32
    %108 = vector.broadcast %cst_71 : f32 to vector<8x8x1xf32>
    %109 = arith.divf %108, %107 : vector<8x8x1xf32>
    %110 = vector.broadcast %109 : vector<8x8x1xf32> to vector<8x8x8xf32>
    %111 = arith.mulf %105, %110 : vector<8x8x8xf32>
    "tpu.trace_start"() <{level = 10 : i32, message = "bqk,bkd->bqd"}> : () -> ()
    %cst_72 = arith.constant dense<0.000000e+00> : vector<8x8x8xf32>
    %112 = tpu.matmul %111, %96, %cst_72 {dimension_numbers = #tpu.dot_dimension_numbers<[2], [1], [1], [2], [0, 0, 0, 1, 1, 2], [0], [0]>} : vector<8x8x8xf32>, vector<8x8x8xf32>, vector<8x8x8xf32> -> vector<8x8x8xf32>
    "tpu.trace_stop"() : () -> ()
    %113 = vector.shape_cast %112 : vector<8x8x8xf32> to vector<64x8xf32>
    %c2_73 = arith.constant 2 : index
    %c0_74 = arith.constant 0 : index
    %c0_75 = arith.constant 0 : index
    %114 = vector.load %arg9[%c2_73, %c0_74, %c0_75] : memref<4x8x32xf32, #tpu.memory_space<vmem>>, vector<1x8x32xf32>
    %115 = vector.shape_cast %114 : vector<1x8x32xf32> to vector<8x32xf32>
    %cst_76 = arith.constant dense<0.000000e+00> : vector<64x32xf32>
    %116 = tpu.matmul %113, %115, %cst_76 {dimension_numbers = #tpu.dot_dimension_numbers<[1], [0], [0], [1], [0, 0, 1, 1], [], []>} : vector<64x8xf32>, vector<8x32xf32>, vector<64x32xf32> -> vector<64x32xf32>
    %117 = arith.addf %84, %116 : vector<64x32xf32>
    %c3 = arith.constant 3 : index
    %c0_77 = arith.constant 0 : index
    %c0_78 = arith.constant 0 : index
    %118 = vector.load %arg6[%c3, %c0_77, %c0_78] : memref<4x32x8xf32, #tpu.memory_space<vmem>>, vector<1x32x8xf32>
    %119 = vector.shape_cast %118 : vector<1x32x8xf32> to vector<32x8xf32>
    %cst_79 = arith.constant dense<0.000000e+00> : vector<64x8xf32>
    %120 = tpu.matmul %8, %119, %cst_79 {dimension_numbers = #tpu.dot_dimension_numbers<[1], [0], [0], [1], [0, 0, 1, 1], [], []>} : vector<64x32xf32>, vector<32x8xf32>, vector<64x8xf32> -> vector<64x8xf32>
    %c3_80 = arith.constant 3 : index
    %c0_81 = arith.constant 0 : index
    %c0_82 = arith.constant 0 : index
    %121 = vector.load %arg7[%c3_80, %c0_81, %c0_82] : memref<4x32x8xf32, #tpu.memory_space<vmem>>, vector<1x32x8xf32>
    %122 = vector.shape_cast %121 : vector<1x32x8xf32> to vector<32x8xf32>
    %cst_83 = arith.constant dense<0.000000e+00> : vector<64x8xf32>
    %123 = tpu.matmul %8, %122, %cst_83 {dimension_numbers = #tpu.dot_dimension_numbers<[1], [0], [0], [1], [0, 0, 1, 1], [], []>} : vector<64x32xf32>, vector<32x8xf32>, vector<64x8xf32> -> vector<64x8xf32>
    %c3_84 = arith.constant 3 : index
    %c0_85 = arith.constant 0 : index
    %c0_86 = arith.constant 0 : index
    %124 = vector.load %arg8[%c3_84, %c0_85, %c0_86] : memref<4x32x8xf32, #tpu.memory_space<vmem>>, vector<1x32x8xf32>
    %125 = vector.shape_cast %124 : vector<1x32x8xf32> to vector<32x8xf32>
    %cst_87 = arith.constant dense<0.000000e+00> : vector<64x8xf32>
    %126 = tpu.matmul %8, %125, %cst_87 {dimension_numbers = #tpu.dot_dimension_numbers<[1], [0], [0], [1], [0, 0, 1, 1], [], []>} : vector<64x32xf32>, vector<32x8xf32>, vector<64x8xf32> -> vector<64x8xf32>
    %127 = vector.shape_cast %120 : vector<64x8xf32> to vector<8x8x8xf32>
    %128 = vector.shape_cast %123 : vector<64x8xf32> to vector<8x8x8xf32>
    %129 = vector.shape_cast %126 : vector<64x8xf32> to vector<8x8x8xf32>
    "tpu.trace_start"() <{level = 10 : i32, message = "bqd,bkd->bqk"}> : () -> ()
    %cst_88 = arith.constant dense<0.000000e+00> : vector<8x8x8xf32>
    %130 = tpu.matmul %127, %128, %cst_88 {dimension_numbers = #tpu.dot_dimension_numbers<[2], [2], [1], [1], [0, 0, 0, 1, 1, 1], [0], [0]>} : vector<8x8x8xf32>, vector<8x8x8xf32>, vector<8x8x8xf32> -> vector<8x8x8xf32>
    "tpu.trace_stop"() : () -> ()
    %cst_89 = arith.constant 0.353553385 : f32
    %131 = vector.broadcast %cst_89 : f32 to vector<8x8x8xf32>
    %132 = arith.mulf %130, %131 : vector<8x8x8xf32>
    %133 = arith.addf %132, %17 : vector<8x8x8xf32>
    %cst_90 = arith.constant dense<0xFF800000> : vector<8x8xf32>
    %134 = vector.multi_reduction <maximumf>, %133, %cst_90 [2] : vector<8x8x8xf32> to vector<8x8xf32>
    %135 = vector.shape_cast %134 : vector<8x8xf32> to vector<8x8x1xf32>
    %136 = vector.broadcast %135 : vector<8x8x1xf32> to vector<8x8x8xf32>
    %137 = arith.subf %133, %136 : vector<8x8x8xf32>
    %138 = math.exp %137 : vector<8x8x8xf32>
    %cst_91 = arith.constant dense<0.000000e+00> : vector<8x8xf32>
    %139 = vector.multi_reduction <add>, %138, %cst_91 [2] : vector<8x8x8xf32> to vector<8x8xf32>
    %140 = vector.shape_cast %139 : vector<8x8xf32> to vector<8x8x1xf32>
    %cst_92 = arith.constant 1.000000e+00 : f32
    %141 = vector.broadcast %cst_92 : f32 to vector<8x8x1xf32>
    %142 = arith.divf %141, %140 : vector<8x8x1xf32>
    %143 = vector.broadcast %142 : vector<8x8x1xf32> to vector<8x8x8xf32>
    %144 = arith.mulf %138, %143 : vector<8x8x8xf32>
    "tpu.trace_start"() <{level = 10 : i32, message = "bqk,bkd->bqd"}> : () -> ()
    %cst_93 = arith.constant dense<0.000000e+00> : vector<8x8x8xf32>
    %145 = tpu.matmul %144, %129, %cst_93 {dimension_numbers = #tpu.dot_dimension_numbers<[2], [1], [1], [2], [0, 0, 0, 1, 1, 2], [0], [0]>} : vector<8x8x8xf32>, vector<8x8x8xf32>, vector<8x8x8xf32> -> vector<8x8x8xf32>
    "tpu.trace_stop"() : () -> ()
    %146 = vector.shape_cast %145 : vector<8x8x8xf32> to vector<64x8xf32>
    %c3_94 = arith.constant 3 : index
    %c0_95 = arith.constant 0 : index
    %c0_96 = arith.constant 0 : index
    %147 = vector.load %arg9[%c3_94, %c0_95, %c0_96] : memref<4x8x32xf32, #tpu.memory_space<vmem>>, vector<1x8x32xf32>
    %148 = vector.shape_cast %147 : vector<1x8x32xf32> to vector<8x32xf32>
    %cst_97 = arith.constant dense<0.000000e+00> : vector<64x32xf32>
    %149 = tpu.matmul %146, %148, %cst_97 {dimension_numbers = #tpu.dot_dimension_numbers<[1], [0], [0], [1], [0, 0, 1, 1], [], []>} : vector<64x8xf32>, vector<8x32xf32>, vector<64x32xf32> -> vector<64x32xf32>
    %150 = arith.addf %117, %149 : vector<64x32xf32>
    %c0_98 = arith.constant 0 : index
    %c0_99 = arith.constant 0 : index
    %151 = vector.load %arg3[%c0_98, %c0_99] : memref<64x1xf32, #tpu.memory_space<vmem>>, vector<64x1xf32>
    %cst_100 = arith.constant 5.000000e-01 : f32
    %152 = vector.broadcast %cst_100 : f32 to vector<64x1xf32>
    %153 = arith.cmpf olt, %151, %152 : vector<64x1xf32>
    %c0_101 = arith.constant 0 : index
    %c0_102 = arith.constant 0 : index
    %154 = vector.load %arg10[%c0_101, %c0_102] : memref<1x32xf32, #tpu.memory_space<vmem>>, vector<1x32xf32>
    %155 = vector.broadcast %154 : vector<1x32xf32> to vector<64x32xf32>
    %156 = arith.addf %150, %155 : vector<64x32xf32>
    %cst_103 = arith.constant 0.000000e+00 : f32
    %157 = vector.shape_cast %153 : vector<64x1xi1> to vector<64x1xi1>
    %158 = vector.broadcast %157 : vector<64x1xi1> to vector<64x32xi1>
    %159 = vector.broadcast %cst_103 : f32 to vector<64x32xf32>
    %160 = arith.select %158, %156, %159 : vector<64x32xi1>, vector<64x32xf32>
    %c0_104 = arith.constant 0 : index
    %c0_105 = arith.constant 0 : index
    %161 = vector.load %arg11[%c0_104, %c0_105] : memref<32x32xf32, #tpu.memory_space<vmem>>, vector<32x32xf32>
    %cst_106 = arith.constant dense<0.000000e+00> : vector<64x32xf32>
    %162 = tpu.matmul %160, %161, %cst_106 {dimension_numbers = #tpu.dot_dimension_numbers<[1], [0], [0], [1], [0, 0, 1, 1], [], []>} : vector<64x32xf32>, vector<32x32xf32>, vector<64x32xf32> -> vector<64x32xf32>
    %c0_107 = arith.constant 0 : index
    %c0_108 = arith.constant 0 : index
    %163 = vector.load %arg12[%c0_107, %c0_108] : memref<1x32xf32, #tpu.memory_space<vmem>>, vector<1x32xf32>
    %164 = vector.broadcast %163 : vector<1x32xf32> to vector<64x32xf32>
    %165 = arith.addf %162, %164 : vector<64x32xf32>
    %cst_109 = arith.constant 0.000000e+00 : f32
    %166 = vector.shape_cast %153 : vector<64x1xi1> to vector<64x1xi1>
    %167 = vector.broadcast %166 : vector<64x1xi1> to vector<64x32xi1>
    %168 = vector.broadcast %cst_109 : f32 to vector<64x32xf32>
    %169 = arith.select %167, %165, %168 : vector<64x32xi1>, vector<64x32xf32>
    %c0_110 = arith.constant 0 : index
    %c0_111 = arith.constant 0 : index
    %170 = vector.load %arg13[%c0_110, %c0_111] : memref<64x32xf32, #tpu.memory_space<vmem>>, vector<64x32xf32>
    tpu.vector_store %arg13[%c0_110, %c0_111], %169 {strides = array<i32>} : memref<64x32xf32, #tpu.memory_space<vmem>>, vector<64x32xf32>,
    return
  }
  func.func @transform_0(%arg0: i32) -> (i32, i32, i32) {
    %c0_i32 = arith.constant 0 : i32
    %c0_i32_0 = arith.constant 0 : i32
    %c0_i32_1 = arith.constant 0 : i32
    return %arg0, %c0_i32, %c0_i32_0 : i32, i32, i32
  }
  func.func @transform_1(%arg0: i32) -> (i32, i32) {
    %c0_i32 = arith.constant 0 : i32
    %c0_i32_0 = arith.constant 0 : i32
    return %arg0, %c0_i32 : i32, i32
  }
  func.func @transform_2(%arg0: i32) -> (i32, i32) {
    %c0_i32 = arith.constant 0 : i32
    %c0_i32_0 = arith.constant 0 : i32
    return %arg0, %c0_i32 : i32, i32
  }
  func.func @transform_3(%arg0: i32) -> (i32, i32) {
    %c0_i32 = arith.constant 0 : i32
    %c0_i32_0 = arith.constant 0 : i32
    %c0_i32_1 = arith.constant 0 : i32
    return %c0_i32, %c0_i32_0 : i32, i32
  }
  func.func @transform_4(%arg0: i32) -> (i32, i32) {
    %c0_i32 = arith.constant 0 : i32
    %c0_i32_0 = arith.constant 0 : i32
    %c0_i32_1 = arith.constant 0 : i32
    return %c0_i32, %c0_i32_0 : i32, i32
  }
  func.func @transform_5(%arg0: i32) -> (i32, i32, i32) {
    %c0_i32 = arith.constant 0 : i32
    %c0_i32_0 = arith.constant 0 : i32
    %c0_i32_1 = arith.constant 0 : i32
    %c0_i32_2 = arith.constant 0 : i32
    return %c0_i32, %c0_i32_0, %c0_i32_1 : i32, i32, i32
  }
  func.func @transform_6(%arg0: i32) -> (i32, i32, i32) {
    %c0_i32 = arith.constant 0 : i32
    %c0_i32_0 = arith.constant 0 : i32
    %c0_i32_1 = arith.constant 0 : i32
    %c0_i32_2 = arith.constant 0 : i32
    return %c0_i32, %c0_i32_0, %c0_i32_1 : i32, i32, i32
  }
  func.func @transform_7(%arg0: i32) -> (i32, i32, i32) {
    %c0_i32 = arith.constant 0 : i32
    %c0_i32_0 = arith.constant 0 : i32
    %c0_i32_1 = arith.constant 0 : i32
    %c0_i32_2 = arith.constant 0 : i32
    return %c0_i32, %c0_i32_0, %c0_i32_1 : i32, i32, i32
  }
  func.func @transform_8(%arg0: i32) -> (i32, i32, i32) {
    %c0_i32 = arith.constant 0 : i32
    %c0_i32_0 = arith.constant 0 : i32
    %c0_i32_1 = arith.constant 0 : i32
    %c0_i32_2 = arith.constant 0 : i32
    return %c0_i32, %c0_i32_0, %c0_i32_1 : i32, i32, i32
  }
  func.func @transform_9(%arg0: i32) -> (i32, i32) {
    %c0_i32 = arith.constant 0 : i32
    %c0_i32_0 = arith.constant 0 : i32
    %c0_i32_1 = arith.constant 0 : i32
    return %c0_i32, %c0_i32_0 : i32, i32
  }
  func.func @transform_10(%arg0: i32) -> (i32, i32) {
    %c0_i32 = arith.constant 0 : i32
    %c0_i32_0 = arith.constant 0 : i32
    %c0_i32_1 = arith.constant 0 : i32
    return %c0_i32, %c0_i32_0 : i32, i32
  }
  func.func @transform_11(%arg0: i32) -> (i32, i32) {
    %c0_i32 = arith.constant 0 : i32
    %c0_i32_0 = arith.constant 0 : i32
    %c0_i32_1 = arith.constant 0 : i32
    return %c0_i32, %c0_i32_0 : i32, i32
  }
  func.func @transform_12(%arg0: i32) -> (i32, i32) {
    %c0_i32 = arith.constant 0 : i32
    %c0_i32_0 = arith.constant 0 : i32
    return %arg0, %c0_i32 : i32, i32
  }
}

</mosaic_0001>

<bundles_post_ra>
// kernel: tpu_custom_call.1
= control target key start
LH: loop header
LB: loop body
LE: loop exit
PB: predicated region body
PF: predicated region fallthrough
CT: control target
= control target key end

     0   :  { %s9820_s21 = smov 0   ;;  %s10901_s0 = inlined_call_operand.vmem [shape: f32[16,8,32], index: 0, kind: input, shape index: {}]   ;;  %s10902_s1 = inlined_call_operand.vmem [shape: f32[16,8], index: 1, kind: input, shape index: {}]   ;;  %s10903_s2 = inlined_call_operand.vmem [shape: f32[128,1], index: 2, kind: input, shape index: {}]   ;;  %s10904_s3 = inlined_call_operand.vmem [shape: f32[32,32], index: 3, kind: input, shape index: {}]   ;;  %s10905_s4 = inlined_call_operand.vmem [shape: f32[1,32], index: 4, kind: input, shape index: {}]   ;;  %s10906_s5 = inlined_call_operand.vmem [shape: f32[4,32,8], index: 5, kind: input, shape index: {}]   ;;  %s10907_s6 = inlined_call_operand.vmem [shape: f32[4,32,8], index: 6, kind: input, shape index: {}]   ;;  %s10908_s7 = inlined_call_operand.vmem [shape: f32[4,32,8], index: 7, kind: input, shape index: {}]   ;;  %s10909_s8 = inlined_call_operand.vmem [shape: f32[4,8,32], index: 8, kind: input, shape index: {}]   ;;  %s10910_s9 = inlined_call_operand.vmem [shape: f32[1,32], index: 9, kind: input, shape index: {}]   ;;  %s10911_s10 = inlined_call_operand.vmem [shape: f32[32,32], index: 10, kind: input, shape index: {}]   ;;  %s10912_s11 = inlined_call_operand.vmem [shape: f32[1,32], index: 11, kind: input, shape index: {}]   ;;  %s10913_s12 = inlined_call_operand.vmem [shape: f32[128,32], index: 12, kind: output, shape index: {}]  }
   0x1 LB: > { %s9826_s22 = sadd.s32 4294967295, %s9749_s21   ;;  %p8184_p0 = scmp.ge.s32.totalorder %s9749_s21, 1  ;;  %s9749_s21 = sphi %s9820_s21, %s22_s21  }
   0x2   : > { %p383_p1 = scmp.lt.s32.totalorder %s9749_s21, 3 }
   0x4   : > { %p384_p2 = pnand %p8184_p0, %p383_p1 }
   0x5   : > { %v464_v0 = vld [vmem:[%s10904_s3] sm:$0xff] (!%p384_p2)  ;;  %v465_v1 = vld [vmem:[%s10904_s3 + $0x8] sm:$0xff] (!%p384_p2)  ;;  %v466_v2 = vld [vmem:[%s10904_s3 + $0x10] sm:$0xff] (!%p384_p2)  ;;  %s8185_s29 = sshll.u32 (!%p384_p2), %s9826_s22, 3  ;;  %vm475_vm0 = vcmask (!%p384_p2), 261120   ;;  %v9751_v57 = vmov (!%p384_p2), 0.0  }
   0x6   : > { %387 = sbr.rel (%p384_p2) target bundleno = 4176 (0x1050), region = 68  ;;  %v9464_v3 = vpack.c.bf16 (!%p384_p2), %v465_v1, %v464_v0  ;;  %v467_v4 = vld [vmem:[%s10904_s3 + $0x18] sm:$0xff] (!%p384_p2)  ;;  %p435_p3 = scmp.lt.s32.totalorder (!%p384_p2), %s8185_s29, 15  ;;  %v768_v5 = vld [vmem:[%s10906_s5] sm:$0xff] (!%p384_p2)  ;;  %v769_v6 = vld [vmem:[%s10906_s5 + $0x8] sm:$0xff] (!%p384_p2)  ;;  %vm9752_vm1 = vmmov (!%p384_p2), 0  }
   0x7   : > { %v9468_v7 = vpack.c.bf16 (!%p384_p2), %v467_v4, %v466_v2  ;;  %v9472_v8 = vpack.c.bf16 (!%p384_p2), %v769_v6, %v768_v5  ;;  %v901_v9 = vld [vmem:[%s10907_s6] sm:$0xff] (!%p384_p2)  ;;  %v902_v10 = vld [vmem:[%s10907_s6 + $0x8] sm:$0xff] (!%p384_p2)  ;;  %v770_v20 = vld [vmem:[%s10906_s5 + $0x10] sm:$0xff] (!%p384_p2)  ;;  %v9753_v60 = vmov (!%p384_p2), 0   ;;  %vm1119_vm2 = vcmask (!%p384_p2), 64512   ;;  %p440_p4 = scmp.lt.s32.totalorder (!%p384_p2), %s9826_s22, 1 }
   0x8   : > { %9465 = vmatprep.subr.bf16.mxu0 (!%p384_p2), %v9464_v3  ;;  %v9480_v11 = vpack.c.bf16 (!%p384_p2), %v902_v10, %v901_v9  ;;  %v771_v21 = vld [vmem:[%s10906_s5 + $0x18] sm:$0xff] (!%p384_p2)  ;;  %v903_v23 = vld [vmem:[%s10907_s6 + $0x10] sm:$0xff] (!%p384_p2)  ;;  %v1010_v26 = vld [vmem:[%s10908_s7] sm:$0xff] (!%p384_p2)  ;;  %9612 = vset.pattern.permute.xlu0 (!%p384_p2), %v9753_v60 }
   0x9   : > { %9467 = vmatpush3.bf16.msra.mxu0 (!%p384_p2), %v9464_v3  ;;  %9473 = vmatprep.subr.bf16.mxu1 (!%p384_p2), %v9472_v8  ;;  %v9476_v22 = vpack.c.bf16 (!%p384_p2), %v771_v21, %v770_v20  ;;  %v904_v24 = vld [vmem:[%s10907_s6 + $0x18] sm:$0xff] (!%p384_p2)  ;;  %v1011_v27 = vld [vmem:[%s10908_s7 + $0x8] sm:$0xff] (!%p384_p2)  ;;  %v8192_v29 = vld [vmem:[%s10905_s4] ss:$0 sm:$0xff] (!%p384_p2) }
   0xa   : > { %9469 = vmatprep.subr.bf16.mxu0 (!%p384_p2), %v9468_v7  ;;  %9475 = vmatpush3.bf16.msra.mxu1 (!%p384_p2), %v9472_v8  ;;  %v9484_v25 = vpack.c.bf16 (!%p384_p2), %v904_v24, %v903_v23  ;;  %v9488_v28 = vpack.c.bf16 (!%p384_p2), %v1011_v27, %v1010_v26  ;;  %v1012_v34 = vld [vmem:[%s10908_s7 + $0x10] sm:$0xff] (!%p384_p2)  ;;  %v1013_v35 = vld [vmem:[%s10908_s7 + $0x18] sm:$0xff] (!%p384_p2)  ;;  %v9754_v27 = vmov (!%p384_p2), 1966171168  }
   0xb   : > { %9477 = vmatprep.subr.bf16.mxu1 (!%p384_p2), %v9476_v22  ;;  %v9492_v41 = vpack.c.bf16 (!%p384_p2), %v1013_v35, %v1012_v34  ;;  %9613 = vset.pattern.permute.xlu1 (!%p384_p2), %v9753_v60 }
   0xd   : > { %s10915_s29 = smov (!%p435_p3, %s8185_s29), 15  ;;  %9471 = vmatpush3.bf16.msra.mxu0 %v9468_v7  ;;  %s10917_s22 = smov (!%p440_p4, %s9826_s22), 1 }
   0xe   : > { %s9855_s24 = sshll.u32 %s10915_s29, 3  ;;  %9481 = vmatprep.subr.bf16.mxu0 %v9480_v11  ;;  %9479 = vmatpush3.bf16.msra.mxu1 %v9476_v22  ;;  %s8187_s16 = sshll.u32 %s10917_s22, 3 }
   0xf   : > { %s438_s27 = scalar_lea.vmem %s10901_s0, %s9855_s24  ;;  %9489 = vmatprep.subr.bf16.mxu1 %v9488_v28  ;;  %s9970_s15 = scalar_lea.vmem %s10903_s2, %s9855_s24 }
  0x10   : > { %v456_v12 = vld [vmem:[%s438_s27] sm:$0xff]  ;;  %v457_v13 = vld [vmem:[%s438_s27 + $0x8] sm:$0xff]  ;;  %v458_v14 = vld [vmem:[%s438_s27 + $0x10] sm:$0xff]  ;;  %s443_s19 = scalar_lea.vmem %s10902_s1, %s8187_s16 }
  0x11   : > { %8816 = vmatprep.mubr.msk.f32.mxu0 %vm475_vm0, %v456_v12  ;;  %v459_v15 = vld [vmem:[%s438_s27 + $0x18] sm:$0xff]  ;;  %v460_v16 = vld [vmem:[%s438_s27 + $0x20] sm:$0xff]  ;;  %v461_v17 = vld [vmem:[%s438_s27 + $0x28] sm:$0xff] }
  0x12   : > { %8817 = vmatmul.mubr.msk.f32.vlgmr.msra.gmra.mrb[0].mxu0 %vm475_vm0, %v457_v13  ;;  %v462_v18 = vld [vmem:[%s438_s27 + $0x30] sm:$0xff]  ;;  %v463_v19 = vld [vmem:[%s438_s27 + $0x38] sm:$0xff]  ;;  %v615_v58 = vld [vmem:[%s9970_s15 + $0x8] sm:$0xff] }
  0x13   : > { %8819 = vmatprep.mubr.msk.f32.mxu0 %vm475_vm0, %v458_v14  ;;  %9483 = vmatpush3.bf16.msra.mxu0 %v9480_v11  ;;  %v617_v59 = vld [vmem:[%s9970_s15 + $0x18] sm:$0xff]  ;;  %v614_v61 = vld [vmem:[%s9970_s15] sm:$0xff]  ;;  %v616_v62 = vld [vmem:[%s9970_s15 + $0x10] sm:$0xff] }
  0x14   : > { %9485 = vmatprep.subr.bf16.mxu0 %v9484_v25  ;;  %679 = vperm.xlu0 %9612, %v615_v58   ;;  %v619_v63 = vld [vmem:[%s9970_s15 + $0x28] sm:$0xff]  ;;  %v618_v0 = vld [vmem:[%s9970_s15 + $0x20] sm:$0xff]  ;;  %v621_v1 = vld [vmem:[%s9970_s15 + $0x38] sm:$0xff] }
  0x15   : > { %689 = vperm.xlu1 %9613, %v617_v59   ;;  %v620_v2 = vld [vmem:[%s9970_s15 + $0x30] sm:$0xff] }
  0x16   : > { %8820 = vmatmul.mubr.msk.f32.gmra.mrb[2].mxu0 %vm475_vm0, %v459_v15 }
  0x17   : > { %8822 = vmatprep.mubr.msk.f32.mxu0 %vm475_vm0, %v460_v16  ;;  %9487 = vmatpush3.bf16.msra.mxu0 %v9484_v25 }
  0x18   : > { %8888 = vmatprep.subr.mxu0 %v9751_v57  ;;  %674 = vperm.xlu0 %9612, %v614_v61  }
  0x19   : > { %684 = vperm.xlu1 %9613, %v616_v62  }
  0x1a   : > { %8823 = vmatmul.mubr.msk.f32.gmra.mrb[4].mxu0 %vm475_vm0, %v461_v17 }
  0x1b   : > { %8825 = vmatprep.mubr.msk.f32.mxu0 %vm475_vm0, %v462_v18 }
  0x1c   : > { %699 = vperm.xlu0 %9612, %v619_v63  }
  0x1d   : > { %694 = vperm.xlu1 %9613, %v618_v0  }
  0x1e   : > { %8826 = vmatmul.mubr.msk.f32.gmra.mrb[6].mxu0 %vm475_vm0, %v463_v19 }
  0x20   : > { %709 = vperm.xlu0 %9612, %v621_v1  }
  0x21   : > { %704 = vperm.xlu1 %9613, %v620_v2  }
  0xe5   : > { %v8818_v30 = vpop.f32.mrb[0].mxu0 }
  0xe6   : > { %v572_v31 = vadd.f32 %v8818_v30, %v8192_v29  ;;  %v566_v32 = vpop.f32.mrb[1].mxu0 }
  0xe7   : > { %v567_v33 = vadd.f32 %v8192_v29, %v566_v32 }
  0xe8   : > { %v9898_v38 = vmax.f32 %v572_v31, 0.0 }
  0xe9   : > { %v9896_v36 = vmax.f32 %v567_v33, 0.0  ;;  %v8821_v37 = vpop.f32.mrb[2].mxu0  ;;  %v613_v33 = vld [vmem:[%s443_s19] sm:$0xff] }
  0xea   : > { %v582_v39 = vadd.f32 %v8821_v37, %v8192_v29  ;;  %v576_v40 = vpop.f32.mrb[3].mxu0  ;;  %v623_v37 = vcombine.high %v613_v33, %v613_v33 }
  0xeb   : > { %v577_v42 = vadd.f32 %v8192_v29, %v576_v40  ;;  %8836 = vmatprep.mubr.msk.f32.mxu1 %vm475_vm0, %v9896_v36  ;;  %8856 = vmatprep.mubr.msk.f32.mxu0 %vm475_vm0, %v9896_v36 }
  0xec   : > { %8837 = vmatmul.mubr.msk.f32.vlgmr.msra.gmra.mrb[0].mxu1 %vm475_vm0, %v9898_v38  ;;  %8857 = vmatmul.mubr.msk.f32.vlgmr.msra.gmra.mrb[8].mxu0 %vm475_vm0, %v9898_v38  ;;  %v9910_v45 = vmax.f32 %v582_v39, 0.0  ;;  %v680_v39 = vpop.permute.xlu0 %679 }
  0xed   : > { %v9908_v43 = vmax.f32 %v577_v42, 0.0  ;;  %v8824_v44 = vpop.f32.mrb[4].mxu0  ;;  %9491 = vmatpush3.bf16.msra.mxu1 %v9488_v28  ;;  %v625_v28 = vunpack.c.l.s4 %v9754_v27 }
  0xee   : > { %v592_v46 = vadd.f32 %v8824_v44, %v8192_v29  ;;  %v586_v47 = vpop.f32.mrb[5].mxu0  ;;  %9493 = vmatprep.subr.bf16.mxu1 %v9492_v41 }
  0xef   : > { %v587_v48 = vadd.f32 %v8192_v29, %v586_v47  ;;  %8839 = vmatprep.mubr.msk.f32.mxu1 %vm475_vm0, %v9908_v43  ;;  %8859 = vmatprep.mubr.msk.f32.mxu0 %vm475_vm0, %v9908_v43  ;;  %v626_v30 = vunpack.c.0.s8 %v625_v28 }
  0xf0   : > { %v9916_v49 = vmax.f32 %v592_v46, 0.0  ;;  %8840 = vmatmul.mubr.msk.f32.gmra.mrb[2].mxu1 %vm475_vm0, %v9910_v45  ;;  %8860 = vmatmul.mubr.msk.f32.gmra.mrb[10].mxu0 %vm475_vm0, %v9910_v45  ;;  %v690_v46 = vpop.permute.xlu1 %689 }
  0xf1   : > { %v9922_v50 = vmax.f32 %v587_v48, 0.0  ;;  %v8827_v51 = vpop.f32.mrb[6].mxu0  ;;  %9495 = vmatpush3.bf16.msra.mxu1 %v9492_v41 }
  0xf2   : > { %v602_v52 = vadd.f32 %v8827_v51, %v8192_v29  ;;  %v596_v53 = vpop.f32.mrb[7].mxu0  ;;  %8893 = vmatprep.subr.mxu1 %v9751_v57 }
  0xf3   : > { %v597_v54 = vadd.f32 %v8192_v29, %v596_v53  ;;  %8842 = vmatprep.mubr.msk.f32.mxu1 %vm475_vm0, %v9922_v50  ;;  %8862 = vmatprep.mubr.msk.f32.mxu0 %vm475_vm0, %v9922_v50  ;;  %v627_v29 = vlaneseq }
  0xf4   : > { %v9928_v55 = vmax.f32 %v602_v52, 0.0  ;;  %8843 = vmatmul.mubr.msk.f32.gmra.mrb[4].mxu1 %vm475_vm0, %v9916_v49  ;;  %8863 = vmatmul.mubr.msk.f32.gmra.mrb[12].mxu0 %vm475_vm0, %v9916_v49  ;;  %v675_v52 = vpop.permute.xlu0 %674  ;;  %v685_v63 = vpop.permute.xlu1 %684 }
  0xf5   : > { %v9934_v56 = vmax.f32 %v597_v54, 0.0  ;;  %v628_v31 = vshrl.u32 %v627_v29, 7 }
  0xf7   : > { %8845 = vmatprep.mubr.msk.f32.mxu1 %vm475_vm0, %v9934_v56  ;;  %8865 = vmatprep.mubr.msk.f32.mxu0 %vm475_vm0, %v9934_v56  ;;  %v629_v32 = vsub.s32 %v626_v30, %v628_v31  ;;  %v714_v41 = vsub.s32 0, %v628_v31 }
  0xf8   : > { %8846 = vmatmul.mubr.msk.f32.gmra.mrb[6].mxu1 %vm475_vm0, %v9928_v55  ;;  %8866 = vmatmul.mubr.msk.f32.gmra.mrb[14].mxu0 %vm475_vm0, %v9928_v55  ;;  %v700_v1 = vpop.permute.xlu0 %699 }
  0xf9   : > { %8876 = vmatprep.mubr.msk.f32.mxu1 %vm475_vm0, %v9896_v36  ;;  %8890 = vmatprep.mubr.msk.f32.mxu0 %vm9752_vm1, %v9751_v57  ;;  %v630_v34 = vrot.slane %v613_v33, %v629_v32  ;;  %v637_v44 = vrot.slane %v623_v37, %v629_v32 }
  0xfb   : > { %v638_v35 = vcombine.high %v630_v34, %v630_v34  ;;  %v646_v42 = vrot.slane %v630_v34, %v629_v32  ;;  %v639_v54 = vcombine.high %v637_v44, %v637_v44 }
  0xfc   : > { %8877 = vmatmul.mubr.msk.f32.vlgmr.msra.gmra.mrb[8].mxu1 %vm475_vm0, %v9898_v38  ;;  %v710_v29 = vpop.permute.xlu0 %709 }
  0xfd   : > { %8879 = vmatprep.mubr.msk.f32.mxu1 %vm475_vm0, %v9908_v43  ;;  %v660_v40 = vrot.slane %v638_v35, %v629_v32  ;;  %v715_v51 = vrot.slane %v646_v42, %v714_v41  ;;  %v668_v53 = vcombine.high %v646_v42, %v646_v42  ;;  %v667_v0 = vrot.slane %v639_v54, %v629_v32 }
  0xff   : > { %v719_v47 = vrot.slane %v660_v40, %v714_v41  ;;  %v670_v48 = vcombine.high %v660_v40, %v660_v40  ;;  %v752_v61 = vadd.f32 %v715_v51, %v675_v52  ;;  %v723_v62 = vrot.slane %v668_v53, %v714_v41 }
 0x100   : > { %8880 = vmatmul.mubr.msk.f32.gmra.mrb[10].mxu1 %vm475_vm0, %v9910_v45 }
 0x101   : > { %8882 = vmatprep.mubr.msk.f32.mxu1 %vm475_vm0, %v9922_v50  ;;  %v753_v58 = vadd.f32 %v719_v47, %v680_v39  ;;  %v727_v59 = vrot.slane %v670_v48, %v714_v41 }
 0x103   : > { %v10041_v2 = vmul.f32 -1e+30, %v753_v58 }
 0x104   : > { %8883 = vmatmul.mubr.msk.f32.gmra.mrb[12].mxu1 %vm475_vm0, %v9916_v49 }
 0x105   : > { %8885 = vmatprep.mubr.msk.f32.mxu1 %vm475_vm0, %v9934_v56 }
 0x108   : > { %8886 = vmatmul.mubr.msk.f32.gmra.mrb[14].mxu1 %vm475_vm0, %v9928_v55 }
 0x109   : > { %8895 = vmatprep.mubr.msk.f32.mxu1 %vm9752_vm1, %v9751_v57 }
 0x1bf   : > { %v8838_v3 = vpop.f32.mrb[0].mxu1  ;;  %v8858_v4 = vpop.f32.mrb[8].mxu0 }
 0x1c0   : > { %v862_v5 = vpop.f32.mrb[1].mxu1  ;;  %v971_v6 = vpop.f32.mrb[9].mxu0  ;;  %8894 = vmatpush3.xpose.msk.msra.mxu1 %vm1119_vm2, %v8858_v4  ;;  %v653_v4 = vrot.slane %v637_v44, %v629_v32 }
 0x1c1   : > { %8889 = vmatpush3.xpose.msk.msra.mxu0 %vm1119_vm2, %v971_v6  ;;  %8903 = vmatprep.subr.mxu1 %v9751_v57  ;;  %v754_v6 = vadd.f32 %v723_v62, %v685_v63 }
 0x1c2   : > { %8898 = vmatprep.subr.mxu0 %v9751_v57 }
 0x1c3   : > { %v8841_v7 = vpop.f32.mrb[2].mxu1  ;;  %v8861_v8 = vpop.f32.mrb[10].mxu0  ;;  %8896 = vmatmul.mubr.msk.f32.vlgmr.msra.gmra.mrb[16].mxu1 %vm1119_vm2, %v8838_v3  ;;  %v755_v3 = vadd.f32 %v727_v59, %v690_v46 }
 0x1c4   : > { %v872_v9 = vpop.f32.mrb[3].mxu1  ;;  %v981_v10 = vpop.f32.mrb[11].mxu0  ;;  %8891 = vmatmul.mubr.msk.f32.vlgmr.msra.gmra.mrb[16].mxu0 %vm1119_vm2, %v862_v5  ;;  %8904 = vmatpush3.xpose.msk.msra.mxu1 %vm1119_vm2, %v8861_v8  ;;  %v10043_v5 = vmul.f32 -1e+30, %v752_v61  ;;  %v671_v8 = vcombine.high %v667_v0, %v667_v0 }
 0x1c5   : > { %8899 = vmatpush3.xpose.msk.msra.mxu0 %vm1119_vm2, %v981_v10  ;;  %8905 = vmatprep.mubr.msk.f32.mxu1 %vm9752_vm1, %v9751_v57 }
 0x1c6   : > { %8900 = vmatprep.mubr.msk.f32.mxu0 %vm9752_vm1, %v9751_v57  ;;  %8913 = vmatprep.subr.mxu1 %v9751_v57  ;;  %v743_v28 = vrot.slane %v671_v8, %v714_v41 }
 0x1c7   : > { %v8844_v11 = vpop.f32.mrb[4].mxu1  ;;  %v8864_v12 = vpop.f32.mrb[12].mxu0  ;;  %8906 = vmatmul.mubr.msk.f32.vlgmr.msra.gmra.mrb[18].mxu1 %vm1119_vm2, %v8841_v7  ;;  %8908 = vmatprep.subr.mxu0 %v9751_v57  ;;  %v735_v7 = vrot.slane %v667_v0, %v714_v41 }
 0x1c8   : > { %v882_v13 = vpop.f32.mrb[5].mxu1  ;;  %v991_v14 = vpop.f32.mrb[13].mxu0  ;;  %8901 = vmatmul.mubr.msk.f32.vlgmr.msra.gmra.mrb[18].mxu0 %vm1119_vm2, %v872_v9  ;;  %8914 = vmatpush3.xpose.msk.msra.mxu1 %vm1119_vm2, %v8864_v12  ;;  %v759_v48 = vadd.f32 %v743_v28, %v710_v29 }
 0x1c9   : > { %8909 = vmatpush3.xpose.msk.msra.mxu0 %vm1119_vm2, %v991_v14  ;;  %8915 = vmatprep.mubr.msk.f32.mxu1 %vm9752_vm1, %v9751_v57  ;;  %v757_v27 = vadd.f32 %v735_v7, %v700_v1 }
 0x1ca   : > { %8910 = vmatprep.mubr.msk.f32.mxu0 %vm9752_vm1, %v9751_v57  ;;  %8923 = vmatprep.subr.mxu1 %v9751_v57 }
 0x1cb   : > { %v8847_v15 = vpop.f32.mrb[6].mxu1  ;;  %v8867_v16 = vpop.f32.mrb[14].mxu0  ;;  %8916 = vmatmul.mubr.msk.f32.vlgmr.msra.gmra.mrb[20].mxu1 %vm1119_vm2, %v8844_v11  ;;  %8918 = vmatprep.subr.mxu0 %v9751_v57  ;;  %v10054_v47 = vmul.f32 -1e+30, %v757_v27 }
 0x1cc   : > { %v892_v17 = vpop.f32.mrb[7].mxu1  ;;  %v1001_v18 = vpop.f32.mrb[15].mxu0  ;;  %8911 = vmatmul.mubr.msk.f32.vlgmr.msra.gmra.mrb[20].mxu0 %vm1119_vm2, %v882_v13  ;;  %8924 = vmatpush3.xpose.msk.msra.mxu1 %vm1119_vm2, %v8867_v16  ;;  %v10045_v16 = vmul.f32 -1e+30, %v755_v3  ;;  %v10061_v3 = vmul.f32 -1e+30, %v759_v48 }
 0x1cd   : > { %8919 = vmatpush3.xpose.msk.msra.mxu0 %vm1119_vm2, %v1001_v18  ;;  %8925 = vmatprep.mubr.msk.f32.mxu1 %vm9752_vm1, %v9751_v57  ;;  %v695_v13 = vpop.permute.xlu1 %694  ;;  %v669_v18 = vcombine.high %v653_v4, %v653_v4 }
 0x1ce   : > { %8920 = vmatprep.mubr.msk.f32.mxu0 %vm9752_vm1, %v9751_v57  ;;  %8933 = vmatprep.subr.mxu1 %v9751_v57 }
 0x1cf   : > { %v8878_v19 = vpop.f32.mrb[8].mxu1  ;;  %8926 = vmatmul.mubr.msk.f32.vlgmr.msra.gmra.mrb[22].mxu1 %vm1119_vm2, %v8847_v15  ;;  %8928 = vmatprep.subr.mxu0 %v9751_v57  ;;  %v739_v44 = vrot.slane %v669_v18, %v714_v41 }
 0x1d0   : > { %v1080_v20 = vpop.f32.mrb[9].mxu1  ;;  %8921 = vmatmul.mubr.msk.f32.vlgmr.msra.gmra.mrb[22].mxu0 %vm1119_vm2, %v892_v17  ;;  %8934 = vmatpush3.msra.mxu1 %v8878_v19  ;;  %v731_v17 = vrot.slane %v653_v4, %v714_v41 }
 0x1d1   : > { %8929 = vmatpush3.msra.mxu0 %v1080_v20  ;;  %8935 = vmatprep.mubr.msk.f32.mxu1 %vm9752_vm1, %v9751_v57  ;;  %v10048_v20 = vmul.f32 -1e+30, %v754_v6  ;;  %v705_v51 = vpop.permute.xlu1 %704 }
 0x1d2   : > { %8943 = vmatprep.subr.mxu1 %v9751_v57  ;;  %8930 = vmatprep.mubr.msk.f32.mxu0 %vm9752_vm1, %v9751_v57  ;;  %v756_v42 = vadd.f32 %v731_v17, %v695_v13  ;;  %v758_v41 = vadd.f32 %v739_v44, %v705_v51 }
 0x1d3   : > { %v10023_v21 = vpop.f32.mrb[10].mxu1  ;;  %8938 = vmatprep.subr.mxu0 %v9751_v57 }
 0x1d4   : > { %v10026_v22 = vpop.f32.mrb[11].mxu1  ;;  %v10058_v0 = vmul.f32 -1e+30, %v756_v42 }
 0x1d7   : > { %v10028_v23 = vpop.f32.mrb[12].mxu1 }
 0x1d8   : > { %v10030_v24 = vpop.f32.mrb[13].mxu1 }
 0x1db   : > { %v10032_v25 = vpop.f32.mrb[14].mxu1 }
 0x1dc   : > { %v10034_v26 = vpop.f32.mrb[15].mxu1 }
 0x296   : > { %v1268_v9 = vpop.f32.mrb[16].mxu1 }
 0x297   : > { %v1729_v10 = vmul.f32 0.35355338, %v1268_v9  ;;  %v1192_v11 = vpop.f32.mrb[16].mxu0  ;;  %v8897_v12 = vpop.f32.mrb[17].mxu1 }
 0x298   : > { %v1728_v14 = vmul.f32 0.35355338, %v1192_v11  ;;  %v8892_v15 = vpop.f32.mrb[17].mxu0 }
 0x299   : > { %v1737_v19 = vadd.f32 %v1729_v10, %v10041_v2 }
 0x29a   : > { %v1420_v30 = vpop.f32.mrb[18].mxu1  ;;  %v1736_v31 = vadd.f32 %v1728_v14, %v10043_v5  ;;  %v10066_v14 = vmul.f32 -1e+30, %v758_v41 }
 0x29b   : > { %v1731_v32 = vmul.f32 0.35355338, %v1420_v30  ;;  %v1344_v33 = vpop.f32.mrb[18].mxu0  ;;  %v8907_v34 = vpop.f32.mrb[19].mxu1  ;;  %v1747_v35 = vsel %vm1119_vm2, %v1737_v19, -inf }
 0x29c   : > { %v1730_v37 = vmul.f32 0.35355338, %v1344_v33  ;;  %v8902_v39 = vpop.f32.mrb[19].mxu0  ;;  %1748 = vmax.xlane.f32.xlu0 %v1747_v35  ;;  %v1744_v40 = vsel %vm1119_vm2, %v1736_v31, -inf }
 0x29d   : > { %1745 = vmax.xlane.f32.xlu1 %v1744_v40  ;;  %v1739_v46 = vadd.f32 %v1731_v32, %v10045_v16 }
 0x29e   : > { %v1572_v52 = vpop.f32.mrb[20].mxu1  ;;  %v1738_v61 = vadd.f32 %v1730_v37, %v10048_v20 }
 0x29f   : > { %v1733_v53 = vmul.f32 0.35355338, %v1572_v52  ;;  %v1496_v54 = vpop.f32.mrb[20].mxu0  ;;  %v8917_v58 = vpop.f32.mrb[21].mxu1  ;;  %v1753_v59 = vsel %vm1119_vm2, %v1739_v46, -inf }
 0x2a0   : > { %v1732_v62 = vmul.f32 0.35355338, %v1496_v54  ;;  %v8912_v63 = vpop.f32.mrb[21].mxu0  ;;  %1754 = vmax.xlane.f32.xlu0 %v1753_v59  ;;  %v1750_v9 = vsel %vm1119_vm2, %v1738_v61, -inf }
 0x2a1   : > { %v1741_v1 = vadd.f32 %v1733_v53, %v10054_v47 }
 0x2a2   : > { %v1724_v4 = vpop.f32.mrb[22].mxu1  ;;  %v1740_v11 = vadd.f32 %v1732_v62, %v10058_v0 }
 0x2a3   : > { %v1735_v6 = vmul.f32 0.35355338, %v1724_v4  ;;  %v1648_v7 = vpop.f32.mrb[22].mxu0  ;;  %v8927_v8 = vpop.f32.mrb[23].mxu1  ;;  %v1759_v10 = vsel %vm1119_vm2, %v1741_v1, -inf }
 0x2a4   : > { %v1734_v12 = vmul.f32 0.35355338, %v1648_v7  ;;  %v8922_v13 = vpop.f32.mrb[23].mxu0  ;;  %1751 = vmax.xlane.f32.xlu0 %v1750_v9  ;;  %1760 = vmax.xlane.f32.xlu1 %v1759_v10  ;;  %v1756_v17 = vsel %vm1119_vm2, %v1740_v11, -inf }
 0x2a5   : > { %v1743_v15 = vadd.f32 %v1735_v6, %v10061_v3 }
 0x2a6   : > { %v1742_v27 = vadd.f32 %v1734_v12, %v10066_v14 }
 0x2a7   : > { %v1765_v18 = vsel %vm1119_vm2, %v1743_v15, -inf }
 0x2a8   : > { %1757 = vmax.xlane.f32.xlu0 %v1756_v17  ;;  %1766 = vmax.xlane.f32.xlu1 %v1765_v18  ;;  %v1762_v28 = vsel %vm1119_vm2, %v1742_v27, -inf }
 0x2ac   : > { %1763 = vmax.xlane.f32.xlu0 %v1762_v28 }
 0x329   : > { %v1749_v29 = vpop.xlane.xlu0 %1748 }
 0x32a   : > { %v1769_v30 = vsub.f32 %v1737_v19, %v1749_v29  ;;  %v1746_v32 = vpop.xlane.xlu1 %1745 }
 0x32b   : > { %v1768_v33 = vsub.f32 %v1736_v31, %v1746_v32 }
 0x32c   : > { %v1778_v34 = vmul.f32 1.442695, %v1769_v30 }
 0x32d   : > { %v1776_v35 = vmul.f32 1.442695, %v1768_v33  ;;  %v1755_v37 = vpop.xlane.xlu0 %1754 }
 0x32e   : > { %9615 = vpow2.f32 %v1778_v34  ;;  %v1771_v39 = vsub.f32 %v1739_v46, %v1755_v37 }
 0x32f   : > { %9617 = vpow2.f32 %v1776_v35 }
 0x330   : > { %v1782_v40 = vmul.f32 1.442695, %v1771_v39 }
 0x331   : > { %v1752_v42 = vpop.xlane.xlu0 %1751  ;;  %v1761_v44 = vpop.xlane.xlu1 %1760 }
 0x332   : > { %9619 = vpow2.f32 %v1782_v40  ;;  %v1770_v48 = vsub.f32 %v1738_v61, %v1752_v42  ;;  %v1773_v51 = vsub.f32 %v1741_v1, %v1761_v44 }
 0x334   : > { %v1780_v52 = vmul.f32 1.442695, %v1770_v48  ;;  %v1786_v53 = vmul.f32 1.442695, %v1773_v51 }
 0x335   : > { %v1758_v54 = vpop.xlane.xlu0 %1757  ;;  %v1767_v58 = vpop.xlane.xlu1 %1766 }
 0x336   : > { %9621 = vpow2.f32 %v1780_v52  ;;  %v1772_v19 = vsub.f32 %v1740_v11, %v1758_v54  ;;  %v1775_v59 = vsub.f32 %v1743_v15, %v1767_v58 }
 0x337   : > { %9623 = vpow2.f32 %v1786_v53  ;;  %v8262_v53 = vld [vmem:[%s10907_s6 + $0x28] sm:$0xff] }
 0x338   : > { %v9616_v31 = vpop.eup %9615  ;;  %v1784_v62 = vmul.f32 1.442695, %v1772_v19  ;;  %v1790_v63 = vmul.f32 1.442695, %v1775_v59 }
 0x339   : > { %v9618_v41 = vpop.eup %9617  ;;  %v1764_v46 = vpop.xlane.xlu0 %1763  ;;  %v1795_v4 = vsel %vm1119_vm2, %v9616_v31, 0.0 }
 0x33a   : > { %9625 = vpow2.f32 %v1784_v62  ;;  %v1774_v6 = vsub.f32 %v1742_v27, %v1764_v46  ;;  %1796 = vadd.xlane.f32.xlu1 %v1795_v4  ;;  %v1792_v61 = vsel %vm1119_vm2, %v9618_v41, 0.0 }
 0x33b   : > { %9627 = vpow2.f32 %v1790_v63  ;;  %1793 = vadd.xlane.f32.xlu0 %v1792_v61  ;;  %v8263_v63 = vld [vmem:[%s10907_s6 + $0x30] sm:$0xff] }
 0x33c   : > { %v9620_v1 = vpop.eup %9619  ;;  %v1788_v7 = vmul.f32 1.442695, %v1774_v6  ;;  %v8251_v61 = vld [vmem:[%s10906_s5 + $0x30] sm:$0xff] }
 0x33d   : > { %v1801_v8 = vsel %vm1119_vm2, %v9620_v1, 0.0 }
 0x33e   : > { %9629 = vpow2.f32 %v1788_v7  ;;  %1802 = vadd.xlane.f32.xlu1 %v1801_v8 }
 0x340   : > { %v9622_v9 = vpop.eup %9621 }
 0x341   : > { %v9624_v10 = vpop.eup %9623  ;;  %v1798_v11 = vsel %vm1119_vm2, %v9622_v9, 0.0 }
 0x342   : > { %1799 = vadd.xlane.f32.xlu0 %v1798_v11  ;;  %v1807_v12 = vsel %vm1119_vm2, %v9624_v10, 0.0 }
 0x343   : > { %1808 = vadd.xlane.f32.xlu1 %v1807_v12  ;;  %v8275_v12 = vld [vmem:[%s10908_s7 + $0x30] sm:$0xff] }
 0x344   : > { %v9626_v13 = vpop.eup %9625 }
 0x345   : > { %v9628_v15 = vpop.eup %9627  ;;  %v1804_v17 = vsel %vm1119_vm2, %v9626_v13, 0.0 }
 0x346   : > { %1805 = vadd.xlane.f32.xlu0 %v1804_v17  ;;  %v1813_v18 = vsel %vm1119_vm2, %v9628_v15, 0.0 }
 0x347   : > { %1814 = vadd.xlane.f32.xlu1 %v1813_v18 }
 0x348   : > { %v10080_v27 = vpop.eup %9629 }
 0x349   : > { %v1810_v28 = vsel %vm1119_vm2, %v10080_v27, 0.0 }
 0x34a   : > { %1811 = vadd.xlane.f32.xlu0 %v1810_v28 }
 0x3c7   : > { %v1797_v29 = vpop.xlane.xlu1 %1796 }
 0x3c8   : > { %9631 = vrcp.f32 %v1797_v29  ;;  %v1794_v30 = vpop.xlane.xlu0 %1793 }
 0x3c9   : > { %9633 = vrcp.f32 %v1794_v30 }
 0x3cb   : > { %v1803_v32 = vpop.xlane.xlu1 %1802 }
 0x3cc   : > { %9635 = vrcp.f32 %v1803_v32 }
 0x3cf   : > { %v1800_v33 = vpop.xlane.xlu0 %1799 }
 0x3d0   : > { %9637 = vrcp.f32 %v1800_v33  ;;  %v1809_v34 = vpop.xlane.xlu1 %1808 }
 0x3d1   : > { %9639 = vrcp.f32 %v1809_v34 }
 0x3d2   : > { %v9632_v35 = vpop.eup %9631 }
 0x3d3   : > { %v9634_v37 = vpop.eup %9633  ;;  %v1833_v39 = vmul.f32 %v9632_v35, %v9616_v31  ;;  %v1806_v40 = vpop.xlane.xlu0 %1805  ;;  %v8250_v31 = vld [vmem:[%s10906_s5 + $0x28] sm:$0xff] }
 0x3d4   : > { %v1832_v42 = vmul.f32 %v9634_v37, %v9618_v41  ;;  %9641 = vrcp.f32 %v1806_v40  ;;  %v1815_v44 = vpop.xlane.xlu1 %1814  ;;  %v8264_v41 = vld [vmem:[%s10907_s6 + $0x38] sm:$0xff] }
 0x3d5   : > { %9643 = vrcp.f32 %v1815_v44  ;;  %8936 = vmatmul.mubr.msk.f32.vlgmr.msra.gmra.mrb[24].mxu1 %vm1119_vm2, %v1833_v39 }
 0x3d6   : > { %v9636_v48 = vpop.eup %9635  ;;  %8944 = vmatpush3.msra.mxu1 %v10023_v21  ;;  %8931 = vmatmul.mubr.msk.f32.vlgmr.msra.gmra.mrb[24].mxu0 %vm1119_vm2, %v1832_v42 }
 0x3d7   : > { %v1835_v51 = vmul.f32 %v9636_v48, %v9620_v1  ;;  %8939 = vmatpush3.msra.mxu0 %v10026_v22  ;;  %v1812_v52 = vpop.xlane.xlu0 %1811  ;;  %8945 = vmatprep.mubr.msk.f32.mxu1 %vm9752_vm1, %v9751_v57  ;;  %v8261_v22 = vld [vmem:[%s10907_s6 + $0x20] sm:$0xff]  ;;  %v8252_v1 = vld [vmem:[%s10906_s5 + $0x38] sm:$0xff] }
 0x3d8   : > { %9645 = vrcp.f32 %v1812_v52  ;;  %8953 = vmatprep.subr.mxu1 %v9751_v57  ;;  %8940 = vmatprep.mubr.msk.f32.mxu0 %vm9752_vm1, %v9751_v57  ;;  %v9504_v59 = vpack.c.bf16 %v8262_v53, %v8261_v22 }
 0x3d9   : > { %8946 = vmatmul.mubr.msk.f32.vlgmr.msra.gmra.mrb[26].mxu1 %vm1119_vm2, %v1835_v51  ;;  %8948 = vmatprep.subr.mxu0 %v9751_v57 }
 0x3da   : > { %v9638_v21 = vpop.eup %9637  ;;  %8954 = vmatpush3.msra.mxu1 %v10028_v23  ;;  %8955 = vmatprep.mubr.msk.f32.mxu1 %vm9752_vm1, %v9751_v57  ;;  %v8249_v23 = vld [vmem:[%s10906_s5 + $0x20] sm:$0xff] }
 0x3db   : > { %v9640_v54 = vpop.eup %9639  ;;  %v1834_v58 = vmul.f32 %v9638_v21, %v9622_v9  ;;  %8963 = vmatprep.subr.mxu1 %v9751_v57  ;;  %v9500_v9 = vpack.c.bf16 %v8252_v1, %v8251_v61 }
 0x3dc   : > { %v1837_v19 = vmul.f32 %v9640_v54, %v9624_v10  ;;  %v8273_v10 = vld [vmem:[%s10908_s7 + $0x20] sm:$0xff] }
 0x3dd   : > { %8941 = vmatmul.mubr.msk.f32.vlgmr.msra.gmra.mrb[26].mxu0 %vm1119_vm2, %v1834_v58 }
 0x3de   : > { %v9642_v62 = vpop.eup %9641  ;;  %8949 = vmatpush3.msra.mxu0 %v10030_v24  ;;  %8956 = vmatmul.mubr.msk.f32.vlgmr.msra.gmra.mrb[28].mxu1 %vm1119_vm2, %v1837_v19  ;;  %v9496_v24 = vpack.c.bf16 %v8250_v31, %v8249_v23 }
 0x3df   : > { %v9644_v46 = vpop.eup %9643  ;;  %v1836_v4 = vmul.f32 %v9642_v62, %v9626_v13  ;;  %8964 = vmatpush3.msra.mxu1 %v10032_v25  ;;  %8950 = vmatprep.mubr.msk.f32.mxu0 %vm9752_vm1, %v9751_v57  ;;  %v9508_v25 = vpack.c.bf16 %v8264_v41, %v8263_v63  ;;  %v8276_v13 = vld [vmem:[%s10908_s7 + $0x38] sm:$0xff] }
 0x3e0   : > { %v1839_v6 = vmul.f32 %v9644_v46, %v9628_v15  ;;  %8958 = vmatprep.subr.mxu0 %v9751_v57  ;;  %8965 = vmatprep.mubr.msk.f32.mxu1 %vm9752_vm1, %v9751_v57  ;;  %v9516_v15 = vpack.c.bf16 %v8276_v13, %v8275_v12 }
 0x3e1   : > { %9505 = vmatprep.subr.bf16.mxu1 %v9504_v59  ;;  %8951 = vmatmul.mubr.msk.f32.vlgmr.msra.gmra.mrb[28].mxu0 %vm1119_vm2, %v1836_v4 }
 0x3e2   : > { %v9646_v7 = vpop.eup %9645  ;;  %8959 = vmatpush3.msra.mxu0 %v10034_v26  ;;  %8966 = vmatmul.mubr.msk.f32.vlgmr.msra.gmra.mrb[30].mxu1 %vm1119_vm2, %v1839_v6  ;;  %v8274_v26 = vld [vmem:[%s10908_s7 + $0x28] sm:$0xff] }
 0x3e3   : > { %v1838_v8 = vmul.f32 %v9646_v7, %v10080_v27  ;;  %9507 = vmatpush3.bf16.msra.mxu1 %v9504_v59  ;;  %8996 = vmatprep.mubr.msk.f32.mxu1 %vm475_vm0, %v9896_v36  ;;  %v9512_v11 = vpack.c.bf16 %v8274_v26, %v8273_v10 }
 0x3e4   : > { %8960 = vmatprep.mubr.msk.f32.mxu0 %vm9752_vm1, %v9751_v57  ;;  %9497 = vmatprep.subr.bf16.mxu0 %v9496_v24 }
 0x3e5   : > { %9509 = vmatprep.subr.bf16.mxu1 %v9508_v25  ;;  %8961 = vmatmul.mubr.msk.f32.vlgmr.msra.gmra.mrb[30].mxu0 %vm1119_vm2, %v1838_v8 }
 0x3e6   : > { %9499 = vmatpush3.bf16.msra.mxu0 %v9496_v24  ;;  %8976 = vmatprep.mubr.msk.f32.mxu0 %vm475_vm0, %v9896_v36 }
 0x3e7   : > { %9511 = vmatpush3.bf16.msra.mxu1 %v9508_v25  ;;  %9501 = vmatprep.subr.bf16.mxu0 %v9500_v9 }
 0x3e8   : > { %9028 = vmatprep.subr.mxu1 %v9751_v57 }
 0x3ea   : > { %8997 = vmatmul.mubr.msk.f32.vlgmr.msra.gmra.mrb[32].mxu1 %vm475_vm0, %v9898_v38  ;;  %9503 = vmatpush3.bf16.msra.mxu0 %v9500_v9 }
 0x3eb   : > { %8999 = vmatprep.mubr.msk.f32.mxu1 %vm475_vm0, %v9908_v43  ;;  %9513 = vmatprep.subr.bf16.mxu0 %v9512_v11 }
 0x3ed   : > { %8977 = vmatmul.mubr.msk.f32.vlgmr.msra.gmra.mrb[32].mxu0 %vm475_vm0, %v9898_v38 }
 0x3ee   : > { %9000 = vmatmul.mubr.msk.f32.gmra.mrb[34].mxu1 %vm475_vm0, %v9910_v45  ;;  %8979 = vmatprep.mubr.msk.f32.mxu0 %vm475_vm0, %v9908_v43 }
 0x3ef   : > { %9002 = vmatprep.mubr.msk.f32.mxu1 %vm475_vm0, %v9922_v50  ;;  %9515 = vmatpush3.bf16.msra.mxu0 %v9512_v11 }
 0x3f0   : > { %9517 = vmatprep.subr.bf16.mxu0 %v9516_v15 }
 0x3f1   : > { %8980 = vmatmul.mubr.msk.f32.gmra.mrb[34].mxu0 %vm475_vm0, %v9910_v45 }
 0x3f2   : > { %9003 = vmatmul.mubr.msk.f32.gmra.mrb[36].mxu1 %vm475_vm0, %v9916_v49  ;;  %8982 = vmatprep.mubr.msk.f32.mxu0 %vm475_vm0, %v9922_v50 }
 0x3f3   : > { %9005 = vmatprep.mubr.msk.f32.mxu1 %vm475_vm0, %v9934_v56  ;;  %9519 = vmatpush3.bf16.msra.mxu0 %v9516_v15 }
 0x3f4   : > { %9048 = vmatprep.subr.mxu0 %v9751_v57 }
 0x3f5   : > { %8983 = vmatmul.mubr.msk.f32.gmra.mrb[36].mxu0 %vm475_vm0, %v9916_v49 }
 0x3f6   : > { %9006 = vmatmul.mubr.msk.f32.gmra.mrb[38].mxu1 %vm475_vm0, %v9928_v55  ;;  %8985 = vmatprep.mubr.msk.f32.mxu0 %vm475_vm0, %v9934_v56 }
 0x3f7   : > { %9030 = vmatprep.mubr.msk.f32.mxu1 %vm9752_vm1, %v9751_v57 }
 0x3f9   : > { %8986 = vmatmul.mubr.msk.f32.gmra.mrb[38].mxu0 %vm475_vm0, %v9928_v55 }
 0x3fa   : > { %9016 = vmatprep.mubr.msk.f32.mxu0 %vm475_vm0, %v9896_v36 }
 0x3fd   : > { %9017 = vmatmul.mubr.msk.f32.vlgmr.msra.gmra.mrb[40].mxu0 %vm475_vm0, %v9898_v38 }
 0x3fe   : > { %9019 = vmatprep.mubr.msk.f32.mxu0 %vm475_vm0, %v9908_v43 }
 0x401   : > { %9020 = vmatmul.mubr.msk.f32.gmra.mrb[42].mxu0 %vm475_vm0, %v9910_v45 }
 0x402   : > { %9022 = vmatprep.mubr.msk.f32.mxu0 %vm475_vm0, %v9922_v50 }
 0x405   : > { %9023 = vmatmul.mubr.msk.f32.gmra.mrb[44].mxu0 %vm475_vm0, %v9916_v49 }
 0x406   : > { %9025 = vmatprep.mubr.msk.f32.mxu0 %vm475_vm0, %v9934_v56 }
 0x409   : > { %9026 = vmatmul.mubr.msk.f32.gmra.mrb[46].mxu0 %vm475_vm0, %v9928_v55 }
 0x40a   : > { %9050 = vmatprep.mubr.msk.f32.mxu0 %vm9752_vm1, %v9751_v57 }
 0x4a8   : > { %v10205_v17 = vpop.f32.mrb[24].mxu1 }
 0x4a9   : > { %v10207_v18 = vpop.f32.mrb[24].mxu0  ;;  %v8937_v27 = vpop.f32.mrb[25].mxu1 }
 0x4aa   : > { %v8932_v28 = vpop.f32.mrb[25].mxu0 }
 0x4ac   : > { %v10209_v29 = vpop.f32.mrb[26].mxu1 }
 0x4ad   : > { %v8947_v30 = vpop.f32.mrb[27].mxu1 }
 0x4b0   : > { %v10211_v32 = vpop.f32.mrb[26].mxu0 }
 0x4b1   : > { %v10213_v33 = vpop.f32.mrb[28].mxu1  ;;  %v8942_v34 = vpop.f32.mrb[27].mxu0 }
 0x4b2   : > { %v8957_v35 = vpop.f32.mrb[29].mxu1 }
 0x4b4   : > { %v10215_v37 = vpop.f32.mrb[28].mxu0 }
 0x4b5   : > { %v10217_v39 = vpop.f32.mrb[30].mxu1  ;;  %v8952_v40 = vpop.f32.mrb[29].mxu0 }
 0x4b6   : > { %v8967_v42 = vpop.f32.mrb[31].mxu1 }
 0x4b8   : > { %v10219_v44 = vpop.f32.mrb[30].mxu0 }
 0x4b9   : > { %v8962_v48 = vpop.f32.mrb[31].mxu0 }
 0x4bd   : > { %v8998_v51 = vpop.f32.mrb[32].mxu1 }
 0x4be   : > { %v2606_v52 = vpop.f32.mrb[33].mxu1 }
 0x4bf   : > { %9029 = vmatpush3.xpose.msk.msra.mxu1 %vm1119_vm2, %v2606_v52 }
 0x4c0   : > { %v8978_v21 = vpop.f32.mrb[32].mxu0  ;;  %9033 = vmatprep.subr.mxu1 %v9751_v57 }
 0x4c1   : > { %v9001_v22 = vpop.f32.mrb[34].mxu1  ;;  %v2496_v53 = vpop.f32.mrb[33].mxu0 }
 0x4c2   : > { %v2616_v54 = vpop.f32.mrb[35].mxu1  ;;  %9031 = vmatmul.mubr.msk.f32.vlgmr.msra.gmra.mrb[40].mxu1 %vm1119_vm2, %v2496_v53 }
 0x4c3   : > { %9034 = vmatpush3.xpose.msk.msra.mxu1 %vm1119_vm2, %v8998_v51  ;;  %9035 = vmatprep.mubr.msk.f32.mxu1 %vm9752_vm1, %v9751_v57 }
 0x4c4   : > { %v8981_v58 = vpop.f32.mrb[34].mxu0  ;;  %9038 = vmatprep.subr.mxu1 %v9751_v57 }
 0x4c5   : > { %v9004_v19 = vpop.f32.mrb[36].mxu1  ;;  %v2506_v59 = vpop.f32.mrb[35].mxu0 }
 0x4c6   : > { %v2626_v23 = vpop.f32.mrb[37].mxu1  ;;  %9036 = vmatmul.mubr.msk.f32.vlgmr.msra.gmra.mrb[42].mxu1 %vm1119_vm2, %v8978_v21 }
 0x4c7   : > { %9039 = vmatpush3.xpose.msk.msra.mxu1 %vm1119_vm2, %v2616_v54  ;;  %9049 = vmatpush3.xpose.msk.msra.mxu0 %vm1119_vm2, %v2626_v23 }
 0x4c8   : > { %v8984_v31 = vpop.f32.mrb[36].mxu0  ;;  %9040 = vmatprep.mubr.msk.f32.mxu1 %vm9752_vm1, %v9751_v57  ;;  %9043 = vmatprep.subr.mxu1 %v9751_v57 }
 0x4c9   : > { %v9007_v62 = vpop.f32.mrb[38].mxu1  ;;  %v2516_v63 = vpop.f32.mrb[37].mxu0  ;;  %9058 = vmatprep.subr.mxu0 %v9751_v57 }
 0x4ca   : > { %v2636_v41 = vpop.f32.mrb[39].mxu1  ;;  %9041 = vmatmul.mubr.msk.f32.vlgmr.msra.gmra.mrb[44].mxu1 %vm1119_vm2, %v2506_v59  ;;  %9051 = vmatmul.mubr.msk.f32.vlgmr.msra.gmra.mrb[48].mxu0 %vm1119_vm2, %v2516_v63 }
 0x4cb   : > { %9044 = vmatpush3.xpose.msk.msra.mxu1 %vm1119_vm2, %v9001_v22  ;;  %9059 = vmatpush3.xpose.msk.msra.mxu0 %vm1119_vm2, %v2636_v41 }
 0x4cc   : > { %v8987_v46 = vpop.f32.mrb[38].mxu0  ;;  %9045 = vmatprep.mubr.msk.f32.mxu1 %vm9752_vm1, %v9751_v57  ;;  %9053 = vmatprep.subr.mxu1 %v9751_v57 }
 0x4cd   : > { %v2526_v4 = vpop.f32.mrb[39].mxu0  ;;  %9060 = vmatprep.mubr.msk.f32.mxu0 %vm9752_vm1, %v9751_v57  ;;  %9068 = vmatprep.subr.mxu0 %v9751_v57 }
 0x4ce   : > { %9046 = vmatmul.mubr.msk.f32.vlgmr.msra.gmra.mrb[46].mxu1 %vm1119_vm2, %v8981_v58  ;;  %9061 = vmatmul.mubr.msk.f32.vlgmr.msra.gmra.mrb[50].mxu0 %vm1119_vm2, %v2526_v4 }
 0x4cf   : > { %9054 = vmatpush3.xpose.msk.msra.mxu1 %vm1119_vm2, %v9004_v19  ;;  %9055 = vmatprep.mubr.msk.f32.mxu1 %vm9752_vm1, %v9751_v57 }
 0x4d0   : > { %v9018_v6 = vpop.f32.mrb[40].mxu0  ;;  %9063 = vmatprep.subr.mxu1 %v9751_v57  ;;  %9070 = vmatprep.mubr.msk.f32.mxu0 %vm9752_vm1, %v9751_v57 }
 0x4d1   : > { %v2716_v24 = vpop.f32.mrb[41].mxu0 }
 0x4d2   : > { %9056 = vmatmul.mubr.msk.f32.vlgmr.msra.gmra.mrb[48].mxu1 %vm1119_vm2, %v8984_v31  ;;  %9069 = vmatpush3.msra.mxu0 %v2716_v24 }
 0x4d3   : > { %9064 = vmatpush3.xpose.msk.msra.mxu1 %vm1119_vm2, %v9007_v62  ;;  %9065 = vmatprep.mubr.msk.f32.mxu1 %vm9752_vm1, %v9751_v57 }
 0x4d4   : > { %v10257_v61 = vpop.f32.mrb[42].mxu0  ;;  %9073 = vmatprep.subr.mxu1 %v9751_v57  ;;  %9078 = vmatprep.subr.mxu0 %v9751_v57 }
 0x4d5   : > { %v10261_v1 = vpop.f32.mrb[43].mxu0 }
 0x4d6   : > { %9066 = vmatmul.mubr.msk.f32.vlgmr.msra.gmra.mrb[50].mxu1 %vm1119_vm2, %v8987_v46 }
 0x4d7   : > { %9074 = vmatpush3.msra.mxu1 %v9018_v6  ;;  %9075 = vmatprep.mubr.msk.f32.mxu1 %vm9752_vm1, %v9751_v57 }
 0x4d8   : > { %v10266_v25 = vpop.f32.mrb[44].mxu0  ;;  %9083 = vmatprep.subr.mxu1 %v9751_v57 }
 0x4d9   : > { %v10269_v7 = vpop.f32.mrb[45].mxu0 }
 0x4dc   : > { %v10271_v8 = vpop.f32.mrb[46].mxu0 }
 0x4dd   : > { %v10273_v9 = vpop.f32.mrb[47].mxu0 }
 0x595   : > { %v2827_v10 = vpop.f32.mrb[40].mxu1 }
 0x596   : > { %v3363_v26 = vmul.f32 0.35355338, %v2827_v10  ;;  %v9032_v11 = vpop.f32.mrb[41].mxu1 }
 0x598   : > { %v3371_v12 = vadd.f32 %v3363_v26, %v10043_v5 }
 0x599   : > { %v2903_v13 = vpop.f32.mrb[42].mxu1 }
 0x59a   : > { %v3364_v15 = vmul.f32 0.35355338, %v2903_v13  ;;  %v9037_v27 = vpop.f32.mrb[43].mxu1  ;;  %v3379_v28 = vsel %vm1119_vm2, %v3371_v12, -inf }
 0x59b   : > { %3380 = vmax.xlane.f32.xlu1 %v3379_v28 }
 0x59c   : > { %v3372_v30 = vadd.f32 %v3364_v15, %v10041_v2 }
 0x59d   : > { %v2979_v34 = vpop.f32.mrb[44].mxu1  ;;  %v3131_v35 = vpop.f32.mrb[48].mxu0 }
 0x59e   : > { %v3365_v40 = vmul.f32 0.35355338, %v2979_v34  ;;  %v9042_v42 = vpop.f32.mrb[45].mxu1  ;;  %v9052_v48 = vpop.f32.mrb[49].mxu0  ;;  %v3367_v51 = vmul.f32 0.35355338, %v3131_v35 }
 0x59f   : > { %v3382_v52 = vsel %vm1119_vm2, %v3372_v30, -inf }
 0x5a0   : > { %3383 = vmax.xlane.f32.xlu0 %v3382_v52  ;;  %v3373_v21 = vadd.f32 %v3365_v40, %v10048_v20  ;;  %v3375_v31 = vadd.f32 %v3367_v51, %v10058_v0 }
 0x5a1   : > { %v3055_v22 = vpop.f32.mrb[46].mxu1  ;;  %v3283_v53 = vpop.f32.mrb[50].mxu0 }
 0x5a2   : > { %v3366_v54 = vmul.f32 0.35355338, %v3055_v22  ;;  %v9047_v58 = vpop.f32.mrb[47].mxu1  ;;  %v9062_v19 = vpop.f32.mrb[51].mxu0  ;;  %v3369_v59 = vmul.f32 0.35355338, %v3283_v53 }
 0x5a3   : > { %v3385_v23 = vsel %vm1119_vm2, %v3373_v21, -inf  ;;  %v3391_v6 = vsel %vm1119_vm2, %v3375_v31, -inf }
 0x5a4   : > { %3386 = vmax.xlane.f32.xlu1 %v3385_v23  ;;  %v3374_v62 = vadd.f32 %v3366_v54, %v10045_v16  ;;  %v3377_v24 = vadd.f32 %v3369_v59, %v10066_v14 }
 0x5a5   : > { %v3207_v63 = vpop.f32.mrb[48].mxu1 }
 0x5a6   : > { %v3368_v41 = vmul.f32 0.35355338, %v3207_v63  ;;  %v9057_v46 = vpop.f32.mrb[49].mxu1  ;;  %v3388_v4 = vsel %vm1119_vm2, %v3374_v62, -inf  ;;  %v3397_v27 = vsel %vm1119_vm2, %v3377_v24, -inf }
 0x5a7   : > { %3389 = vmax.xlane.f32.xlu0 %v3388_v4 }
 0x5a8   : > { %3392 = vmax.xlane.f32.xlu1 %v3391_v6  ;;  %v3376_v10 = vadd.f32 %v3368_v41, %v10054_v47 }
 0x5a9   : > { %v3359_v26 = vpop.f32.mrb[50].mxu1 }
 0x5aa   : > { %v3370_v11 = vmul.f32 0.35355338, %v3359_v26  ;;  %v9067_v13 = vpop.f32.mrb[51].mxu1  ;;  %v3394_v15 = vsel %vm1119_vm2, %v3376_v10, -inf }
 0x5ab   : > { %3395 = vmax.xlane.f32.xlu0 %v3394_v15 }
 0x5ac   : > { %3398 = vmax.xlane.f32.xlu1 %v3397_v27  ;;  %v3378_v28 = vadd.f32 %v3370_v11, %v10061_v3 }
 0x5ae   : > { %v3400_v34 = vsel %vm1119_vm2, %v3378_v28, -inf }
 0x5af   : > { %3401 = vmax.xlane.f32.xlu0 %v3400_v34 }
 0x628   : > { %v3381_v35 = vpop.xlane.xlu1 %3380 }
 0x629   : > { %v3403_v40 = vsub.f32 %v3371_v12, %v3381_v35 }
 0x62b   : > { %v3411_v42 = vmul.f32 1.442695, %v3403_v40 }
 0x62d   : > { %9647 = vpow2.f32 %v3411_v42  ;;  %v3384_v48 = vpop.xlane.xlu0 %3383 }
 0x62e   : > { %v3404_v51 = vsub.f32 %v3372_v30, %v3384_v48 }
 0x630   : > { %v3413_v52 = vmul.f32 1.442695, %v3404_v51 }
 0x631   : > { %v3387_v22 = vpop.xlane.xlu1 %3386 }
 0x632   : > { %9649 = vpow2.f32 %v3413_v52  ;;  %v3405_v53 = vsub.f32 %v3373_v21, %v3387_v22 }
 0x634   : > { %v3415_v54 = vmul.f32 1.442695, %v3405_v53  ;;  %v3390_v58 = vpop.xlane.xlu0 %3389 }
 0x635   : > { %v3393_v19 = vpop.xlane.xlu1 %3392  ;;  %v3406_v59 = vsub.f32 %v3374_v62, %v3390_v58 }
 0x636   : > { %9651 = vpow2.f32 %v3415_v54  ;;  %v3407_v23 = vsub.f32 %v3375_v31, %v3393_v19 }
 0x637   : > { %v9648_v63 = vpop.eup %9647  ;;  %v3417_v41 = vmul.f32 1.442695, %v3406_v59 }
 0x638   : > { %v3419_v46 = vmul.f32 1.442695, %v3407_v23  ;;  %v3396_v4 = vpop.xlane.xlu0 %3395  ;;  %v3427_v12 = vsel %vm1119_vm2, %v9648_v63, 0.0 }
 0x639   : > { %9653 = vpow2.f32 %v3417_v41  ;;  %v3399_v6 = vpop.xlane.xlu1 %3398  ;;  %v3408_v26 = vsub.f32 %v3376_v10, %v3396_v4  ;;  %3428 = vadd.xlane.f32.xlu1 %v3427_v12 }
 0x63a   : > { %9655 = vpow2.f32 %v3419_v46  ;;  %v3409_v30 = vsub.f32 %v3377_v24, %v3399_v6 }
 0x63b   : > { %v3421_v11 = vmul.f32 1.442695, %v3408_v26 }
 0x63c   : > { %v9650_v21 = vpop.eup %9649  ;;  %v3423_v13 = vmul.f32 1.442695, %v3409_v30  ;;  %v3402_v15 = vpop.xlane.xlu0 %3401 }
 0x63d   : > { %9657 = vpow2.f32 %v3421_v11  ;;  %v3410_v62 = vsub.f32 %v3378_v28, %v3402_v15  ;;  %v3430_v31 = vsel %vm1119_vm2, %v9650_v21, 0.0 }
 0x63e   : > { %9659 = vpow2.f32 %v3423_v13  ;;  %3431 = vadd.xlane.f32.xlu0 %v3430_v31 }
 0x63f   : > { %v3425_v27 = vmul.f32 1.442695, %v3410_v62  ;;  %v8327_v62 = vld [vmem:[%s10906_s5 + $0x48] sm:$0xff] }
 0x640   : > { %v9652_v34 = vpop.eup %9651 }
 0x641   : > { %9661 = vpow2.f32 %v3425_v27  ;;  %v3433_v35 = vsel %vm1119_vm2, %v9652_v34, 0.0 }
 0x642   : > { %3434 = vadd.xlane.f32.xlu1 %v3433_v35 }
 0x643   : > { %v9654_v10 = vpop.eup %9653 }
 0x644   : > { %v9656_v40 = vpop.eup %9655  ;;  %v3436_v24 = vsel %vm1119_vm2, %v9654_v10, 0.0 }
 0x645   : > { %v3439_v42 = vsel %vm1119_vm2, %v9656_v40, 0.0  ;;  %3437 = vadd.xlane.f32.xlu0 %v3436_v24 }
 0x646   : > { %3440 = vadd.xlane.f32.xlu1 %v3439_v42  ;;  %v8338_v42 = vld [vmem:[%s10907_s6 + $0x40] sm:$0xff] }
 0x647   : > { %v9658_v48 = vpop.eup %9657 }
 0x648   : > { %v9660_v28 = vpop.eup %9659  ;;  %v3442_v51 = vsel %vm1119_vm2, %v9658_v48, 0.0 }
 0x649   : > { %v3445_v52 = vsel %vm1119_vm2, %v9660_v28, 0.0  ;;  %3443 = vadd.xlane.f32.xlu0 %v3442_v51  ;;  %v8341_v51 = vld [vmem:[%s10907_s6 + $0x58] sm:$0xff] }
 0x64a   : > { %3446 = vadd.xlane.f32.xlu1 %v3445_v52 }
 0x64b   : > { %v9662_v22 = vpop.eup %9661 }
 0x64c   : > { %v3448_v53 = vsel %vm1119_vm2, %v9662_v22, 0.0 }
 0x64d   : > { %3449 = vadd.xlane.f32.xlu0 %v3448_v53  ;;  %v2424_v53 = vld [vmem:[%s10909_s8] sm:$0xff] }
 0x6c6   : > { %v3429_v54 = vpop.xlane.xlu1 %3428 }
 0x6c7   : > { %9663 = vrcp.f32 %v3429_v54 }
 0x6cb   : > { %v3432_v58 = vpop.xlane.xlu0 %3431 }
 0x6cc   : > { %9665 = vrcp.f32 %v3432_v58 }
 0x6cf   : > { %v3435_v19 = vpop.xlane.xlu1 %3434 }
 0x6d0   : > { %9667 = vrcp.f32 %v3435_v19  ;;  %v8350_v19 = vld [vmem:[%s10908_s7 + $0x40] sm:$0xff] }
 0x6d1   : > { %v9664_v59 = vpop.eup %9663 }
 0x6d2   : > { %v3467_v23 = vmul.f32 %v9664_v59, %v9648_v63  ;;  %v3438_v41 = vpop.xlane.xlu0 %3437  ;;  %v8351_v59 = vld [vmem:[%s10908_s7 + $0x48] sm:$0xff] }
 0x6d3   : > { %v3441_v46 = vpop.xlane.xlu1 %3440  ;;  %9669 = vrcp.f32 %v3438_v41 }
 0x6d4   : > { %9671 = vrcp.f32 %v3441_v46  ;;  %9071 = vmatmul.mubr.msk.f32.vlgmr.msra.gmra.mrb[52].mxu0 %vm1119_vm2, %v3467_v23  ;;  %v9536_v23 = vpack.c.bf16 %v8351_v59, %v8350_v19 }
 0x6d5   : > { %9079 = vmatpush3.msra.mxu0 %v10261_v1  ;;  %9080 = vmatprep.mubr.msk.f32.mxu0 %vm9752_vm1, %v9751_v57 }
 0x6d6   : > { %v9666_v4 = vpop.eup %9665  ;;  %v3444_v12 = vpop.xlane.xlu0 %3443  ;;  %9088 = vmatprep.subr.mxu0 %v9751_v57 }
 0x6d7   : > { %v3468_v6 = vmul.f32 %v9666_v4, %v9650_v21  ;;  %v3447_v26 = vpop.xlane.xlu1 %3446  ;;  %9673 = vrcp.f32 %v3444_v12 }
 0x6d8   : > { %9675 = vrcp.f32 %v3447_v26 }
 0x6d9   : > { %9076 = vmatmul.mubr.msk.f32.vlgmr.msra.gmra.mrb[52].mxu1 %vm1119_vm2, %v3468_v6 }
 0x6da   : > { %v9668_v63 = vpop.eup %9667  ;;  %9084 = vmatpush3.msra.mxu1 %v10257_v61  ;;  %v3450_v30 = vpop.xlane.xlu0 %3449  ;;  %9085 = vmatprep.mubr.msk.f32.mxu1 %vm9752_vm1, %v9751_v57  ;;  %v8326_v61 = vld [vmem:[%s10906_s5 + $0x40] sm:$0xff] }
 0x6db   : > { %v3469_v1 = vmul.f32 %v9668_v63, %v9652_v34  ;;  %9677 = vrcp.f32 %v3450_v30  ;;  %9093 = vmatprep.subr.mxu1 %v9751_v57  ;;  %v9520_v34 = vpack.c.bf16 %v8327_v62, %v8326_v61  ;;  %v8352_v61 = vld [vmem:[%s10908_s7 + $0x50] sm:$0xff]  ;;  %v8353_v62 = vld [vmem:[%s10908_s7 + $0x58] sm:$0xff] }
 0x6dd   : > { %v9670_v11 = vpop.eup %9669  ;;  %9081 = vmatmul.mubr.msk.f32.vlgmr.msra.gmra.mrb[54].mxu0 %vm1119_vm2, %v3469_v1 }
 0x6de   : > { %v9672_v21 = vpop.eup %9671  ;;  %v3470_v13 = vmul.f32 %v9670_v11, %v9654_v10  ;;  %9089 = vmatpush3.msra.mxu0 %v10269_v7  ;;  %9090 = vmatprep.mubr.msk.f32.mxu0 %vm9752_vm1, %v9751_v57  ;;  %v8328_v10 = vld [vmem:[%s10906_s5 + $0x50] sm:$0xff] }
 0x6df   : > { %v3471_v15 = vmul.f32 %v9672_v21, %v9656_v40  ;;  %9098 = vmatprep.subr.mxu0 %v9751_v57 }
 0x6e0   : > { %9086 = vmatmul.mubr.msk.f32.vlgmr.msra.gmra.mrb[54].mxu1 %vm1119_vm2, %v3470_v13 }
 0x6e1   : > { %v9674_v31 = vpop.eup %9673  ;;  %9091 = vmatmul.mubr.msk.f32.vlgmr.msra.gmra.mrb[56].mxu0 %vm1119_vm2, %v3471_v15  ;;  %9094 = vmatpush3.msra.mxu1 %v10266_v25  ;;  %v8329_v25 = vld [vmem:[%s10906_s5 + $0x58] sm:$0xff] }
 0x6e2   : > { %v9676_v7 = vpop.eup %9675  ;;  %v3472_v27 = vmul.f32 %v9674_v31, %v9658_v48  ;;  %9099 = vmatpush3.msra.mxu0 %v10273_v9  ;;  %9095 = vmatprep.mubr.msk.f32.mxu1 %vm9752_vm1, %v9751_v57  ;;  %v9524_v24 = vpack.c.bf16 %v8329_v25, %v8328_v10  ;;  %v8339_v48 = vld [vmem:[%s10907_s6 + $0x48] sm:$0xff] }
 0x6e3   : > { %v3473_v35 = vmul.f32 %v9676_v7, %v9660_v28  ;;  %9100 = vmatprep.mubr.msk.f32.mxu0 %vm9752_vm1, %v9751_v57  ;;  %9103 = vmatprep.subr.mxu1 %v9751_v57  ;;  %v8340_v28 = vld [vmem:[%s10907_s6 + $0x50] sm:$0xff]  ;;  %v9540_v7 = vpack.c.bf16 %v8353_v62, %v8352_v61 }
 0x6e4   : > { %9096 = vmatmul.mubr.msk.f32.vlgmr.msra.gmra.mrb[56].mxu1 %vm1119_vm2, %v3472_v27  ;;  %v9532_v52 = vpack.c.bf16 %v8341_v51, %v8340_v28 }
 0x6e5   : > { %v9678_v9 = vpop.eup %9677  ;;  %9101 = vmatmul.mubr.msk.f32.vlgmr.msra.gmra.mrb[58].mxu0 %vm1119_vm2, %v3473_v35  ;;  %9104 = vmatpush3.msra.mxu1 %v10271_v8  ;;  %v9528_v8 = vpack.c.bf16 %v8339_v48, %v8338_v42 }
 0x6e6   : > { %v3474_v40 = vmul.f32 %v9678_v9, %v9662_v22  ;;  %9105 = vmatprep.mubr.msk.f32.mxu1 %vm9752_vm1, %v9751_v57  ;;  %9521 = vmatprep.subr.bf16.mxu1 %v9520_v34  ;;  %v8309_v22 = vld [vmem:[%s10909_s8 + $0x8] sm:$0xff] }
 0x6e7   : > { %9108 = vmatprep.subr.mxu0 %v8309_v22 }
 0x6e8   : > { %9106 = vmatmul.mubr.msk.f32.vlgmr.msra.gmra.mrb[58].mxu1 %vm1119_vm2, %v3474_v40  ;;  %9109 = vmatpush3.msra.mxu0 %v8309_v22 }
 0x6e9   : > { %9523 = vmatpush3.bf16.msra.mxu1 %v9520_v34  ;;  %9144 = vmatprep.mubr.msk.f32.mxu1 %vm475_vm0, %v9896_v36 }
 0x6ea   : > { %9525 = vmatprep.subr.bf16.mxu1 %v9524_v24  ;;  %9122 = vmatprep.subr.mxu0 %v2424_v53 }
 0x6ed   : > { %9527 = vmatpush3.bf16.msra.mxu1 %v9524_v24 }
 0x6ee   : > { %9529 = vmatprep.subr.bf16.mxu1 %v9528_v8 }
 0x6f0   : > { %9145 = vmatmul.mubr.msk.f32.vlgmr.msra.gmra.mrb[60].mxu1 %vm475_vm0, %v9898_v38 }
 0x6f1   : > { %9147 = vmatprep.mubr.msk.f32.mxu1 %vm475_vm0, %v9908_v43  ;;  %9531 = vmatpush3.bf16.msra.mxu1 %v9528_v8 }
 0x6f2   : > { %9533 = vmatprep.subr.bf16.mxu1 %v9532_v52 }
 0x6f4   : > { %9148 = vmatmul.mubr.msk.f32.gmra.mrb[62].mxu1 %vm475_vm0, %v9910_v45 }
 0x6f5   : > { %9150 = vmatprep.mubr.msk.f32.mxu1 %vm475_vm0, %v9922_v50  ;;  %9535 = vmatpush3.bf16.msra.mxu1 %v9532_v52 }
 0x6f6   : > { %9196 = vmatprep.subr.mxu1 %v9751_v57 }
 0x6f8   : > { %9151 = vmatmul.mubr.msk.f32.gmra.mrb[64].mxu1 %vm475_vm0, %v9916_v49 }
 0x6f9   : > { %9153 = vmatprep.mubr.msk.f32.mxu1 %vm475_vm0, %v9934_v56 }
 0x6fc   : > { %9154 = vmatmul.mubr.msk.f32.gmra.mrb[66].mxu1 %vm475_vm0, %v9928_v55 }
 0x6fd   : > { %9164 = vmatprep.mubr.msk.f32.mxu1 %vm475_vm0, %v9896_v36 }
 0x700   : > { %9165 = vmatmul.mubr.msk.f32.vlgmr.msra.gmra.mrb[68].mxu1 %vm475_vm0, %v9898_v38 }
 0x701   : > { %9167 = vmatprep.mubr.msk.f32.mxu1 %vm475_vm0, %v9908_v43 }
 0x704   : > { %9168 = vmatmul.mubr.msk.f32.gmra.mrb[70].mxu1 %vm475_vm0, %v9910_v45 }
 0x705   : > { %9170 = vmatprep.mubr.msk.f32.mxu1 %vm475_vm0, %v9922_v50 }
 0x708   : > { %9171 = vmatmul.mubr.msk.f32.gmra.mrb[72].mxu1 %vm475_vm0, %v9916_v49 }
 0x709   : > { %9173 = vmatprep.mubr.msk.f32.mxu1 %vm475_vm0, %v9934_v56 }
 0x70c   : > { %9174 = vmatmul.mubr.msk.f32.gmra.mrb[74].mxu1 %vm475_vm0, %v9928_v55 }
 0x70d   : > { %9198 = vmatprep.mubr.msk.f32.mxu1 %vm9752_vm1, %v9751_v57 }
 0x7a7   : > { %v3544_v54 = vpop.f32.mrb[52].mxu0 }
 0x7a8   : > { %v9072_v58 = vpop.f32.mrb[53].mxu0  ;;  %9110 = vmatprep.mubr.msk.f32.mxu0 %vm1119_vm2, %v3544_v54 }
 0x7ac   : > { %v3617_v41 = vpop.f32.mrb[52].mxu1 }
 0x7ad   : > { %v9077_v46 = vpop.f32.mrb[53].mxu1  ;;  %9111 = vmatmul.mubr.msk.f32.vlgmr.msra.gmra.mrb[60].mxu0 %vm1119_vm2, %v3617_v41 }
 0x7ae   : > { %9123 = vmatpush3.msra.mxu0 %v2424_v53 }
 0x7af   : > { %9537 = vmatprep.subr.bf16.mxu0 %v9536_v23 }
 0x7b0   : > { %v3690_v4 = vpop.f32.mrb[54].mxu0 }
 0x7b1   : > { %v9082_v12 = vpop.f32.mrb[55].mxu0  ;;  %9113 = vmatprep.mubr.msk.f32.mxu0 %vm1119_vm2, %v3690_v4 }
 0x7b3   : > { %v3763_v6 = vpop.f32.mrb[54].mxu1 }
 0x7b4   : > { %v3836_v26 = vpop.f32.mrb[56].mxu0  ;;  %v9087_v63 = vpop.f32.mrb[55].mxu1  ;;  %9114 = vmatmul.mubr.msk.f32.gmra.mrb[62].mxu0 %vm1119_vm2, %v3763_v6 }
 0x7b5   : > { %v9092_v30 = vpop.f32.mrb[57].mxu0  ;;  %9116 = vmatprep.mubr.msk.f32.mxu0 %vm1119_vm2, %v3836_v26 }
 0x7b7   : > { %v3909_v1 = vpop.f32.mrb[56].mxu1 }
 0x7b8   : > { %v3982_v11 = vpop.f32.mrb[58].mxu0  ;;  %v9097_v21 = vpop.f32.mrb[57].mxu1  ;;  %9117 = vmatmul.mubr.msk.f32.gmra.mrb[64].mxu0 %vm1119_vm2, %v3909_v1 }
 0x7b9   : > { %v9102_v13 = vpop.f32.mrb[59].mxu0  ;;  %9119 = vmatprep.mubr.msk.f32.mxu0 %vm1119_vm2, %v3982_v11 }
 0x7bb   : > { %v4055_v15 = vpop.f32.mrb[58].mxu1 }
 0x7bc   : > { %v9107_v31 = vpop.f32.mrb[59].mxu1  ;;  %9120 = vmatmul.mubr.msk.f32.gmra.mrb[66].mxu0 %vm1119_vm2, %v4055_v15 }
 0x7bd   : > { %9124 = vmatprep.mubr.msk.f32.mxu0 %vm1119_vm2, %v10207_v18 }
 0x7c0   : > { %9125 = vmatmul.mubr.msk.f32.vlgmr.msra.gmra.mrb[60].mxu0 %vm1119_vm2, %v10205_v17 }
 0x7c1   : > { %9127 = vmatprep.mubr.msk.f32.mxu0 %vm1119_vm2, %v10211_v32  ;;  %9539 = vmatpush3.bf16.msra.mxu0 %v9536_v23 }
 0x7c2   : > { %9541 = vmatprep.subr.bf16.mxu0 %v9540_v7 }
 0x7c3   : > { %v9146_v27 = vpop.f32.mrb[60].mxu1 }
 0x7c4   : > { %v4390_v34 = vpop.f32.mrb[61].mxu1  ;;  %9128 = vmatmul.mubr.msk.f32.gmra.mrb[62].mxu0 %vm1119_vm2, %v10209_v29 }
 0x7c5   : > { %9130 = vmatprep.mubr.msk.f32.mxu0 %vm1119_vm2, %v10215_v37  ;;  %9543 = vmatpush3.bf16.msra.mxu0 %v9540_v7 }
 0x7c6   : > { %9211 = vmatprep.subr.mxu0 %v9751_v57 }
 0x7c7   : > { %v9149_v18 = vpop.f32.mrb[62].mxu1 }
 0x7c8   : > { %v4400_v35 = vpop.f32.mrb[63].mxu1  ;;  %9131 = vmatmul.mubr.msk.f32.gmra.mrb[64].mxu0 %vm1119_vm2, %v10213_v33 }
 0x7c9   : > { %9133 = vmatprep.mubr.msk.f32.mxu0 %vm1119_vm2, %v10219_v44 }
 0x7cb   : > { %v9152_v17 = vpop.f32.mrb[64].mxu1 }
 0x7cc   : > { %v4410_v32 = vpop.f32.mrb[65].mxu1  ;;  %9134 = vmatmul.mubr.msk.f32.gmra.mrb[66].mxu0 %vm1119_vm2, %v10217_v39 }
 0x7cd   : > { %9184 = vmatprep.mubr.msk.f32.mxu0 %vm475_vm0, %v9896_v36 }
 0x7cf   : > { %v9155_v29 = vpop.f32.mrb[66].mxu1 }
 0x7d0   : > { %v4420_v37 = vpop.f32.mrb[67].mxu1  ;;  %9185 = vmatmul.mubr.msk.f32.vlgmr.msra.gmra.mrb[68].mxu0 %vm475_vm0, %v9898_v38 }
 0x7d1   : > { %9187 = vmatprep.mubr.msk.f32.mxu0 %vm475_vm0, %v9908_v43 }
 0x7d3   : > { %v9166_v33 = vpop.f32.mrb[68].mxu1 }
 0x7d4   : > { %v4500_v10 = vpop.f32.mrb[69].mxu1  ;;  %9188 = vmatmul.mubr.msk.f32.gmra.mrb[70].mxu0 %vm475_vm0, %v9910_v45 }
 0x7d5   : > { %9197 = vmatpush3.xpose.msk.msra.mxu1 %vm1119_vm2, %v4500_v10  ;;  %9190 = vmatprep.mubr.msk.f32.mxu0 %vm475_vm0, %v9922_v50 }
 0x7d6   : > { %9201 = vmatprep.subr.mxu1 %v9751_v57 }
 0x7d7   : > { %v9169_v39 = vpop.f32.mrb[70].mxu1 }
 0x7d8   : > { %v4510_v44 = vpop.f32.mrb[71].mxu1  ;;  %9199 = vmatmul.mubr.msk.f32.vlgmr.msra.gmra.mrb[76].mxu1 %vm1119_vm2, %v4390_v34  ;;  %9212 = vmatpush3.xpose.msk.msra.mxu0 %vm1119_vm2, %v9169_v39 }
 0x7d9   : > { %9191 = vmatmul.mubr.msk.f32.gmra.mrb[72].mxu0 %vm475_vm0, %v9916_v49  ;;  %9202 = vmatpush3.xpose.msk.msra.mxu1 %vm1119_vm2, %v9166_v33 }
 0x7da   : > { %9193 = vmatprep.mubr.msk.f32.mxu0 %vm475_vm0, %v9934_v56  ;;  %9203 = vmatprep.mubr.msk.f32.mxu1 %vm9752_vm1, %v9751_v57 }
 0x7db   : > { %v9172_v25 = vpop.f32.mrb[72].mxu1  ;;  %9206 = vmatprep.subr.mxu1 %v9751_v57  ;;  %9221 = vmatprep.subr.mxu0 %v9751_v57 }
 0x7dc   : > { %v4520_v9 = vpop.f32.mrb[73].mxu1  ;;  %9204 = vmatmul.mubr.msk.f32.vlgmr.msra.gmra.mrb[78].mxu1 %vm1119_vm2, %v9146_v27 }
 0x7dd   : > { %9194 = vmatmul.mubr.msk.f32.gmra.mrb[74].mxu0 %vm475_vm0, %v9928_v55  ;;  %9207 = vmatpush3.xpose.msk.msra.mxu1 %vm1119_vm2, %v4510_v44 }
 0x7de   : > { %9208 = vmatprep.mubr.msk.f32.mxu1 %vm9752_vm1, %v9751_v57  ;;  %9213 = vmatprep.mubr.msk.f32.mxu0 %vm9752_vm1, %v9751_v57 }
 0x7df   : > { %v9175_v40 = vpop.f32.mrb[74].mxu1  ;;  %9216 = vmatprep.subr.mxu1 %v9751_v57 }
 0x7e0   : > { %v4530_v24 = vpop.f32.mrb[75].mxu1  ;;  %9209 = vmatmul.mubr.msk.f32.vlgmr.msra.gmra.mrb[80].mxu1 %vm1119_vm2, %v4400_v35 }
 0x7e1   : > { %9214 = vmatmul.mubr.msk.f32.vlgmr.msra.gmra.mrb[76].mxu0 %vm1119_vm2, %v9149_v18  ;;  %9217 = vmatpush3.xpose.msk.msra.mxu1 %vm1119_vm2, %v4520_v9 }
 0x7e2   : > { %9222 = vmatpush3.xpose.msk.msra.mxu0 %vm1119_vm2, %v9172_v25  ;;  %9218 = vmatprep.mubr.msk.f32.mxu1 %vm9752_vm1, %v9751_v57 }
 0x7e3   : > { %9223 = vmatprep.mubr.msk.f32.mxu0 %vm9752_vm1, %v9751_v57  ;;  %9226 = vmatprep.subr.mxu1 %v9751_v57 }
 0x7e4   : > { %9219 = vmatmul.mubr.msk.f32.vlgmr.msra.gmra.mrb[82].mxu1 %vm1119_vm2, %v4410_v32  ;;  %9231 = vmatprep.subr.mxu0 %v9751_v57 }
 0x7e5   : > { %9224 = vmatmul.mubr.msk.f32.vlgmr.msra.gmra.mrb[78].mxu0 %vm1119_vm2, %v9152_v17  ;;  %9227 = vmatpush3.xpose.msk.msra.mxu1 %vm1119_vm2, %v4530_v24 }
 0x7e6   : > { %9232 = vmatpush3.xpose.msk.msra.mxu0 %vm1119_vm2, %v9175_v40  ;;  %9228 = vmatprep.mubr.msk.f32.mxu1 %vm9752_vm1, %v9751_v57 }
 0x7e7   : > { %9233 = vmatprep.mubr.msk.f32.mxu0 %vm9752_vm1, %v9751_v57  ;;  %9241 = vmatprep.subr.mxu0 %v9751_v57 }
 0x7e8   : > { %9229 = vmatmul.mubr.msk.f32.vlgmr.msra.gmra.mrb[84].mxu1 %vm1119_vm2, %v4420_v37  ;;  %9236 = vmatprep.subr.mxu1 %v9751_v57 }
 0x7e9   : > { %9234 = vmatmul.mubr.msk.f32.vlgmr.msra.gmra.mrb[80].mxu0 %vm1119_vm2, %v9155_v29  ;;  %9238 = vmatprep.mubr.msk.f32.mxu1 %vm9752_vm1, %v9751_v57 }
 0x7ea   : > { %9243 = vmatprep.mubr.msk.f32.mxu0 %vm9752_vm1, %v9751_v57 }
 0x8a3   : > { %v9186_v42 = vpop.f32.mrb[68].mxu0 }
 0x8a4   : > { %v4610_v48 = vpop.f32.mrb[69].mxu0  ;;  %9242 = vmatpush3.msra.mxu0 %v9186_v42 }
 0x8a5   : > { %9237 = vmatpush3.msra.mxu1 %v4610_v48  ;;  %9251 = vmatprep.subr.mxu0 %v9751_v57 }
 0x8a6   : > { %9246 = vmatprep.subr.mxu1 %v9751_v57 }
 0x8a7   : > { %v10491_v8 = vpop.f32.mrb[70].mxu0 }
 0x8a8   : > { %v10493_v28 = vpop.f32.mrb[71].mxu0 }
 0x8ab   : > { %v4721_v51 = vpop.f32.mrb[76].mxu1 }
 0x8ac   : > { %v5257_v52 = vmul.f32 0.35355338, %v4721_v51  ;;  %v10495_v22 = vpop.f32.mrb[72].mxu0  ;;  %v9200_v53 = vpop.f32.mrb[77].mxu1 }
 0x8ad   : > { %v10497_v54 = vpop.f32.mrb[73].mxu0 }
 0x8ae   : > { %v5265_v58 = vadd.f32 %v5257_v52, %v10043_v5 }
 0x8af   : > { %v4797_v19 = vpop.f32.mrb[78].mxu1 }
 0x8b0   : > { %v5258_v59 = vmul.f32 0.35355338, %v4797_v19  ;;  %v10500_v23 = vpop.f32.mrb[74].mxu0  ;;  %v9205_v41 = vpop.f32.mrb[79].mxu1  ;;  %v5273_v46 = vsel %vm1119_vm2, %v5265_v58, -inf }
 0x8b1   : > { %v10503_v4 = vpop.f32.mrb[75].mxu0  ;;  %5274 = vmax.xlane.f32.xlu1 %v5273_v46 }
 0x8b2   : > { %v5266_v12 = vadd.f32 %v5258_v59, %v10041_v2 }
 0x8b3   : > { %v4873_v6 = vpop.f32.mrb[80].mxu1 }
 0x8b4   : > { %v5259_v26 = vmul.f32 0.35355338, %v4873_v6  ;;  %v9210_v63 = vpop.f32.mrb[81].mxu1  ;;  %v4949_v30 = vpop.f32.mrb[76].mxu0  ;;  %v5276_v1 = vsel %vm1119_vm2, %v5266_v12, -inf }
 0x8b5   : > { %v5260_v11 = vmul.f32 0.35355338, %v4949_v30  ;;  %v9215_v21 = vpop.f32.mrb[77].mxu0  ;;  %5277 = vmax.xlane.f32.xlu0 %v5276_v1 }
 0x8b6   : > { %v5267_v13 = vadd.f32 %v5259_v26, %v10048_v20 }
 0x8b7   : > { %v5025_v15 = vpop.f32.mrb[82].mxu1  ;;  %v5268_v61 = vadd.f32 %v5260_v11, %v10045_v16 }
 0x8b8   : > { %v5261_v62 = vmul.f32 0.35355338, %v5025_v15  ;;  %v9220_v31 = vpop.f32.mrb[83].mxu1  ;;  %v5101_v7 = vpop.f32.mrb[78].mxu0  ;;  %v5279_v27 = vsel %vm1119_vm2, %v5267_v13, -inf }
 0x8b9   : > { %v5262_v34 = vmul.f32 0.35355338, %v5101_v7  ;;  %v9225_v18 = vpop.f32.mrb[79].mxu0  ;;  %5280 = vmax.xlane.f32.xlu1 %v5279_v27  ;;  %v5282_v35 = vsel %vm1119_vm2, %v5268_v61, -inf }
 0x8ba   : > { %5283 = vmax.xlane.f32.xlu0 %v5282_v35  ;;  %v5269_v17 = vadd.f32 %v5261_v62, %v10058_v0 }
 0x8bb   : > { %v5177_v32 = vpop.f32.mrb[84].mxu1  ;;  %v5270_v29 = vadd.f32 %v5262_v34, %v10054_v47 }
 0x8bc   : > { %v5263_v37 = vmul.f32 0.35355338, %v5177_v32  ;;  %v9230_v33 = vpop.f32.mrb[85].mxu1  ;;  %v5253_v10 = vpop.f32.mrb[80].mxu0  ;;  %v5285_v39 = vsel %vm1119_vm2, %v5269_v17, -inf }
 0x8bd   : > { %v5264_v44 = vmul.f32 0.35355338, %v5253_v10  ;;  %v9235_v25 = vpop.f32.mrb[81].mxu0  ;;  %5286 = vmax.xlane.f32.xlu1 %v5285_v39  ;;  %v5288_v9 = vsel %vm1119_vm2, %v5270_v29, -inf }
 0x8be   : > { %5289 = vmax.xlane.f32.xlu0 %v5288_v9  ;;  %v5271_v40 = vadd.f32 %v5263_v37, %v10066_v14 }
 0x8bf   : > { %v5272_v24 = vadd.f32 %v5264_v44, %v10061_v3 }
 0x8c0   : > { %v5291_v42 = vsel %vm1119_vm2, %v5271_v40, -inf }
 0x8c1   : > { %5292 = vmax.xlane.f32.xlu1 %v5291_v42  ;;  %v5294_v48 = vsel %vm1119_vm2, %v5272_v24, -inf }
 0x8c2   : > { %5295 = vmax.xlane.f32.xlu0 %v5294_v48 }
 0x93e   : > { %v5275_v51 = vpop.xlane.xlu1 %5274 }
 0x93f   : > { %v5297_v52 = vsub.f32 %v5265_v58, %v5275_v51 }
 0x941   : > { %v5305_v53 = vmul.f32 1.442695, %v5297_v52 }
 0x942   : > { %v5278_v19 = vpop.xlane.xlu0 %5277 }
 0x943   : > { %9679 = vpow2.f32 %v5305_v53  ;;  %v5298_v59 = vsub.f32 %v5266_v12, %v5278_v19 }
 0x945   : > { %v5307_v41 = vmul.f32 1.442695, %v5298_v59 }
 0x946   : > { %v5281_v46 = vpop.xlane.xlu1 %5280 }
 0x947   : > { %9681 = vpow2.f32 %v5307_v41  ;;  %v5299_v6 = vsub.f32 %v5267_v13, %v5281_v46  ;;  %v5284_v26 = vpop.xlane.xlu0 %5283 }
 0x948   : > { %v5300_v63 = vsub.f32 %v5268_v61, %v5284_v26 }
 0x949   : > { %v5309_v30 = vmul.f32 1.442695, %v5299_v6 }
 0x94a   : > { %v5311_v1 = vmul.f32 1.442695, %v5300_v63  ;;  %v5287_v11 = vpop.xlane.xlu1 %5286 }
 0x94b   : > { %9683 = vpow2.f32 %v5309_v30  ;;  %v5301_v21 = vsub.f32 %v5269_v17, %v5287_v11  ;;  %v5290_v15 = vpop.xlane.xlu0 %5289 }
 0x94c   : > { %9685 = vpow2.f32 %v5311_v1  ;;  %v5302_v62 = vsub.f32 %v5270_v29, %v5290_v15 }
 0x94d   : > { %v9680_v31 = vpop.eup %9679  ;;  %v5313_v58 = vmul.f32 1.442695, %v5301_v21 }
 0x94e   : > { %v5315_v7 = vmul.f32 1.442695, %v5302_v62  ;;  %v5293_v27 = vpop.xlane.xlu1 %5292  ;;  %v5321_v12 = vsel %vm1119_vm2, %v9680_v31, 0.0  ;;  %v8395_v62 = vld [vmem:[%s10906_s5 + $0x60] sm:$0xff] }
 0x94f   : > { %9687 = vpow2.f32 %v5313_v58  ;;  %v5303_v34 = vsub.f32 %v5271_v40, %v5293_v27  ;;  %v5296_v18 = vpop.xlane.xlu0 %5295  ;;  %5322 = vadd.xlane.f32.xlu1 %v5321_v12 }
 0x950   : > { %9689 = vpow2.f32 %v5315_v7  ;;  %v5304_v13 = vsub.f32 %v5272_v24, %v5296_v18 }
 0x951   : > { %v9682_v61 = vpop.eup %9681  ;;  %v5317_v35 = vmul.f32 1.442695, %v5303_v34  ;;  %v8398_v34 = vld [vmem:[%s10906_s5 + $0x78] sm:$0xff] }
 0x952   : > { %v5319_v32 = vmul.f32 1.442695, %v5304_v13  ;;  %v5324_v17 = vsel %vm1119_vm2, %v9682_v61, 0.0 }
 0x953   : > { %9691 = vpow2.f32 %v5317_v35  ;;  %5325 = vadd.xlane.f32.xlu0 %v5324_v17  ;;  %v8421_v17 = vld [vmem:[%s10908_s7 + $0x70] sm:$0xff] }
 0x954   : > { %9693 = vpow2.f32 %v5319_v32  ;;  %v8420_v32 = vld [vmem:[%s10908_s7 + $0x68] sm:$0xff] }
 0x955   : > { %v9684_v29 = vpop.eup %9683 }
 0x956   : > { %v9686_v37 = vpop.eup %9685  ;;  %v5327_v33 = vsel %vm1119_vm2, %v9684_v29, 0.0 }
 0x957   : > { %5328 = vadd.xlane.f32.xlu1 %v5327_v33  ;;  %v5330_v10 = vsel %vm1119_vm2, %v9686_v37, 0.0  ;;  %v8386_v33 = vld [vmem:[%s10909_s8 + $0x10] sm:$0xff] }
 0x958   : > { %5331 = vadd.xlane.f32.xlu0 %v5330_v10  ;;  %v8407_v10 = vld [vmem:[%s10907_s6 + $0x60] sm:$0xff] }
 0x959   : > { %v9688_v39 = vpop.eup %9687 }
 0x95a   : > { %v9690_v44 = vpop.eup %9689  ;;  %v5333_v25 = vsel %vm1119_vm2, %v9688_v39, 0.0 }
 0x95b   : > { %5334 = vadd.xlane.f32.xlu1 %v5333_v25  ;;  %v5336_v9 = vsel %vm1119_vm2, %v9690_v44, 0.0 }
 0x95c   : > { %5337 = vadd.xlane.f32.xlu0 %v5336_v9  ;;  %v8409_v9 = vld [vmem:[%s10907_s6 + $0x70] sm:$0xff] }
 0x95d   : > { %v9692_v40 = vpop.eup %9691 }
 0x95e   : > { %v10525_v24 = vpop.eup %9693  ;;  %v5339_v42 = vsel %vm1119_vm2, %v9692_v40, 0.0 }
 0x95f   : > { %5340 = vadd.xlane.f32.xlu1 %v5339_v42  ;;  %v5342_v48 = vsel %vm1119_vm2, %v10525_v24, 0.0 }
 0x960   : > { %5343 = vadd.xlane.f32.xlu0 %v5342_v48 }
 0x9dc   : > { %v5323_v51 = vpop.xlane.xlu1 %5322 }
 0x9dd   : > { %9695 = vrcp.f32 %v5323_v51 }
 0x9e0   : > { %v5326_v52 = vpop.xlane.xlu0 %5325 }
 0x9e1   : > { %9697 = vrcp.f32 %v5326_v52 }
 0x9e4   : > { %v5329_v53 = vpop.xlane.xlu1 %5328 }
 0x9e5   : > { %9699 = vrcp.f32 %v5329_v53  ;;  %v5332_v19 = vpop.xlane.xlu0 %5331 }
 0x9e6   : > { %9701 = vrcp.f32 %v5332_v19 }
 0x9e7   : > { %v9696_v59 = vpop.eup %9695 }
 0x9e8   : > { %v5361_v41 = vmul.f32 %v9696_v59, %v9680_v31  ;;  %v5335_v46 = vpop.xlane.xlu1 %5334  ;;  %v8396_v31 = vld [vmem:[%s10906_s5 + $0x68] sm:$0xff] }
 0x9e9   : > { %9703 = vrcp.f32 %v5335_v46  ;;  %v5338_v6 = vpop.xlane.xlu0 %5337  ;;  %v9544_v12 = vpack.c.bf16 %v8396_v31, %v8395_v62 }
 0x9ea   : > { %9705 = vrcp.f32 %v5338_v6  ;;  %9239 = vmatmul.mubr.msk.f32.vlgmr.msra.gmra.mrb[86].mxu1 %vm1119_vm2, %v5361_v41 }
 0x9eb   : > { %v9698_v26 = vpop.eup %9697  ;;  %9247 = vmatpush3.msra.mxu1 %v10493_v28  ;;  %9248 = vmatprep.mubr.msk.f32.mxu1 %vm9752_vm1, %v9751_v57 }
 0x9ec   : > { %v5362_v63 = vmul.f32 %v9698_v26, %v9682_v61  ;;  %v5341_v30 = vpop.xlane.xlu1 %5340  ;;  %9256 = vmatprep.subr.mxu1 %v9751_v57 }
 0x9ed   : > { %9707 = vrcp.f32 %v5341_v30  ;;  %v5344_v1 = vpop.xlane.xlu0 %5343 }
 0x9ee   : > { %9709 = vrcp.f32 %v5344_v1  ;;  %9244 = vmatmul.mubr.msk.f32.vlgmr.msra.gmra.mrb[82].mxu0 %vm1119_vm2, %v5362_v63 }
 0x9ef   : > { %v9700_v11 = vpop.eup %9699  ;;  %9252 = vmatpush3.msra.mxu0 %v10491_v8  ;;  %9253 = vmatprep.mubr.msk.f32.mxu0 %vm9752_vm1, %v9751_v57 }
 0x9f0   : > { %v9702_v21 = vpop.eup %9701  ;;  %v5363_v28 = vmul.f32 %v9700_v11, %v9684_v29  ;;  %9261 = vmatprep.subr.mxu0 %v9751_v57  ;;  %v8422_v29 = vld [vmem:[%s10908_s7 + $0x78] sm:$0xff] }
 0x9f1   : > { %v5364_v15 = vmul.f32 %v9702_v21, %v9686_v37  ;;  %v9564_v37 = vpack.c.bf16 %v8422_v29, %v8421_v17 }
 0x9f2   : > { %9249 = vmatmul.mubr.msk.f32.vlgmr.msra.gmra.mrb[88].mxu1 %vm1119_vm2, %v5363_v28 }
 0x9f3   : > { %v9704_v58 = vpop.eup %9703  ;;  %9257 = vmatpush3.msra.mxu1 %v10497_v54  ;;  %9254 = vmatmul.mubr.msk.f32.vlgmr.msra.gmra.mrb[84].mxu0 %vm1119_vm2, %v5364_v15  ;;  %v8397_v54 = vld [vmem:[%s10906_s5 + $0x70] sm:$0xff] }
 0x9f4   : > { %v9706_v8 = vpop.eup %9705  ;;  %v5365_v7 = vmul.f32 %v9704_v58, %v9688_v39  ;;  %9262 = vmatpush3.msra.mxu0 %v10495_v22  ;;  %9258 = vmatprep.mubr.msk.f32.mxu1 %vm9752_vm1, %v9751_v57  ;;  %v9548_v61 = vpack.c.bf16 %v8398_v34, %v8397_v54  ;;  %v8408_v39 = vld [vmem:[%s10907_s6 + $0x68] sm:$0xff] }
 0x9f5   : > { %v5366_v27 = vmul.f32 %v9706_v8, %v9690_v44  ;;  %9266 = vmatprep.subr.mxu1 %v9751_v57  ;;  %9263 = vmatprep.mubr.msk.f32.mxu0 %vm9752_vm1, %v9751_v57  ;;  %v9552_v44 = vpack.c.bf16 %v8408_v39, %v8407_v10 }
 0x9f6   : > { %9259 = vmatmul.mubr.msk.f32.vlgmr.msra.gmra.mrb[90].mxu1 %vm1119_vm2, %v5365_v7  ;;  %9271 = vmatprep.subr.mxu0 %v9751_v57 }
 0x9f7   : > { %v9708_v22 = vpop.eup %9707  ;;  %9267 = vmatpush3.msra.mxu1 %v10503_v4  ;;  %9264 = vmatmul.mubr.msk.f32.vlgmr.msra.gmra.mrb[86].mxu0 %vm1119_vm2, %v5366_v27  ;;  %v8419_v4 = vld [vmem:[%s10908_s7 + $0x60] sm:$0xff] }
 0x9f8   : > { %v9710_v18 = vpop.eup %9709  ;;  %v5367_v13 = vmul.f32 %v9708_v22, %v9692_v40  ;;  %9272 = vmatpush3.msra.mxu0 %v10500_v23  ;;  %9268 = vmatprep.mubr.msk.f32.mxu1 %vm9752_vm1, %v9751_v57  ;;  %v9560_v23 = vpack.c.bf16 %v8420_v32, %v8419_v4  ;;  %v8410_v40 = vld [vmem:[%s10907_s6 + $0x78] sm:$0xff] }
 0x9f9   : > { %v5368_v35 = vmul.f32 %v9710_v18, %v10525_v24  ;;  %9545 = vmatprep.subr.bf16.mxu1 %v9544_v12  ;;  %9273 = vmatprep.mubr.msk.f32.mxu0 %vm9752_vm1, %v9751_v57  ;;  %v9556_v42 = vpack.c.bf16 %v8410_v40, %v8409_v9 }
 0x9fa   : > { %9269 = vmatmul.mubr.msk.f32.vlgmr.msra.gmra.mrb[92].mxu1 %vm1119_vm2, %v5367_v13  ;;  %9276 = vmatprep.subr.mxu0 %v8386_v33 }
 0x9fb   : > { %9547 = vmatpush3.bf16.msra.mxu1 %v9544_v12  ;;  %9274 = vmatmul.mubr.msk.f32.vlgmr.msra.gmra.mrb[88].mxu0 %vm1119_vm2, %v5368_v35 }
 0x9fc   : > { %9298 = vmatprep.mubr.msk.f32.mxu1 %vm475_vm0, %v9896_v36  ;;  %9549 = vmatprep.subr.bf16.mxu1 %v9548_v61 }
 0x9fd   : > { %9277 = vmatpush3.msra.mxu0 %v8386_v33 }
 0x9fe   : > { %9553 = vmatprep.subr.bf16.mxu0 %v9552_v44 }
 0x9ff   : > { %9551 = vmatpush3.bf16.msra.mxu1 %v9548_v61 }
 0xa00   : > { %9561 = vmatprep.subr.bf16.mxu1 %v9560_v23 }
 0xa02   : > { %9299 = vmatmul.mubr.msk.f32.vlgmr.msra.gmra.mrb[94].mxu1 %vm475_vm0, %v9898_v38 }
 0xa03   : > { %9301 = vmatprep.mubr.msk.f32.mxu1 %vm475_vm0, %v9908_v43  ;;  %9563 = vmatpush3.bf16.msra.mxu1 %v9560_v23 }
 0xa04   : > { %9565 = vmatprep.subr.bf16.mxu1 %v9564_v37 }
 0xa06   : > { %9302 = vmatmul.mubr.msk.f32.gmra.mrb[96].mxu1 %vm475_vm0, %v9910_v45 }
 0xa07   : > { %9304 = vmatprep.mubr.msk.f32.mxu1 %vm475_vm0, %v9922_v50  ;;  %9567 = vmatpush3.bf16.msra.mxu1 %v9564_v37 }
 0xa08   : > { %9355 = vmatprep.subr.mxu1 %v9751_v57 }
 0xa0a   : > { %9305 = vmatmul.mubr.msk.f32.gmra.mrb[98].mxu1 %vm475_vm0, %v9916_v49 }
 0xa0b   : > { %9307 = vmatprep.mubr.msk.f32.mxu1 %vm475_vm0, %v9934_v56 }
 0xa0e   : > { %9308 = vmatmul.mubr.msk.f32.gmra.mrb[100].mxu1 %vm475_vm0, %v9928_v55 }
 0xa0f   : > { %9338 = vmatprep.mubr.msk.f32.mxu1 %vm475_vm0, %v9896_v36 }
 0xa12   : > { %9339 = vmatmul.mubr.msk.f32.vlgmr.msra.gmra.mrb[102].mxu1 %vm475_vm0, %v9898_v38 }
 0xa13   : > { %9341 = vmatprep.mubr.msk.f32.mxu1 %vm475_vm0, %v9908_v43 }
 0xa16   : > { %9342 = vmatmul.mubr.msk.f32.gmra.mrb[104].mxu1 %vm475_vm0, %v9910_v45 }
 0xa17   : > { %9344 = vmatprep.mubr.msk.f32.mxu1 %vm475_vm0, %v9922_v50 }
 0xa1a   : > { %9345 = vmatmul.mubr.msk.f32.gmra.mrb[106].mxu1 %vm475_vm0, %v9916_v49 }
 0xa1b   : > { %9347 = vmatprep.mubr.msk.f32.mxu1 %vm475_vm0, %v9934_v56 }
 0xa1e   : > { %9348 = vmatmul.mubr.msk.f32.gmra.mrb[108].mxu1 %vm475_vm0, %v9928_v55 }
 0xa1f   : > { %9357 = vmatprep.mubr.msk.f32.mxu1 %vm9752_vm1, %v9751_v57 }
 0xabd   : > { %v5438_v25 = vpop.f32.mrb[86].mxu1 }
 0xabe   : > { %v9240_v24 = vpop.f32.mrb[87].mxu1  ;;  %9278 = vmatprep.mubr.msk.f32.mxu0 %vm1119_vm2, %v5438_v25 }
 0xac1   : > { %v5511_v48 = vpop.f32.mrb[82].mxu0 }
 0xac2   : > { %v9245_v51 = vpop.f32.mrb[83].mxu0  ;;  %9279 = vmatmul.mubr.msk.f32.vlgmr.msra.gmra.mrb[60].mxu0 %vm1119_vm2, %v5511_v48 }
 0xac3   : > { %9555 = vmatpush3.bf16.msra.mxu0 %v9552_v44 }
 0xac4   : > { %9557 = vmatprep.subr.bf16.mxu0 %v9556_v42 }
 0xac5   : > { %v5584_v52 = vpop.f32.mrb[88].mxu1 }
 0xac6   : > { %v9250_v53 = vpop.f32.mrb[89].mxu1  ;;  %v5657_v19 = vpop.f32.mrb[84].mxu0  ;;  %9281 = vmatprep.mubr.msk.f32.mxu0 %vm1119_vm2, %v5584_v52 }
 0xac7   : > { %v9255_v59 = vpop.f32.mrb[85].mxu0  ;;  %9282 = vmatmul.mubr.msk.f32.gmra.mrb[62].mxu0 %vm1119_vm2, %v5657_v19 }
 0xac8   : > { %9559 = vmatpush3.bf16.msra.mxu0 %v9556_v42 }
 0xac9   : > { %v5730_v41 = vpop.f32.mrb[90].mxu1  ;;  %9350 = vmatprep.subr.mxu0 %v9751_v57 }
 0xaca   : > { %v9260_v46 = vpop.f32.mrb[91].mxu1  ;;  %v5803_v6 = vpop.f32.mrb[86].mxu0  ;;  %9284 = vmatprep.mubr.msk.f32.mxu0 %vm1119_vm2, %v5730_v41 }
 0xacb   : > { %v9265_v26 = vpop.f32.mrb[87].mxu0  ;;  %9285 = vmatmul.mubr.msk.f32.gmra.mrb[64].mxu0 %vm1119_vm2, %v5803_v6 }
 0xacd   : > { %v5876_v63 = vpop.f32.mrb[92].mxu1 }
 0xace   : > { %v9270_v30 = vpop.f32.mrb[93].mxu1  ;;  %v5949_v1 = vpop.f32.mrb[88].mxu0  ;;  %9287 = vmatprep.mubr.msk.f32.mxu0 %vm1119_vm2, %v5876_v63 }
 0xacf   : > { %v9275_v11 = vpop.f32.mrb[89].mxu0  ;;  %9288 = vmatmul.mubr.msk.f32.gmra.mrb[66].mxu0 %vm1119_vm2, %v5949_v1 }
 0xad0   : > { %9318 = vmatprep.mubr.msk.f32.mxu0 %vm475_vm0, %v9896_v36 }
 0xad3   : > { %9319 = vmatmul.mubr.msk.f32.vlgmr.msra.gmra.mrb[90].mxu0 %vm475_vm0, %v9898_v38 }
 0xad4   : > { %9321 = vmatprep.mubr.msk.f32.mxu0 %vm475_vm0, %v9908_v43 }
 0xad5   : > { %v9300_v21 = vpop.f32.mrb[94].mxu1 }
 0xad6   : > { %v6163_v28 = vpop.f32.mrb[95].mxu1 }
 0xad7   : > { %9322 = vmatmul.mubr.msk.f32.gmra.mrb[92].mxu0 %vm475_vm0, %v9910_v45 }
 0xad8   : > { %9324 = vmatprep.mubr.msk.f32.mxu0 %vm475_vm0, %v9922_v50 }
 0xad9   : > { %v9303_v15 = vpop.f32.mrb[96].mxu1 }
 0xada   : > { %v6173_v62 = vpop.f32.mrb[97].mxu1 }
 0xadb   : > { %9325 = vmatmul.mubr.msk.f32.gmra.mrb[94].mxu0 %vm475_vm0, %v9916_v49 }
 0xadc   : > { %9327 = vmatprep.mubr.msk.f32.mxu0 %vm475_vm0, %v9934_v56 }
 0xadd   : > { %v9306_v36 = vpop.f32.mrb[98].mxu1 }
 0xade   : > { %v6183_v38 = vpop.f32.mrb[99].mxu1 }
 0xadf   : > { %9328 = vmatmul.mubr.msk.f32.gmra.mrb[96].mxu0 %vm475_vm0, %v9928_v55 }
 0xae0   : > { %9352 = vmatprep.mubr.msk.f32.mxu0 %vm9752_vm1, %v9751_v57 }
 0xae1   : > { %v9309_v43 = vpop.f32.mrb[100].mxu1 }
 0xae2   : > { %v6193_v45 = vpop.f32.mrb[101].mxu1 }
 0xae5   : > { %v9340_v31 = vpop.f32.mrb[102].mxu1 }
 0xae6   : > { %v6383_v50 = vpop.f32.mrb[103].mxu1 }
 0xae9   : > { %v10662_v58 = vpop.f32.mrb[104].mxu1 }
 0xaea   : > { %v10664_v8 = vpop.f32.mrb[105].mxu1 }
 0xaed   : > { %v10666_v49 = vpop.f32.mrb[106].mxu1 }
 0xaee   : > { %v10668_v7 = vpop.f32.mrb[107].mxu1 }
 0xaf1   : > { %v10670_v56 = vpop.f32.mrb[108].mxu1 }
 0xaf2   : > { %v10672_v27 = vpop.f32.mrb[109].mxu1 }
 0xba6   : > { %v9320_v55 = vpop.f32.mrb[90].mxu0 }
 0xba7   : > { %v6273_v12 = vpop.f32.mrb[91].mxu0  ;;  %9356 = vmatpush3.xpose.msk.msra.mxu1 %vm1119_vm2, %v9320_v55 }
 0xba8   : > { %9351 = vmatpush3.xpose.msk.msra.mxu0 %vm1119_vm2, %v6273_v12  ;;  %9365 = vmatprep.subr.mxu1 %v9751_v57 }
 0xba9   : > { %9360 = vmatprep.subr.mxu0 %v9751_v57 }
 0xbaa   : > { %v9323_v54 = vpop.f32.mrb[92].mxu0  ;;  %9358 = vmatmul.mubr.msk.f32.vlgmr.msra.gmra.mrb[110].mxu1 %vm1119_vm2, %v9300_v21 }
 0xbab   : > { %v6283_v34 = vpop.f32.mrb[93].mxu0  ;;  %9353 = vmatmul.mubr.msk.f32.vlgmr.msra.gmra.mrb[98].mxu0 %vm1119_vm2, %v6163_v28  ;;  %9366 = vmatpush3.xpose.msk.msra.mxu1 %vm1119_vm2, %v9323_v54 }
 0xbac   : > { %9361 = vmatpush3.xpose.msk.msra.mxu0 %vm1119_vm2, %v6283_v34  ;;  %9367 = vmatprep.mubr.msk.f32.mxu1 %vm9752_vm1, %v9751_v57 }
 0xbad   : > { %9362 = vmatprep.mubr.msk.f32.mxu0 %vm9752_vm1, %v9751_v57  ;;  %9375 = vmatprep.subr.mxu1 %v9751_v57 }
 0xbae   : > { %v9326_v22 = vpop.f32.mrb[94].mxu0  ;;  %9368 = vmatmul.mubr.msk.f32.vlgmr.msra.gmra.mrb[112].mxu1 %vm1119_vm2, %v9303_v15  ;;  %9370 = vmatprep.subr.mxu0 %v9751_v57 }
 0xbaf   : > { %v6293_v18 = vpop.f32.mrb[95].mxu0  ;;  %9363 = vmatmul.mubr.msk.f32.vlgmr.msra.gmra.mrb[100].mxu0 %vm1119_vm2, %v6173_v62  ;;  %9376 = vmatpush3.xpose.msk.msra.mxu1 %vm1119_vm2, %v9326_v22 }
 0xbb0   : > { %9371 = vmatpush3.xpose.msk.msra.mxu0 %vm1119_vm2, %v6293_v18  ;;  %9377 = vmatprep.mubr.msk.f32.mxu1 %vm9752_vm1, %v9751_v57 }
 0xbb1   : > { %9372 = vmatprep.mubr.msk.f32.mxu0 %vm9752_vm1, %v9751_v57  ;;  %9385 = vmatprep.subr.mxu1 %v9751_v57 }
 0xbb2   : > { %v9329_v13 = vpop.f32.mrb[96].mxu0  ;;  %9378 = vmatmul.mubr.msk.f32.vlgmr.msra.gmra.mrb[114].mxu1 %vm1119_vm2, %v9306_v36  ;;  %9380 = vmatprep.subr.mxu0 %v9751_v57 }
 0xbb3   : > { %v6303_v61 = vpop.f32.mrb[97].mxu0  ;;  %9373 = vmatmul.mubr.msk.f32.vlgmr.msra.gmra.mrb[102].mxu0 %vm1119_vm2, %v6183_v38  ;;  %9386 = vmatpush3.xpose.msk.msra.mxu1 %vm1119_vm2, %v9329_v13 }
 0xbb4   : > { %9381 = vmatpush3.xpose.msk.msra.mxu0 %vm1119_vm2, %v6303_v61  ;;  %9387 = vmatprep.mubr.msk.f32.mxu1 %vm9752_vm1, %v9751_v57 }
 0xbb5   : > { %9382 = vmatprep.mubr.msk.f32.mxu0 %vm9752_vm1, %v9751_v57  ;;  %9395 = vmatprep.subr.mxu1 %v9751_v57 }
 0xbb6   : > { %9388 = vmatmul.mubr.msk.f32.vlgmr.msra.gmra.mrb[116].mxu1 %vm1119_vm2, %v9309_v43  ;;  %9390 = vmatprep.subr.mxu0 %v9751_v57 }
 0xbb7   : > { %9383 = vmatmul.mubr.msk.f32.vlgmr.msra.gmra.mrb[104].mxu0 %vm1119_vm2, %v6193_v45  ;;  %9396 = vmatpush3.msra.mxu1 %v9340_v31 }
 0xbb8   : > { %9391 = vmatpush3.msra.mxu0 %v6383_v50  ;;  %9397 = vmatprep.mubr.msk.f32.mxu1 %vm9752_vm1, %v9751_v57 }
 0xbb9   : > { %9405 = vmatprep.subr.mxu1 %v9751_v57  ;;  %9392 = vmatprep.mubr.msk.f32.mxu0 %vm9752_vm1, %v9751_v57 }
 0xbba   : > { %9400 = vmatprep.subr.mxu0 %v9751_v57 }
 0xc7d   : > { %v6570_v35 = vpop.f32.mrb[110].mxu1 }
 0xc7e   : > { %v7031_v4 = vmul.f32 0.35355338, %v6570_v35  ;;  %v6494_v32 = vpop.f32.mrb[98].mxu0  ;;  %v9359_v23 = vpop.f32.mrb[111].mxu1 }
 0xc7f   : > { %v7030_v17 = vmul.f32 0.35355338, %v6494_v32  ;;  %v9354_v29 = vpop.f32.mrb[99].mxu0 }
 0xc80   : > { %v7039_v37 = vadd.f32 %v7031_v4, %v10041_v2 }
 0xc81   : > { %v6722_v33 = vpop.f32.mrb[112].mxu1  ;;  %v7038_v10 = vadd.f32 %v7030_v17, %v10043_v5 }
 0xc82   : > { %v7033_v39 = vmul.f32 0.35355338, %v6722_v33  ;;  %v6646_v44 = vpop.f32.mrb[100].mxu0  ;;  %v9369_v25 = vpop.f32.mrb[113].mxu1  ;;  %v7049_v9 = vsel %vm1119_vm2, %v7039_v37, -inf }
 0xc83   : > { %v7032_v40 = vmul.f32 0.35355338, %v6646_v44  ;;  %v9364_v24 = vpop.f32.mrb[101].mxu0  ;;  %7050 = vmax.xlane.f32.xlu0 %v7049_v9  ;;  %v7046_v42 = vsel %vm1119_vm2, %v7038_v10, -inf }
 0xc84   : > { %7047 = vmax.xlane.f32.xlu1 %v7046_v42  ;;  %v7041_v48 = vadd.f32 %v7033_v39, %v10045_v16 }
 0xc85   : > { %v6874_v51 = vpop.f32.mrb[114].mxu1  ;;  %v7040_v52 = vadd.f32 %v7032_v40, %v10048_v20 }
 0xc86   : > { %v7035_v2 = vmul.f32 0.35355338, %v6874_v51  ;;  %v6798_v53 = vpop.f32.mrb[102].mxu0  ;;  %v9379_v19 = vpop.f32.mrb[115].mxu1  ;;  %v7055_v5 = vsel %vm1119_vm2, %v7041_v48, -inf }
 0xc87   : > { %v7034_v59 = vmul.f32 0.35355338, %v6798_v53  ;;  %v9374_v41 = vpop.f32.mrb[103].mxu0  ;;  %7056 = vmax.xlane.f32.xlu0 %v7055_v5  ;;  %v7052_v46 = vsel %vm1119_vm2, %v7040_v52, -inf }
 0xc88   : > { %7053 = vmax.xlane.f32.xlu1 %v7052_v46  ;;  %v7043_v6 = vadd.f32 %v7035_v2, %v10054_v47  ;;  %v7865_v41 = vld [vmem:[%s9970_s15] sm:$0xff]  ;;  %v7867_v46 = vld [vmem:[%s9970_s15 + $0x10] sm:$0xff] }
 0xc89   : > { %v7026_v26 = vpop.f32.mrb[116].mxu1  ;;  %v7042_v63 = vadd.f32 %v7034_v59, %v10058_v0  ;;  %vm7873_vm3 = vcmp.lt.f32.partialorder %v7865_v41, 0.5  ;;  %vm7875_vm4 = vcmp.lt.f32.partialorder %v7867_v46, 0.5  ;;  %v8464_v46 = vld [vmem:[%s10910_s9] ss:$0 sm:$0xff] }
 0xc8a   : > { %v7037_v16 = vmul.f32 0.35355338, %v7026_v26  ;;  %v6950_v30 = vpop.f32.mrb[104].mxu0  ;;  %v9389_v1 = vpop.f32.mrb[117].mxu1  ;;  %v7061_v20 = vsel %vm1119_vm2, %v7043_v6, -inf  ;;  %v7896_v26 = vsel %vm7873_vm3, 1, %v9753_v60 }
 0xc8b   : > { %v7036_v11 = vmul.f32 0.35355338, %v6950_v30  ;;  %v9384_v21 = vpop.f32.mrb[105].mxu0  ;;  %7062 = vmax.xlane.f32.xlu0 %v7061_v20  ;;  %v7058_v28 = vsel %vm1119_vm2, %v7042_v63, -inf  ;;  %v7898_v30 = vsel %vm7875_vm4, 1, %v9753_v60  ;;  %v7870_v20 = vld [vmem:[%s9970_s15 + $0x28] sm:$0xff] }
 0xc8c   : > { %7059 = vmax.xlane.f32.xlu1 %v7058_v28  ;;  %v7045_v15 = vadd.f32 %v7037_v16, %v10061_v3  ;;  %v7869_v16 = vld [vmem:[%s9970_s15 + $0x20] sm:$0xff]  ;;  %vm7878_vm8 = vcmp.lt.f32.partialorder %v7870_v20, 0.5 }
 0xc8d   : > { %v7044_v62 = vadd.f32 %v7036_v11, %v10066_v14  ;;  %vm7877_vm7 = vcmp.lt.f32.partialorder %v7869_v16, 0.5  ;;  %v7871_v11 = vld [vmem:[%s9970_s15 + $0x30] sm:$0xff] }
 0xc8e   : > { %v7067_v47 = vsel %vm1119_vm2, %v7045_v15, -inf  ;;  %v7900_v28 = vsel %vm7877_vm7, 1, %v9753_v60  ;;  %vm7879_vm9 = vcmp.lt.f32.partialorder %v7871_v11, 0.5 }
 0xc8f   : > { %7068 = vmax.xlane.f32.xlu0 %v7067_v47  ;;  %v7064_v0 = vsel %vm1119_vm2, %v7044_v62, -inf  ;;  %v7902_v47 = vsel %vm7879_vm9, 1, %v9753_v60 }
 0xc90   : > { %7065 = vmax.xlane.f32.xlu1 %v7064_v0 }
 0xd10   : > { %v7051_v36 = vpop.xlane.xlu0 %7050 }
 0xd11   : > { %v7071_v38 = vsub.f32 %v7039_v37, %v7051_v36  ;;  %v7048_v43 = vpop.xlane.xlu1 %7047 }
 0xd12   : > { %v7070_v45 = vsub.f32 %v7038_v10, %v7048_v43 }
 0xd13   : > { %v7080_v31 = vmul.f32 1.442695, %v7071_v38 }
 0xd14   : > { %v7078_v50 = vmul.f32 1.442695, %v7070_v45  ;;  %v7057_v55 = vpop.xlane.xlu0 %7056 }
 0xd15   : > { %9711 = vpow2.f32 %v7080_v31  ;;  %v7073_v12 = vsub.f32 %v7041_v48, %v7057_v55  ;;  %v7054_v54 = vpop.xlane.xlu1 %7053 }
 0xd16   : > { %9713 = vpow2.f32 %v7078_v50  ;;  %v7072_v3 = vsub.f32 %v7040_v52, %v7054_v54 }
 0xd17   : > { %v7084_v34 = vmul.f32 1.442695, %v7073_v12 }
 0xd18   : > { %v7082_v14 = vmul.f32 1.442695, %v7072_v3  ;;  %v7063_v22 = vpop.xlane.xlu0 %7062 }
 0xd19   : > { %9715 = vpow2.f32 %v7084_v34  ;;  %v7075_v18 = vsub.f32 %v7043_v6, %v7063_v22  ;;  %v7060_v13 = vpop.xlane.xlu1 %7059  ;;  %v7866_v6 = vld [vmem:[%s9970_s15 + $0x8] sm:$0xff] }
 0xd1a   : > { %9717 = vpow2.f32 %v7082_v14  ;;  %v7074_v61 = vsub.f32 %v7042_v63, %v7060_v13  ;;  %vm7874_vm5 = vcmp.lt.f32.partialorder %v7866_v6, 0.5  ;;  %v7868_v63 = vld [vmem:[%s9970_s15 + $0x18] sm:$0xff] }
 0xd1b   : > { %v7088_v35 = vmul.f32 1.442695, %v7075_v18  ;;  %v7897_v1 = vsel %vm7874_vm5, 1, %v9753_v60  ;;  %vm7876_vm6 = vcmp.lt.f32.partialorder %v7868_v63, 0.5 }
 0xd1c   : > { %v7086_v4 = vmul.f32 1.442695, %v7074_v61  ;;  %v7069_v32 = vpop.xlane.xlu0 %7068  ;;  %v7899_v21 = vsel %vm7876_vm6, 1, %v9753_v60 }
 0xd1d   : > { %9719 = vpow2.f32 %v7088_v35  ;;  %v7077_v23 = vsub.f32 %v7045_v15, %v7069_v32  ;;  %v7066_v17 = vpop.xlane.xlu1 %7065  ;;  %v7872_v15 = vld [vmem:[%s9970_s15 + $0x38] sm:$0xff]  ;;  %s10871_s15 = scalar_lea.vmem %s10913_s12, %s9855_s24 }
 0xd1e   : > { %9721 = vpow2.f32 %v7086_v4  ;;  %v7076_v29 = vsub.f32 %v7044_v62, %v7066_v17  ;;  %v7901_v62 = vsel %vm7878_vm8, 1, %v9753_v60  ;;  %vm7880_vm10 = vcmp.lt.f32.partialorder %v7872_v15, 0.5 }
 0xd1f   : > { %v10732_v37 = vpop.eup %9711  ;;  %v7092_v33 = vmul.f32 1.442695, %v7077_v23  ;;  %v7903_v0 = vsel %vm7880_vm10, 1, %v9753_v60  ;;  %v7945_v23 = vld [vmem:[%s10911_s10 + $0x8] sm:$0xff] }
 0xd20   : > { %v10734_v10 = vpop.eup %9713  ;;  %v7090_v39 = vmul.f32 1.442695, %v7076_v29  ;;  %v7097_v44 = vsel %vm1119_vm2, %v10732_v37, 0.0 }
 0xd21   : > { %9723 = vpow2.f32 %v7092_v33  ;;  %7098 = vadd.xlane.f32.xlu0 %v7097_v44  ;;  %v7094_v25 = vsel %vm1119_vm2, %v10734_v10, 0.0 }
 0xd22   : > { %9725 = vpow2.f32 %v7090_v39  ;;  %7095 = vadd.xlane.f32.xlu1 %v7094_v25 }
 0xd23   : > { %v10740_v9 = vpop.eup %9715 }
 0xd24   : > { %v10742_v40 = vpop.eup %9717  ;;  %v7103_v24 = vsel %vm1119_vm2, %v10740_v9, 0.0 }
 0xd25   : > { %7104 = vadd.xlane.f32.xlu0 %v7103_v24  ;;  %v7100_v42 = vsel %vm1119_vm2, %v10742_v40, 0.0 }
 0xd26   : > { %7101 = vadd.xlane.f32.xlu1 %v7100_v42 }
 0xd27   : > { %v10748_v48 = vpop.eup %9719 }
 0xd28   : > { %v10750_v51 = vpop.eup %9721  ;;  %v7109_v52 = vsel %vm1119_vm2, %v10748_v48, 0.0 }
 0xd29   : > { %7110 = vadd.xlane.f32.xlu0 %v7109_v52  ;;  %v7106_v2 = vsel %vm1119_vm2, %v10750_v51, 0.0 }
 0xd2a   : > { %7107 = vadd.xlane.f32.xlu1 %v7106_v2 }
 0xd2b   : > { %v10756_v53 = vpop.eup %9723 }
 0xd2c   : > { %v10758_v19 = vpop.eup %9725  ;;  %v7115_v5 = vsel %vm1119_vm2, %v10756_v53, 0.0 }
 0xd2d   : > { %7116 = vadd.xlane.f32.xlu0 %v7115_v5  ;;  %v7112_v59 = vsel %vm1119_vm2, %v10758_v19, 0.0 }
 0xd2e   : > { %7113 = vadd.xlane.f32.xlu1 %v7112_v59 }
 0xd3f   : > { %7905 = vperm.xlu1 %9613, %v7896_v26  }
 0xd43   : > { %7911 = vperm.xlu1 %9613, %v7898_v30   ;;  %7908 = vperm.xlu0 %9612, %v7897_v1  }
 0xd47   : > { %7914 = vperm.xlu1 %9613, %v7899_v21   ;;  %7917 = vperm.xlu0 %9612, %v7900_v28  }
 0xd4b   : > { %7920 = vperm.xlu1 %9613, %v7901_v62   ;;  %7923 = vperm.xlu0 %9612, %v7902_v47  }
 0xd4f   : > { %7926 = vperm.xlu1 %9613, %v7903_v0  }
 0xdae   : > { %v7099_v36 = vpop.xlane.xlu0 %7098 }
 0xdaf   : > { %9727 = vrcp.f32 %v7099_v36  ;;  %v7096_v38 = vpop.xlane.xlu1 %7095 }
 0xdb0   : > { %9729 = vrcp.f32 %v7096_v38 }
 0xdb2   : > { %v7105_v43 = vpop.xlane.xlu0 %7104 }
 0xdb3   : > { %9731 = vrcp.f32 %v7105_v43  ;;  %v7102_v45 = vpop.xlane.xlu1 %7101 }
 0xdb4   : > { %9733 = vrcp.f32 %v7102_v45 }
 0xdb6   : > { %v7111_v31 = vpop.xlane.xlu0 %7110 }
 0xdb7   : > { %9735 = vrcp.f32 %v7111_v31  ;;  %v7108_v50 = vpop.xlane.xlu1 %7107 }
 0xdb8   : > { %9737 = vrcp.f32 %v7108_v50 }
 0xdb9   : > { %v9728_v55 = vpop.eup %9727 }
 0xdba   : > { %v9730_v12 = vpop.eup %9729  ;;  %v7135_v54 = vmul.f32 %v9728_v55, %v10732_v37  ;;  %v7117_v3 = vpop.xlane.xlu0 %7116 }
 0xdbb   : > { %v7134_v60 = vmul.f32 %v9730_v12, %v10734_v10  ;;  %9739 = vrcp.f32 %v7117_v3  ;;  %v7114_v34 = vpop.xlane.xlu1 %7113 }
 0xdbc   : > { %9741 = vrcp.f32 %v7114_v34  ;;  %9398 = vmatmul.mubr.msk.f32.vlgmr.msra.gmra.mrb[118].mxu1 %vm1119_vm2, %v7135_v54 }
 0xdbd   : > { %v9732_v14 = vpop.eup %9731  ;;  %9406 = vmatpush3.msra.mxu1 %v10662_v58  ;;  %9393 = vmatmul.mubr.msk.f32.vlgmr.msra.gmra.mrb[106].mxu0 %vm1119_vm2, %v7134_v60 }
 0xdbe   : > { %v9734_v22 = vpop.eup %9733  ;;  %v7137_v18 = vmul.f32 %v9732_v14, %v10740_v9  ;;  %9401 = vmatpush3.msra.mxu0 %v10664_v8  ;;  %9407 = vmatprep.mubr.msk.f32.mxu1 %vm9752_vm1, %v9751_v57 }
 0xdbf   : > { %v7136_v13 = vmul.f32 %v9734_v22, %v10742_v40  ;;  %9415 = vmatprep.subr.mxu1 %v9751_v57  ;;  %9402 = vmatprep.mubr.msk.f32.mxu0 %vm9752_vm1, %v9751_v57  ;;  %v7906_v59 = vpop.permute.xlu1 %7905 }
 0xdc0   : > { %9408 = vmatmul.mubr.msk.f32.vlgmr.msra.gmra.mrb[120].mxu1 %vm1119_vm2, %v7137_v18  ;;  %9410 = vmatprep.subr.mxu0 %v9751_v57  ;;  %vm7928_vm11 = vcmp.eq.s32.totalorder %v7906_v59, 1 }
 0xdc1   : > { %v9736_v58 = vpop.eup %9735  ;;  %9416 = vmatpush3.msra.mxu1 %v10666_v49  ;;  %9403 = vmatmul.mubr.msk.f32.vlgmr.msra.gmra.mrb[108].mxu0 %vm1119_vm2, %v7136_v13 }
 0xdc2   : > { %v9738_v8 = vpop.eup %9737  ;;  %v7139_v61 = vmul.f32 %v9736_v58, %v10748_v48  ;;  %9411 = vmatpush3.msra.mxu0 %v10668_v7  ;;  %9417 = vmatprep.mubr.msk.f32.mxu1 %vm9752_vm1, %v9751_v57  ;;  %v7909_v6 = vpop.permute.xlu0 %7908  ;;  %v8465_v58 = vld [vmem:[%s10912_s11] ss:$0 sm:$0xff] }
 0xdc3   : > { %v7138_v35 = vmul.f32 %v9738_v8, %v10750_v51  ;;  %9425 = vmatprep.subr.mxu1 %v9751_v57  ;;  %9412 = vmatprep.mubr.msk.f32.mxu0 %vm9752_vm1, %v9751_v57  ;;  %v10841_v41 = vpop.permute.xlu1 %7911  ;;  %vm7929_vm12 = vcmp.eq.s32.totalorder %v7909_v6, 1 }
 0xdc4   : > { %9418 = vmatmul.mubr.msk.f32.vlgmr.msra.gmra.mrb[122].mxu1 %vm1119_vm2, %v7139_v61  ;;  %9420 = vmatprep.subr.mxu0 %v9751_v57  ;;  %vm7930_vm13 = vcmp.eq.s32.totalorder %v10841_v41, 1 }
 0xdc5   : > { %v9740_v49 = vpop.eup %9739  ;;  %9426 = vmatpush3.msra.mxu1 %v10670_v56  ;;  %9413 = vmatmul.mubr.msk.f32.vlgmr.msra.gmra.mrb[110].mxu0 %vm1119_vm2, %v7138_v35  ;;  %v8455_v56 = vld [vmem:[%s10909_s8 + $0x18] sm:$0xff] }
 0xdc6   : > { %v9742_v7 = vpop.eup %9741  ;;  %v7141_v4 = vmul.f32 %v9740_v49, %v10756_v53  ;;  %9421 = vmatpush3.msra.mxu0 %v10672_v27  ;;  %9427 = vmatprep.mubr.msk.f32.mxu1 %vm9752_vm1, %v9751_v57  ;;  %v7944_v27 = vld [vmem:[%s10911_s10] sm:$0xff]  ;;  %v7946_v53 = vld [vmem:[%s10911_s10 + $0x10] sm:$0xff]  ;;  %v7918_v62 = vpop.permute.xlu0 %7917 }
 0xdc7   : > { %v7140_v32 = vmul.f32 %v9742_v7, %v10758_v19  ;;  %9422 = vmatprep.mubr.msk.f32.mxu0 %vm9752_vm1, %v9751_v57  ;;  %9430 = vmatprep.subr.mxu0 %v8455_v56  ;;  %v9568_v17 = vpack.c.bf16 %v7945_v23, %v7944_v27  ;;  %v7947_v19 = vld [vmem:[%s10911_s10 + $0x18] sm:$0xff]  ;;  %v7915_v63 = vpop.permute.xlu1 %7914  ;;  %vm7932_vm15 = vcmp.eq.s32.totalorder %v7918_v62, 1 }
 0xdc8   : > { %9428 = vmatmul.mubr.msk.f32.vlgmr.msra.gmra.mrb[124].mxu1 %vm1119_vm2, %v7141_v4  ;;  %v9572_v5 = vpack.c.bf16 %v7947_v19, %v7946_v53  ;;  %vm7931_vm14 = vcmp.eq.s32.totalorder %v7915_v63, 1 }
 0xdc9   : > { %9423 = vmatmul.mubr.msk.f32.vlgmr.msra.gmra.mrb[112].mxu0 %vm1119_vm2, %v7140_v32  ;;  %9569 = vmatprep.subr.bf16.mxu1 %v9568_v17 }
 0xdca   : > { %9431 = vmatpush3.msra.mxu0 %v8455_v56  ;;  %9571 = vmatpush3.bf16.msra.mxu1 %v9568_v17  ;;  %v7924_v55 = vpop.permute.xlu0 %7923 }
 0xdcb   : > { %9573 = vmatprep.subr.bf16.mxu1 %v9572_v5  ;;  %v7921_v0 = vpop.permute.xlu1 %7920 }
 0xdcc   : > { %vm7933_vm1 = vcmp.eq.s32.totalorder %v7921_v0, 1 }
 0xdce   : > { %9575 = vmatpush3.bf16.msra.mxu1 %v9572_v5 }
 0xdcf   : > { %v7927_v3 = vpop.permute.xlu1 %7926 }
 0xdd0   : > { %vm7935_vm3 = vcmp.eq.s32.totalorder %v7927_v3, 1 }
 0xe8f   : > { %v7284_v57 = vpop.f32.mrb[118].mxu1 }
 0xe90   : > { %v7211_v29 = vpop.f32.mrb[106].mxu0  ;;  %v9399_v37 = vpop.f32.mrb[119].mxu1 }
 0xe91   : > { %v9394_v33 = vpop.f32.mrb[107].mxu0  ;;  %9432 = vmatprep.mubr.msk.f32.mxu0 %vm1119_vm2, %v7211_v29 }
 0xe92   : > { %9433 = vmatmul.mubr.msk.f32.vlgmr.msra.gmra.mrb[60].mxu0 %vm1119_vm2, %v7284_v57 }
 0xe93   : > { %v7430_v10 = vpop.f32.mrb[120].mxu1 }
 0xe94   : > { %v7357_v39 = vpop.f32.mrb[108].mxu0  ;;  %v9409_v44 = vpop.f32.mrb[121].mxu1 }
 0xe95   : > { %v9404_v25 = vpop.f32.mrb[109].mxu0  ;;  %9435 = vmatprep.mubr.msk.f32.mxu0 %vm1119_vm2, %v7357_v39 }
 0xe96   : > { %9436 = vmatmul.mubr.msk.f32.gmra.mrb[62].mxu0 %vm1119_vm2, %v7430_v10 }
 0xe97   : > { %v7576_v9 = vpop.f32.mrb[122].mxu1 }
 0xe98   : > { %v7503_v40 = vpop.f32.mrb[110].mxu0  ;;  %v9419_v24 = vpop.f32.mrb[123].mxu1 }
 0xe99   : > { %v9414_v42 = vpop.f32.mrb[111].mxu0  ;;  %9438 = vmatprep.mubr.msk.f32.mxu0 %vm1119_vm2, %v7503_v40 }
 0xe9a   : > { %9439 = vmatmul.mubr.msk.f32.gmra.mrb[64].mxu0 %vm1119_vm2, %v7576_v9 }
 0xe9b   : > { %v7722_v48 = vpop.f32.mrb[124].mxu1 }
 0xe9c   : > { %v7649_v51 = vpop.f32.mrb[112].mxu0  ;;  %v9429_v52 = vpop.f32.mrb[125].mxu1 }
 0xe9d   : > { %v9424_v2 = vpop.f32.mrb[113].mxu0  ;;  %9441 = vmatprep.mubr.msk.f32.mxu0 %vm1119_vm2, %v7649_v51 }
 0xe9e   : > { %9442 = vmatmul.mubr.msk.f32.gmra.mrb[66].mxu0 %vm1119_vm2, %v7722_v48  ;;  %vm7934_vm2 = vcmp.eq.s32.totalorder %v7924_v55, 1 }
 0xf65   : > { %v9434_v26 = vpop.f32.mrb[60].mxu0 }
 0xf66   : > { %v7889_v16 = vadd.f32 %v9434_v26, %v8464_v46  ;;  %v7818_v30 = vpop.f32.mrb[61].mxu0 }
 0xf67   : > { %v7888_v1 = vadd.f32 %v8464_v46, %v7818_v30 }
 0xf68   : > { %v7937_v21 = vsel %vm7929_vm12, %v7889_v16, 0.0 }
 0xf69   : > { %v7936_v20 = vsel %vm7928_vm11, %v7888_v1, 0.0  ;;  %v9437_v11 = vpop.f32.mrb[62].mxu0 }
 0xf6a   : > { %v7891_v28 = vadd.f32 %v9437_v11, %v8464_v46  ;;  %v7828_v15 = vpop.f32.mrb[63].mxu0  ;;  %9452 = vmatprep.mubr.msk.f32.mxu1 %vm475_vm0, %v7936_v20 }
 0xf6b   : > { %v7890_v47 = vadd.f32 %v8464_v46, %v7828_v15  ;;  %9453 = vmatmul.mubr.msk.f32.vlgmr.msra.gmra.mrb[126].mxu1 %vm475_vm0, %v7937_v21 }
 0xf6c   : > { %v7939_v43 = vsel %vm7931_vm14, %v7891_v28, 0.0 }
 0xf6d   : > { %v7938_v36 = vsel %vm7930_vm13, %v7890_v47, 0.0  ;;  %v9440_v38 = vpop.f32.mrb[64].mxu0 }
 0xf6e   : > { %v7893_v45 = vadd.f32 %v9440_v38, %v8464_v46  ;;  %v7838_v31 = vpop.f32.mrb[65].mxu0  ;;  %9455 = vmatprep.mubr.msk.f32.mxu1 %vm475_vm0, %v7938_v36 }
 0xf6f   : > { %v7892_v50 = vadd.f32 %v8464_v46, %v7838_v31  ;;  %9456 = vmatmul.mubr.msk.f32.gmra.mrb[128].mxu1 %vm475_vm0, %v7939_v43 }
 0xf70   : > { %v7941_v60 = vsel %vm7933_vm1, %v7893_v45, 0.0 }
 0xf71   : > { %v7940_v12 = vsel %vm7932_vm15, %v7892_v50, 0.0  ;;  %v9443_v54 = vpop.f32.mrb[66].mxu0 }
 0xf72   : > { %v7895_v34 = vadd.f32 %v9443_v54, %v8464_v46  ;;  %v7848_v14 = vpop.f32.mrb[67].mxu0  ;;  %9458 = vmatprep.mubr.msk.f32.mxu1 %vm475_vm0, %v7940_v12 }
 0xf73   : > { %v7894_v22 = vadd.f32 %v8464_v46, %v7848_v14  ;;  %9459 = vmatmul.mubr.msk.f32.gmra.mrb[130].mxu1 %vm475_vm0, %v7941_v60 }
 0xf74   : > { %v7943_v13 = vsel %vm7935_vm3, %v7895_v34, 0.0 }
 0xf75   : > { %v7942_v18 = vsel %vm7934_vm2, %v7894_v22, 0.0 }
 0xf76   : > { %9461 = vmatprep.mubr.msk.f32.mxu1 %vm475_vm0, %v7942_v18 }
 0xf77   : > { %9462 = vmatmul.mubr.msk.f32.gmra.mrb[132].mxu1 %vm475_vm0, %v7943_v13 }
0x103e   : > { %v9454_v8 = vpop.f32.mrb[126].mxu1 }
0x103f   : > { %v8051_v61 = vadd.f32 %v9454_v8, %v8465_v58  ;;  %v8045_v35 = vpop.f32.mrb[127].mxu1 }
0x1040   : > { %v8046_v49 = vadd.f32 %v8465_v58, %v8045_v35 }
0x1041   : > { %v8085_v7 = vsel %vm7929_vm12, %v8051_v61, 0.0 }
0x1042   : > { %8093 = vst.msk [vmem:[%s10871_s15 + $0x8] sm:$0xff] %vm475_vm0, %v8085_v7  ;;  %v8084_v4 = vsel %vm7928_vm11, %v8046_v49, 0.0  ;;  %v9457_v32 = vpop.f32.mrb[128].mxu1 }
0x1043   : > { %8092 = vst.msk [vmem:[%s10871_s15] sm:$0xff] %vm475_vm0, %v8084_v4  ;;  %v8061_v56 = vadd.f32 %v9457_v32, %v8465_v58  ;;  %v8055_v27 = vpop.f32.mrb[129].mxu1 }
0x1044   : > { %v8056_v23 = vadd.f32 %v8465_v58, %v8055_v27 }
0x1045   : > { %v8087_v17 = vsel %vm7931_vm14, %v8061_v56, 0.0 }
0x1046   : > { %8095 = vst.msk [vmem:[%s10871_s15 + $0x18] sm:$0xff] %vm475_vm0, %v8087_v17  ;;  %v8086_v57 = vsel %vm7930_vm13, %v8056_v23, 0.0  ;;  %v9460_v29 = vpop.f32.mrb[130].mxu1 }
0x1047   : > { %8094 = vst.msk [vmem:[%s10871_s15 + $0x10] sm:$0xff] %vm475_vm0, %v8086_v57  ;;  %v8071_v37 = vadd.f32 %v9460_v29, %v8465_v58  ;;  %v8065_v33 = vpop.f32.mrb[131].mxu1 }
0x1048   : > { %v8066_v10 = vadd.f32 %v8465_v58, %v8065_v33 }
0x1049   : > { %v8089_v39 = vsel %vm7933_vm1, %v8071_v37, 0.0 }
0x104a   : > { %8097 = vst.msk [vmem:[%s10871_s15 + $0x28] sm:$0xff] %vm475_vm0, %v8089_v39  ;;  %v8088_v44 = vsel %vm7932_vm15, %v8066_v10, 0.0  ;;  %v9463_v25 = vpop.f32.mrb[132].mxu1 }
0x104b   : > { %8096 = vst.msk [vmem:[%s10871_s15 + $0x20] sm:$0xff] %vm475_vm0, %v8088_v44  ;;  %v8081_v9 = vadd.f32 %v9463_v25, %v8465_v58  ;;  %v8075_v40 = vpop.f32.mrb[133].mxu1 }
0x104c   : > { %v8076_v24 = vadd.f32 %v8465_v58, %v8075_v40 }
0x104d   : > { %v8091_v42 = vsel %vm7935_vm3, %v8081_v9, 0.0 }
0x104e   : > { %8099 = vst.msk [vmem:[%s10871_s15 + $0x38] sm:$0xff] %vm475_vm0, %v8091_v42  ;;  %v8090_v48 = vsel %vm7934_vm2, %v8076_v24, 0.0 }
0x104f   : > { %8098 = vst.msk [vmem:[%s10871_s15 + $0x30] sm:$0xff] %vm475_vm0, %v8090_v48 }
0x1050 PF: > { %s22_s21 = sadd.s32 1, %s9749_s21  }
0x1051   : > { %p19_p5 = scmp.ge.s32.totalorder %s22_s21, 4  }
0x1053   :  { %21 = sbr.rel (!%p19_p5) target bundleno = 1 (0x1), region = 116 }

</bundles_post_ra>
